<compile_context>
chip_gen: v5e
topology: v5e:2x2
jax: 0.10.0
libtpu: 0.0.40
codegen_flags: <defaults>
</compile_context>

<pallas_src>
import functools

import jax
import jax.numpy as jnp
from jax.experimental import pallas as pl
from jax.experimental.pallas import tpu as pltpu


def _round_up(x, m):
    return (x + m - 1) // m * m


def _cdiv(a, b):
    return -(-a // b)


@functools.lru_cache(maxsize=None)
def _vmem_limit():
    """Per-generation VMEM budget (v7x only has 64 MiB; v5e/v6e have 128)."""
    try:
        cap = pltpu.get_tpu_info().vmem_capacity_bytes
        return int(min(cap * 0.65, 100 * 1024 * 1024))
    except Exception:
        return 40 * 1024 * 1024


def _const_spec(shape):
    """BlockSpec for a grid-invariant operand; single-buffered when supported."""
    imap = lambda *_: (0,) * len(shape)
    try:
        return pl.BlockSpec(shape, imap, pipeline_mode=pl.Buffered(1))
    except (TypeError, AttributeError):
        return pl.BlockSpec(shape, imap)


# ---------------------------------------------------------------------------
# Kernel B: 1x1 conv (conv3) + BN + shortcut + ReLU
# ---------------------------------------------------------------------------
def _mm_bn_res_kernel(x_ref, w_ref, s_ref, b_ref, r_ref, o_ref, *, relu):
    acc = jnp.dot(x_ref[...], w_ref[...], preferred_element_type=jnp.float32)
    out = acc * s_ref[...] + b_ref[...] + r_ref[...].astype(jnp.float32)
    if relu:
        out = jnp.maximum(out, 0.0)
    o_ref[...] = out.astype(o_ref.dtype)


def _mm_bn_proj_res_kernel(x_ref, w_ref, s_ref, b_ref,
                           r_ref, wr_ref, sr_ref, br_ref, o_ref, *, relu):
    acc = jnp.dot(x_ref[...], w_ref[...], preferred_element_type=jnp.float32)
    accr = jnp.dot(r_ref[...], wr_ref[...], preferred_element_type=jnp.float32)
    out = acc * s_ref[...] + b_ref[...] + accr * sr_ref[...] + br_ref[...]
    if relu:
        out = jnp.maximum(out, 0.0)
    o_ref[...] = out.astype(o_ref.dtype)


def _choose_tm(M, K, Nc, Kr):
    """Row tile for the matmul kernel: footprint-aware, no forced 2-way split,
    single full-size tile for small M (avoids per-step overhead and row pads)."""
    budget = min(int(_vmem_limit() * 0.55), 24 * 1024 * 1024)

    def footprint(tm):
        act = 2 * tm * (K + Kr + Nc) * 2      # double-buffered bf16 tiles
        wts = (K + Kr) * Nc * 2               # single-buffered bf16 weights
        eps = 3 * tm * Nc * 4                 # rough f32 epilogue temporaries
        return act + wts + eps

    tm = min(1024, _round_up(M, 8))
    while tm > 8 and footprint(tm) > budget:
        tm = _round_up(tm // 2, 8)
    if M <= tm:
        return M, M                           # block == full dim, no padding
    ntiles = _cdiv(M, tm)
    tm = _round_up(_cdiv(M, ntiles), 8)
    return tm, tm * ntiles


def fused_matmul_bn_shortcut(x, w, scale, bias, residual, *,
                             residual_w=None, residual_scale=None,
                             residual_bias=None, relu=True,
                             out_dtype=jnp.bfloat16):
    """out = relu((x @ w) * scale + bias + shortcut), shortcut = identity add
    or a fused projection matmul + BN."""
    M, K = x.shape
    Nc = w.shape[1]
    Kr = residual.shape[1] if residual_w is not None else 0
    tm, Mp = _choose_tm(M, K, Nc, Kr)
    if Mp != M:
        # TODO(synk): mask the ragged last row-tile in-kernel instead of an
        # HBM row pad (not hit for typical N*H*W row counts).
        x = jnp.pad(x, ((0, Mp - M), (0, 0)))
        residual = jnp.pad(residual, ((0, Mp - M), (0, 0)))

    s2 = scale.reshape(1, Nc).astype(jnp.float32)
    b2 = bias.reshape(1, Nc).astype(jnp.float32)

    in_specs = [
        pl.BlockSpec((tm, K), lambda i: (i, 0)),
        _const_spec((K, Nc)),
        _const_spec((1, Nc)),
        _const_spec((1, Nc)),
    ]
    args = [x, w, s2, b2]

    if residual_w is None:
        kernel = functools.partial(_mm_bn_res_kernel, relu=relu)
        in_specs.append(pl.BlockSpec((tm, Nc), lambda i: (i, 0)))
        args.append(residual)
    else:
        kernel = functools.partial(_mm_bn_proj_res_kernel, relu=relu)
        in_specs += [
            pl.BlockSpec((tm, Kr), lambda i: (i, 0)),
            _const_spec((Kr, Nc)),
            _const_spec((1, Nc)),
            _const_spec((1, Nc)),
        ]
        args += [residual, residual_w,
                 residual_scale.reshape(1, Nc).astype(jnp.float32),
                 residual_bias.reshape(1, Nc).astype(jnp.float32)]

    out = pl.pallas_call(
        kernel,
        out_shape=jax.ShapeDtypeStruct((Mp, Nc), out_dtype),
        grid_spec=pltpu.PrefetchScalarGridSpec(
            num_scalar_prefetch=0,
            grid=(Mp // tm,),
            in_specs=in_specs,
            out_specs=pl.BlockSpec((tm, Nc), lambda i: (i, 0)),
        ),
        compiler_params=pltpu.CompilerParams(
            dimension_semantics=("parallel",),
            vmem_limit_bytes=_vmem_limit()),
    )(*args)
    return out[:M] if Mp != M else out


# ---------------------------------------------------------------------------
# Kernel A: fused 1x1 conv + BN + ReLU  ->  3x3 conv (stride, pad=1) + BN + ReLU
# ---------------------------------------------------------------------------
def _choose_th(Ho, Wo, Co, acc_bytes=384 * 1024):
    """Output-row tile: a divisor of Ho with (th*Wo) % 8 == 0 and a bounded
    f32 accumulator; prefer >=2 tiles per image so output DMA pipelines."""
    max_rows = max(8, acc_bytes // (4 * Co))
    best = None
    for d in range(1, Ho):
        if Ho % d == 0 and (d * Wo) % 8 == 0 and d * Wo <= max_rows:
            best = d
    return best if best is not None else Ho


def _conv1_conv2_kernel(x_ref, w1_ref, s1_ref, b1_ref,
                        w2_ref, s2_ref, b2_ref, o_ref, xpad_ref,
                        *, H, W, Ho, Wo, th, stride):
    Cin = x_ref.shape[-1]
    C = xpad_ref.shape[-1]          # padded mid channels
    Co = o_ref.shape[-1]
    j = pl.program_id(1)

    # Once per image: 1x1 conv + BN1 + ReLU directly into the spatially
    # padded VMEM scratch (no HBM round-trip, no HBM pad pass).
    @pl.when(j == 0)
    def _():
        xin = x_ref[0].reshape(H * W, Cin)
        h1 = jnp.dot(xin, w1_ref[...], preferred_element_type=jnp.float32)
        h1 = jnp.maximum(h1 * s1_ref[...] + b1_ref[...], 0.0)
        xpad_ref[...] = jnp.zeros(xpad_ref.shape, xpad_ref.dtype)
        xpad_ref[1:H + 1, 1:W + 1, :] = h1.reshape(H, W, C).astype(xpad_ref.dtype)

    # 3x3 conv for this tile of output rows: 3 matmuls with K = 3*C
    # (the three kx taps are folded into the contraction).
    row0 = pl.multiple_of(j * (th * stride), th * stride)
    acc = jnp.zeros((th * Wo, Co), jnp.float32)
    for ky in range(3):
        taps = []
        for kx in range(3):
            if stride == 1:
                blk = xpad_ref[pl.ds(row0 + ky, th), pl.ds(kx, Wo), :]
            else:
                blk = xpad_ref[pl.ds(row0 + ky, th, stride),
                               pl.ds(kx, Wo, stride), :]
            taps.append(blk.reshape(th * Wo, C))
        lhs = jnp.concatenate(taps, axis=-1)                    # (th*Wo, 3C)
        acc = acc + jnp.dot(lhs, w2_ref[ky],
                            preferred_element_type=jnp.float32)
    out = jnp.maximum(acc * s2_ref[...] + b2_ref[...], 0.0)
    o_ref[...] = out[None].astype(o_ref.dtype)


def conv1_conv2_fused(xb, w1, s1, b1, w2f, s2, b2, *, stride,
                      out_dtype=jnp.bfloat16):
    """xb: (N, H, W, Cin_p) bf16; w1: (Cin_p, C); w2f: (3, 3C, C) (kx folded).
    Returns (N, Ho*Wo, C)."""
    N, H, W, Cin = xb.shape
    C = w1.shape[1]
    Ho = (H - 1) // stride + 1
    Wo = (W - 1) // stride + 1
    th = _choose_th(Ho, Wo, C)
    n_tiles = Ho // th

    s1r = s1.reshape(1, C).astype(jnp.float32)
    b1r = b1.reshape(1, C).astype(jnp.float32)
    s2r = s2.reshape(1, C).astype(jnp.float32)
    b2r = b2.reshape(1, C).astype(jnp.float32)

    kernel = functools.partial(_conv1_conv2_kernel, H=H, W=W, Ho=Ho, Wo=Wo,
                               th=th, stride=stride)
    return pl.pallas_call(
        kernel,
        out_shape=jax.ShapeDtypeStruct((N, Ho * Wo, C), out_dtype),
        grid_spec=pltpu.PrefetchScalarGridSpec(
            num_scalar_prefetch=0,
            grid=(N, n_tiles),
            in_specs=[
                pl.BlockSpec((1, H, W, Cin), lambda n, j: (n, 0, 0, 0)),
                _const_spec((Cin, C)),          # w1
                _const_spec((1, C)),            # s1
                _const_spec((1, C)),            # b1
                _const_spec((3, 3 * C, C)),     # w2 (kx folded)
                _const_spec((1, C)),            # s2
                _const_spec((1, C)),            # b2
            ],
            out_specs=pl.BlockSpec((1, th * Wo, C), lambda n, j: (n, j, 0)),
            scratch_shapes=[
                pltpu.VMEM((stride * Ho + 2, stride * Wo + 2, C), jnp.bfloat16),
            ],
        ),
        compiler_params=pltpu.CompilerParams(
            dimension_semantics=("parallel", "arbitrary"),
            vmem_limit_bytes=_vmem_limit()),
    )(xb, w1, s1r, b1r, w2f, s2r, b2r)


# ---------------------------------------------------------------------------
# Glue: BN folding, padding helpers, full forward
# ---------------------------------------------------------------------------
def bn_fold(gamma, beta, mean, var, eps=1e-5):
    s = gamma / jnp.sqrt(var + eps)
    return s, beta - mean * s


def _pad_vec(v, n):
    return jnp.pad(v, (0, n - v.shape[0]))


def _pad_mat(m, r, c):
    return jnp.pad(m, ((0, r - m.shape[0]), (0, c - m.shape[1])))


def bottleneck_forward(x_nchw, params, stride):
    N, Cin, H, W = x_nchw.shape
    w1 = params["w1"]
    planes = w1.shape[0]
    w3 = params["w3"]
    cout = w3.shape[0]

    cin_p = _round_up(Cin, 128)
    mid_p = _round_up(planes, 128)
    out_p = _round_up(cout, 128)

    # bf16 first, then the NCHW->NHWC transpose + channel pad (halves the HBM
    # bytes of those two XLA passes)
    xb = jnp.transpose(x_nchw.astype(jnp.bfloat16), (0, 2, 3, 1))
    xb = jnp.pad(xb, ((0, 0), (0, 0), (0, 0), (0, cin_p - Cin)))

    # fold BN params, pad channels (padded channels get scale=0, bias=0)
    s1, b1 = bn_fold(*params["bn1"])
    s1, b1 = _pad_vec(s1, mid_p), _pad_vec(b1, mid_p)
    s2, b2 = bn_fold(*params["bn2"])
    s2, b2 = _pad_vec(s2, mid_p), _pad_vec(b2, mid_p)
    s3, b3 = bn_fold(*params["bn3"])
    s3, b3 = _pad_vec(s3, out_p), _pad_vec(b3, out_p)

    w1m = _pad_mat(w1[:, :, 0, 0].T, cin_p, mid_p).astype(jnp.bfloat16)
    w2t = jnp.transpose(params["w2"], (2, 3, 1, 0))           # (ky, kx, ci, co)
    w2t = jnp.pad(w2t, ((0, 0), (0, 0),
                        (0, mid_p - planes), (0, mid_p - planes)))
    w2f = w2t.reshape(3, 3 * mid_p, mid_p).astype(jnp.bfloat16)
    w3m = _pad_mat(w3[:, :, 0, 0].T, mid_p, out_p).astype(jnp.bfloat16)

    Ho = (H - 1) // stride + 1
    Wo = (W - 1) // stride + 1

    # conv1 + bn1 + relu + conv2(3x3, stride, pad=1) + bn2 + relu, one kernel
    try:
        out2 = conv1_conv2_fused(xb, w1m, s1, b1, w2f, s2, b2, stride=stride)
    except Exception:
        # Safety net: a strided 3x3 conv equals the dense one decimated at the
        # output, so reuse the (well-tested) stride-1 kernel + an XLA slice.
        dense = conv1_conv2_fused(xb, w1m, s1, b1, w2f, s2, b2, stride=1)
        dense = dense.reshape(N, H, W, mid_p)
        out2 = dense[:, ::stride, ::stride, :].reshape(N, Ho * Wo, mid_p)
    out2 = out2.reshape(N * Ho * Wo, mid_p)

    # conv3 (1x1) + bn3 + shortcut + relu -- single fused kernel, bf16 out
    if stride != 1 or Cin != cout:
        ss, bs = bn_fold(*params["bns"])
        ss, bs = _pad_vec(ss, out_p), _pad_vec(bs, out_p)
        wsm = _pad_mat(params["ws"][:, :, 0, 0].T, cin_p, out_p
                       ).astype(jnp.bfloat16)
        # TODO(synk): for stride 2, emit the decimated shortcut input as a
        # second output of the fused conv1/conv2 kernel to avoid re-reading x.
        xs = xb[:, ::stride, ::stride, :].reshape(N * Ho * Wo, cin_p)
        out = fused_matmul_bn_shortcut(out2, w3m, s3, b3, xs,
                                       residual_w=wsm, residual_scale=ss,
                                       residual_bias=bs, relu=True)
    else:
        out = fused_matmul_bn_shortcut(out2, w3m, s3, b3,
                                       xb.reshape(N * H * W, cin_p), relu=True)

    out = out.reshape(N, Ho, Wo, out_p)[..., :cout]
    return jnp.transpose(out, (0, 3, 1, 2)).astype(jnp.float32)   # NHWC->NCHW


# ---------------------------------------------------------------------------
# Pure-JAX reference (lax.conv, f32) for correctness checking
# ---------------------------------------------------------------------------
def ref_forward(x, params, stride, eps=1e-5):
    def conv(x, w, stride=1, pad=0):
        return jax.lax.conv_general_dilated(
            x, w, (stride, stride), [(pad, pad), (pad, pad)],
            dimension_numbers=("NCHW", "OIHW", "NCHW"))

    def bn(x, p):
        g, b, m, v = p
        s = g / jnp.sqrt(v + eps)
        return x * s[None, :, None, None] + (b - m * s)[None, :, None, None]

    out = jax.nn.relu(bn(conv(x, params["w1"]), params["bn1"]))
    out = jax.nn.relu(bn(conv(out, params["w2"], stride=stride, pad=1),
                         params["bn2"]))
    out = bn(conv(out, params["w3"]), params["bn3"])
    cout = params["w3"].shape[0]
    if stride != 1 or x.shape[1] != cout:
        sc = bn(conv(x, params["ws"], stride=stride), params["bns"])
    else:
        sc = x
    return jax.nn.relu(out + sc)


def make_params(key, in_planes, planes, stride, expansion=4):
    ks = iter(jax.random.split(key, 32))

    def w(shape, scale=0.1):
        return scale * jax.random.normal(next(ks), shape, jnp.float32)

    def bn_params(c):
        gamma = jax.random.uniform(next(ks), (c,), jnp.float32, 0.5, 1.5)
        beta = 0.1 * jax.random.normal(next(ks), (c,), jnp.float32)
        mean = 0.1 * jax.random.normal(next(ks), (c,), jnp.float32)
        var = jax.random.uniform(next(ks), (c,), jnp.float32, 0.5, 1.5)
        return (gamma, beta, mean, var)

    cout = expansion * planes
    params = {
        "w1": w((planes, in_planes, 1, 1)),
        "bn1": bn_params(planes),
        "w2": w((planes, planes, 3, 3)),
        "bn2": bn_params(planes),
        "w3": w((cout, planes, 1, 1)),
        "bn3": bn_params(cout),
    }
    if stride != 1 or in_planes != cout:
        params["ws"] = w((cout, in_planes, 1, 1))
        params["bns"] = bn_params(cout)
    return params


if __name__ == "__main__":
    key = jax.random.PRNGKey(0)
    configs = [
        # (N, in_planes, planes, H, W, stride)
        (2, 16, 8, 8, 8, 1),   # stride 1, projection shortcut (channel mism.)
        (2, 16, 8, 8, 8, 2),   # stride 2, in-kernel strided 3x3 + projection
        (2, 32, 8, 8, 8, 1),   # stride 1, identity shortcut
    ]
    for idx, (N, in_planes, planes, H, W, stride) in enumerate(configs):
        kx_, kp_, key = jax.random.split(key, 3)
        x = jax.random.normal(kx_, (N, in_planes, H, W), jnp.float32)
        params = make_params(kp_, in_planes, planes, stride)

        out = jax.block_until_ready(bottleneck_forward(x, params, stride))
        ref = jax.block_until_ready(ref_forward(x, params, stride))

        assert out.shape == ref.shape, (idx, out.shape, ref.shape)
        max_err = float(jnp.max(jnp.abs(out - ref)))
        assert jnp.allclose(out, ref, atol=3e-2, rtol=3e-2), (idx, max_err)

    print("KERNEL_OK")
</pallas_src>

<mosaic_0001>
module attributes {stable_mosaic.version = 11 : i64} {
  func.func @_conv1_conv2_kernel(%arg0: i32, %arg1: i32, %arg2: memref<1x8x8x128xbf16, #tpu.memory_space<vmem>>, %arg3: memref<128x128xbf16, #tpu.memory_space<vmem>>, %arg4: memref<1x128xf32, #tpu.memory_space<vmem>>, %arg5: memref<1x128xf32, #tpu.memory_space<vmem>>, %arg6: memref<3x384x128xbf16, #tpu.memory_space<vmem>>, %arg7: memref<1x128xf32, #tpu.memory_space<vmem>>, %arg8: memref<1x128xf32, #tpu.memory_space<vmem>>, %arg9: memref<1x32x128xbf16, #tpu.memory_space<vmem>>, %arg10: memref<10x10x128xbf16, #tpu.memory_space<vmem>>) attributes {dimension_semantics = [#tpu.dimension_semantics<parallel>, #tpu.dimension_semantics<arbitrary>], iteration_bounds = array<i64: 2, 2>, scalar_prefetch = 0 : i64, scratch_operands = 1 : i64, tpu.core_type = #tpu.core_type<tc>, window_params = [{transform_indices = @transform_0, window_bounds = array<i64: 1, 8, 8, 128>}, {pipeline_mode = #tpu.pipeline_mode<synchronous>, transform_indices = @transform_1, window_bounds = array<i64: 128, 128>}, {pipeline_mode = #tpu.pipeline_mode<synchronous>, transform_indices = @transform_2, window_bounds = array<i64: 1, 128>}, {pipeline_mode = #tpu.pipeline_mode<synchronous>, transform_indices = @transform_3, window_bounds = array<i64: 1, 128>}, {pipeline_mode = #tpu.pipeline_mode<synchronous>, transform_indices = @transform_4, window_bounds = array<i64: 3, 384, 128>}, {pipeline_mode = #tpu.pipeline_mode<synchronous>, transform_indices = @transform_5, window_bounds = array<i64: 1, 128>}, {pipeline_mode = #tpu.pipeline_mode<synchronous>, transform_indices = @transform_6, window_bounds = array<i64: 1, 128>}, {transform_indices = @transform_7, window_bounds = array<i64: 1, 32, 128>}]} {
    %c0_i32 = arith.constant 0 : i32
    %0 = arith.cmpi eq, %arg1, %c0_i32 : i32
    %1 = arith.extui %0 : i1 to i32
    %c0_i32_0 = arith.constant 0 : i32
    %2 = arith.cmpi ne, %1, %c0_i32_0 : i32
    scf.if %2 {
      %c0_43 = arith.constant 0 : index
      %c0_44 = arith.constant 0 : index
      %c0_45 = arith.constant 0 : index
      %c0_46 = arith.constant 0 : index
      %68 = vector.load %arg2[%c0_43, %c0_44, %c0_45, %c0_46] : memref<1x8x8x128xbf16, #tpu.memory_space<vmem>>, vector<1x8x8x128xbf16>
      %69 = vector.shape_cast %68 : vector<1x8x8x128xbf16> to vector<8x8x128xbf16>
      %70 = vector.shape_cast %69 : vector<8x8x128xbf16> to vector<64x128xbf16>
      %c0_47 = arith.constant 0 : index
      %c0_48 = arith.constant 0 : index
      %71 = vector.load %arg3[%c0_47, %c0_48] : memref<128x128xbf16, #tpu.memory_space<vmem>>, vector<128x128xbf16>
      %cst_49 = arith.constant dense<0.000000e+00> : vector<64x128xf32>
      %72 = tpu.matmul %70, %71, %cst_49 {dimension_numbers = #tpu.dot_dimension_numbers<[1], [0], [0], [1], [0, 0, 1, 1], [], []>} : vector<64x128xbf16>, vector<128x128xbf16>, vector<64x128xf32> -> vector<64x128xf32>
      %c0_50 = arith.constant 0 : index
      %c0_51 = arith.constant 0 : index
      %73 = vector.load %arg4[%c0_50, %c0_51] : memref<1x128xf32, #tpu.memory_space<vmem>>, vector<1x128xf32>
      %74 = vector.broadcast %73 : vector<1x128xf32> to vector<64x128xf32>
      %75 = arith.mulf %72, %74 : vector<64x128xf32>
      %c0_52 = arith.constant 0 : index
      %c0_53 = arith.constant 0 : index
      %76 = vector.load %arg5[%c0_52, %c0_53] : memref<1x128xf32, #tpu.memory_space<vmem>>, vector<1x128xf32>
      %77 = vector.broadcast %76 : vector<1x128xf32> to vector<64x128xf32>
      %78 = arith.addf %75, %77 : vector<64x128xf32>
      %cst_54 = arith.constant 0.000000e+00 : f32
      %79 = vector.broadcast %cst_54 : f32 to vector<64x128xf32>
      %80 = arith.maximumf %78, %79 : vector<64x128xf32>
      %cst_55 = arith.constant 0.000000e+00 : bf16
      %81 = vector.broadcast %cst_55 : bf16 to vector<10x10x128xbf16>
      %c0_56 = arith.constant 0 : index
      %c0_57 = arith.constant 0 : index
      %c0_58 = arith.constant 0 : index
      %82 = vector.load %arg10[%c0_56, %c0_57, %c0_58] : memref<10x10x128xbf16, #tpu.memory_space<vmem>>, vector<10x10x128xbf16>
      tpu.vector_store %arg10[%c0_56, %c0_57, %c0_58], %81 {strides = array<i32>} : memref<10x10x128xbf16, #tpu.memory_space<vmem>>, vector<10x10x128xbf16>,
      %83 = vector.shape_cast %80 : vector<64x128xf32> to vector<8x8x128xf32>
      %84 = arith.truncf %83 : vector<8x8x128xf32> to vector<8x8x128xbf16>
      %c1_59 = arith.constant 1 : index
      %c1_60 = arith.constant 1 : index
      %c0_61 = arith.constant 0 : index
      %85 = vector.load %arg10[%c1_59, %c1_60, %c0_61] : memref<10x10x128xbf16, #tpu.memory_space<vmem>>, vector<8x8x128xbf16>
      tpu.vector_store %arg10[%c1_59, %c1_60, %c0_61], %84 {strides = array<i32>} : memref<10x10x128xbf16, #tpu.memory_space<vmem>>, vector<8x8x128xbf16>,
    } else {
    }
    %c4_i32 = arith.constant 4 : i32
    %3 = arith.muli %arg1, %c4_i32 : i32
    %4 = tpu.assume_multiple %3, 4 : i32
    %cst = arith.constant 0.000000e+00 : f32
    %5 = vector.broadcast %cst : f32 to vector<32x128xf32>
    %c0_i32_1 = arith.constant 0 : i32
    %6 = arith.addi %4, %c0_i32_1 : i32
    %7 = arith.index_cast %6 : i32 to index
    %c0 = arith.constant 0 : index
    %c0_2 = arith.constant 0 : index
    %8 = vector.load %arg10[%7, %c0, %c0_2] : memref<10x10x128xbf16, #tpu.memory_space<vmem>>, vector<4x8x128xbf16>
    %9 = vector.shape_cast %8 : vector<4x8x128xbf16> to vector<32x128xbf16>
    %c0_i32_3 = arith.constant 0 : i32
    %10 = arith.addi %4, %c0_i32_3 : i32
    %11 = arith.index_cast %10 : i32 to index
    %c1 = arith.constant 1 : index
    %c0_4 = arith.constant 0 : index
    %12 = vector.load %arg10[%11, %c1, %c0_4] : memref<10x10x128xbf16, #tpu.memory_space<vmem>>, vector<4x8x128xbf16>
    %13 = vector.shape_cast %12 : vector<4x8x128xbf16> to vector<32x128xbf16>
    %c0_i32_5 = arith.constant 0 : i32
    %14 = arith.addi %4, %c0_i32_5 : i32
    %15 = arith.index_cast %14 : i32 to index
    %c2 = arith.constant 2 : index
    %c0_6 = arith.constant 0 : index
    %16 = vector.load %arg10[%15, %c2, %c0_6] : memref<10x10x128xbf16, #tpu.memory_space<vmem>>, vector<4x8x128xbf16>
    %17 = vector.shape_cast %16 : vector<4x8x128xbf16> to vector<32x128xbf16>
    %18 = tpu.concatenate %9, %13, %17 in 1 : vector<32x128xbf16>, vector<32x128xbf16>, vector<32x128xbf16> -> vector<32x384xbf16>
    %c0_7 = arith.constant 0 : index
    %c0_8 = arith.constant 0 : index
    %c0_9 = arith.constant 0 : index
    %19 = vector.load %arg6[%c0_7, %c0_8, %c0_9] : memref<3x384x128xbf16, #tpu.memory_space<vmem>>, vector<1x384x128xbf16>
    %20 = vector.shape_cast %19 : vector<1x384x128xbf16> to vector<384x128xbf16>
    %cst_10 = arith.constant dense<0.000000e+00> : vector<32x128xf32>
    %21 = tpu.matmul %18, %20, %cst_10 {dimension_numbers = #tpu.dot_dimension_numbers<[1], [0], [0], [1], [0, 0, 1, 1], [], []>} : vector<32x384xbf16>, vector<384x128xbf16>, vector<32x128xf32> -> vector<32x128xf32>
    %22 = arith.addf %5, %21 : vector<32x128xf32>
    %c1_i32 = arith.constant 1 : i32
    %23 = arith.addi %4, %c1_i32 : i32
    %24 = arith.index_cast %23 : i32 to index
    %c0_11 = arith.constant 0 : index
    %c0_12 = arith.constant 0 : index
    %25 = vector.load %arg10[%24, %c0_11, %c0_12] : memref<10x10x128xbf16, #tpu.memory_space<vmem>>, vector<4x8x128xbf16>
    %26 = vector.shape_cast %25 : vector<4x8x128xbf16> to vector<32x128xbf16>
    %c1_i32_13 = arith.constant 1 : i32
    %27 = arith.addi %4, %c1_i32_13 : i32
    %28 = arith.index_cast %27 : i32 to index
    %c1_14 = arith.constant 1 : index
    %c0_15 = arith.constant 0 : index
    %29 = vector.load %arg10[%28, %c1_14, %c0_15] : memref<10x10x128xbf16, #tpu.memory_space<vmem>>, vector<4x8x128xbf16>
    %30 = vector.shape_cast %29 : vector<4x8x128xbf16> to vector<32x128xbf16>
    %c1_i32_16 = arith.constant 1 : i32
    %31 = arith.addi %4, %c1_i32_16 : i32
    %32 = arith.index_cast %31 : i32 to index
    %c2_17 = arith.constant 2 : index
    %c0_18 = arith.constant 0 : index
    %33 = vector.load %arg10[%32, %c2_17, %c0_18] : memref<10x10x128xbf16, #tpu.memory_space<vmem>>, vector<4x8x128xbf16>
    %34 = vector.shape_cast %33 : vector<4x8x128xbf16> to vector<32x128xbf16>
    %35 = tpu.concatenate %26, %30, %34 in 1 : vector<32x128xbf16>, vector<32x128xbf16>, vector<32x128xbf16> -> vector<32x384xbf16>
    %c1_19 = arith.constant 1 : index
    %c0_20 = arith.constant 0 : index
    %c0_21 = arith.constant 0 : index
    %36 = vector.load %arg6[%c1_19, %c0_20, %c0_21] : memref<3x384x128xbf16, #tpu.memory_space<vmem>>, vector<1x384x128xbf16>
    %37 = vector.shape_cast %36 : vector<1x384x128xbf16> to vector<384x128xbf16>
    %cst_22 = arith.constant dense<0.000000e+00> : vector<32x128xf32>
    %38 = tpu.matmul %35, %37, %cst_22 {dimension_numbers = #tpu.dot_dimension_numbers<[1], [0], [0], [1], [0, 0, 1, 1], [], []>} : vector<32x384xbf16>, vector<384x128xbf16>, vector<32x128xf32> -> vector<32x128xf32>
    %39 = arith.addf %22, %38 : vector<32x128xf32>
    %c2_i32 = arith.constant 2 : i32
    %40 = arith.addi %4, %c2_i32 : i32
    %41 = arith.index_cast %40 : i32 to index
    %c0_23 = arith.constant 0 : index
    %c0_24 = arith.constant 0 : index
    %42 = vector.load %arg10[%41, %c0_23, %c0_24] : memref<10x10x128xbf16, #tpu.memory_space<vmem>>, vector<4x8x128xbf16>
    %43 = vector.shape_cast %42 : vector<4x8x128xbf16> to vector<32x128xbf16>
    %c2_i32_25 = arith.constant 2 : i32
    %44 = arith.addi %4, %c2_i32_25 : i32
    %45 = arith.index_cast %44 : i32 to index
    %c1_26 = arith.constant 1 : index
    %c0_27 = arith.constant 0 : index
    %46 = vector.load %arg10[%45, %c1_26, %c0_27] : memref<10x10x128xbf16, #tpu.memory_space<vmem>>, vector<4x8x128xbf16>
    %47 = vector.shape_cast %46 : vector<4x8x128xbf16> to vector<32x128xbf16>
    %c2_i32_28 = arith.constant 2 : i32
    %48 = arith.addi %4, %c2_i32_28 : i32
    %49 = arith.index_cast %48 : i32 to index
    %c2_29 = arith.constant 2 : index
    %c0_30 = arith.constant 0 : index
    %50 = vector.load %arg10[%49, %c2_29, %c0_30] : memref<10x10x128xbf16, #tpu.memory_space<vmem>>, vector<4x8x128xbf16>
    %51 = vector.shape_cast %50 : vector<4x8x128xbf16> to vector<32x128xbf16>
    %52 = tpu.concatenate %43, %47, %51 in 1 : vector<32x128xbf16>, vector<32x128xbf16>, vector<32x128xbf16> -> vector<32x384xbf16>
    %c2_31 = arith.constant 2 : index
    %c0_32 = arith.constant 0 : index
    %c0_33 = arith.constant 0 : index
    %53 = vector.load %arg6[%c2_31, %c0_32, %c0_33] : memref<3x384x128xbf16, #tpu.memory_space<vmem>>, vector<1x384x128xbf16>
    %54 = vector.shape_cast %53 : vector<1x384x128xbf16> to vector<384x128xbf16>
    %cst_34 = arith.constant dense<0.000000e+00> : vector<32x128xf32>
    %55 = tpu.matmul %52, %54, %cst_34 {dimension_numbers = #tpu.dot_dimension_numbers<[1], [0], [0], [1], [0, 0, 1, 1], [], []>} : vector<32x384xbf16>, vector<384x128xbf16>, vector<32x128xf32> -> vector<32x128xf32>
    %56 = arith.addf %39, %55 : vector<32x128xf32>
    %c0_35 = arith.constant 0 : index
    %c0_36 = arith.constant 0 : index
    %57 = vector.load %arg7[%c0_35, %c0_36] : memref<1x128xf32, #tpu.memory_space<vmem>>, vector<1x128xf32>
    %58 = vector.broadcast %57 : vector<1x128xf32> to vector<32x128xf32>
    %59 = arith.mulf %56, %58 : vector<32x128xf32>
    %c0_37 = arith.constant 0 : index
    %c0_38 = arith.constant 0 : index
    %60 = vector.load %arg8[%c0_37, %c0_38] : memref<1x128xf32, #tpu.memory_space<vmem>>, vector<1x128xf32>
    %61 = vector.broadcast %60 : vector<1x128xf32> to vector<32x128xf32>
    %62 = arith.addf %59, %61 : vector<32x128xf32>
    %cst_39 = arith.constant 0.000000e+00 : f32
    %63 = vector.broadcast %cst_39 : f32 to vector<32x128xf32>
    %64 = arith.maximumf %62, %63 : vector<32x128xf32>
    %65 = vector.shape_cast %64 : vector<32x128xf32> to vector<1x32x128xf32>
    %66 = arith.truncf %65 : vector<1x32x128xf32> to vector<1x32x128xbf16>
    %c0_40 = arith.constant 0 : index
    %c0_41 = arith.constant 0 : index
    %c0_42 = arith.constant 0 : index
    %67 = vector.load %arg9[%c0_40, %c0_41, %c0_42] : memref<1x32x128xbf16, #tpu.memory_space<vmem>>, vector<1x32x128xbf16>
    tpu.vector_store %arg9[%c0_40, %c0_41, %c0_42], %66 {strides = array<i32>} : memref<1x32x128xbf16, #tpu.memory_space<vmem>>, vector<1x32x128xbf16>,
    return
  }
  func.func @transform_0(%arg0: i32, %arg1: i32) -> (i32, i32, i32, i32) {
    %c0_i32 = arith.constant 0 : i32
    %c0_i32_0 = arith.constant 0 : i32
    %c0_i32_1 = arith.constant 0 : i32
    %c0_i32_2 = arith.constant 0 : i32
    return %arg0, %c0_i32, %c0_i32_0, %c0_i32_1 : i32, i32, i32, i32
  }
  func.func @transform_1(%arg0: i32, %arg1: i32) -> (i32, i32) {
    %c0_i32 = arith.constant 0 : i32
    %c0_i32_0 = arith.constant 0 : i32
    %c0_i32_1 = arith.constant 0 : i32
    return %c0_i32, %c0_i32_0 : i32, i32
  }
  func.func @transform_2(%arg0: i32, %arg1: i32) -> (i32, i32) {
    %c0_i32 = arith.constant 0 : i32
    %c0_i32_0 = arith.constant 0 : i32
    %c0_i32_1 = arith.constant 0 : i32
    return %c0_i32, %c0_i32_0 : i32, i32
  }
  func.func @transform_3(%arg0: i32, %arg1: i32) -> (i32, i32) {
    %c0_i32 = arith.constant 0 : i32
    %c0_i32_0 = arith.constant 0 : i32
    %c0_i32_1 = arith.constant 0 : i32
    return %c0_i32, %c0_i32_0 : i32, i32
  }
  func.func @transform_4(%arg0: i32, %arg1: i32) -> (i32, i32, i32) {
    %c0_i32 = arith.constant 0 : i32
    %c0_i32_0 = arith.constant 0 : i32
    %c0_i32_1 = arith.constant 0 : i32
    %c0_i32_2 = arith.constant 0 : i32
    return %c0_i32, %c0_i32_0, %c0_i32_1 : i32, i32, i32
  }
  func.func @transform_5(%arg0: i32, %arg1: i32) -> (i32, i32) {
    %c0_i32 = arith.constant 0 : i32
    %c0_i32_0 = arith.constant 0 : i32
    %c0_i32_1 = arith.constant 0 : i32
    return %c0_i32, %c0_i32_0 : i32, i32
  }
  func.func @transform_6(%arg0: i32, %arg1: i32) -> (i32, i32) {
    %c0_i32 = arith.constant 0 : i32
    %c0_i32_0 = arith.constant 0 : i32
    %c0_i32_1 = arith.constant 0 : i32
    return %c0_i32, %c0_i32_0 : i32, i32
  }
  func.func @transform_7(%arg0: i32, %arg1: i32) -> (i32, i32, i32) {
    %c0_i32 = arith.constant 0 : i32
    %c0_i32_0 = arith.constant 0 : i32
    return %arg0, %arg1, %c0_i32 : i32, i32, i32
  }
}

module attributes {stable_mosaic.version = 11 : i64} {
  func.func @_conv1_conv2_kernel(%arg0: i32, %arg1: i32, %arg2: memref<1x8x8x128xbf16, #tpu.memory_space<vmem>>, %arg3: memref<128x128xbf16, #tpu.memory_space<vmem>>, %arg4: memref<1x128xf32, #tpu.memory_space<vmem>>, %arg5: memref<1x128xf32, #tpu.memory_space<vmem>>, %arg6: memref<3x384x128xbf16, #tpu.memory_space<vmem>>, %arg7: memref<1x128xf32, #tpu.memory_space<vmem>>, %arg8: memref<1x128xf32, #tpu.memory_space<vmem>>, %arg9: memref<1x32x128xbf16, #tpu.memory_space<vmem>>, %arg10: memref<10x10x128xbf16, #tpu.memory_space<vmem>>) attributes {dimension_semantics = [#tpu.dimension_semantics<parallel>, #tpu.dimension_semantics<arbitrary>], iteration_bounds = array<i64: 2, 2>, scalar_prefetch = 0 : i64, scratch_operands = 1 : i64, tpu.core_type = #tpu.core_type<tc>, window_params = [{transform_indices = @transform_0, window_bounds = array<i64: 1, 8, 8, 128>}, {pipeline_mode = #tpu.pipeline_mode<synchronous>, transform_indices = @transform_1, window_bounds = array<i64: 128, 128>}, {pipeline_mode = #tpu.pipeline_mode<synchronous>, transform_indices = @transform_2, window_bounds = array<i64: 1, 128>}, {pipeline_mode = #tpu.pipeline_mode<synchronous>, transform_indices = @transform_3, window_bounds = array<i64: 1, 128>}, {pipeline_mode = #tpu.pipeline_mode<synchronous>, transform_indices = @transform_4, window_bounds = array<i64: 3, 384, 128>}, {pipeline_mode = #tpu.pipeline_mode<synchronous>, transform_indices = @transform_5, window_bounds = array<i64: 1, 128>}, {pipeline_mode = #tpu.pipeline_mode<synchronous>, transform_indices = @transform_6, window_bounds = array<i64: 1, 128>}, {transform_indices = @transform_7, window_bounds = array<i64: 1, 32, 128>}]} {
    %c0_i32 = arith.constant 0 : i32
    %0 = arith.cmpi eq, %arg1, %c0_i32 : i32
    %1 = arith.extui %0 : i1 to i32
    %c0_i32_0 = arith.constant 0 : i32
    %2 = arith.cmpi ne, %1, %c0_i32_0 : i32
    scf.if %2 {
      %c0_43 = arith.constant 0 : index
      %c0_44 = arith.constant 0 : index
      %c0_45 = arith.constant 0 : index
      %c0_46 = arith.constant 0 : index
      %68 = vector.load %arg2[%c0_43, %c0_44, %c0_45, %c0_46] : memref<1x8x8x128xbf16, #tpu.memory_space<vmem>>, vector<1x8x8x128xbf16>
      %69 = vector.shape_cast %68 : vector<1x8x8x128xbf16> to vector<8x8x128xbf16>
      %70 = vector.shape_cast %69 : vector<8x8x128xbf16> to vector<64x128xbf16>
      %c0_47 = arith.constant 0 : index
      %c0_48 = arith.constant 0 : index
      %71 = vector.load %arg3[%c0_47, %c0_48] : memref<128x128xbf16, #tpu.memory_space<vmem>>, vector<128x128xbf16>
      %cst_49 = arith.constant dense<0.000000e+00> : vector<64x128xf32>
      %72 = tpu.matmul %70, %71, %cst_49 {dimension_numbers = #tpu.dot_dimension_numbers<[1], [0], [0], [1], [0, 0, 1, 1], [], []>} : vector<64x128xbf16>, vector<128x128xbf16>, vector<64x128xf32> -> vector<64x128xf32>
      %c0_50 = arith.constant 0 : index
      %c0_51 = arith.constant 0 : index
      %73 = vector.load %arg4[%c0_50, %c0_51] : memref<1x128xf32, #tpu.memory_space<vmem>>, vector<1x128xf32>
      %74 = vector.broadcast %73 : vector<1x128xf32> to vector<64x128xf32>
      %75 = arith.mulf %72, %74 : vector<64x128xf32>
      %c0_52 = arith.constant 0 : index
      %c0_53 = arith.constant 0 : index
      %76 = vector.load %arg5[%c0_52, %c0_53] : memref<1x128xf32, #tpu.memory_space<vmem>>, vector<1x128xf32>
      %77 = vector.broadcast %76 : vector<1x128xf32> to vector<64x128xf32>
      %78 = arith.addf %75, %77 : vector<64x128xf32>
      %cst_54 = arith.constant 0.000000e+00 : f32
      %79 = vector.broadcast %cst_54 : f32 to vector<64x128xf32>
      %80 = arith.maximumf %78, %79 : vector<64x128xf32>
      %cst_55 = arith.constant 0.000000e+00 : bf16
      %81 = vector.broadcast %cst_55 : bf16 to vector<10x10x128xbf16>
      %c0_56 = arith.constant 0 : index
      %c0_57 = arith.constant 0 : index
      %c0_58 = arith.constant 0 : index
      %82 = vector.load %arg10[%c0_56, %c0_57, %c0_58] : memref<10x10x128xbf16, #tpu.memory_space<vmem>>, vector<10x10x128xbf16>
      tpu.vector_store %arg10[%c0_56, %c0_57, %c0_58], %81 {strides = array<i32>} : memref<10x10x128xbf16, #tpu.memory_space<vmem>>, vector<10x10x128xbf16>,
      %83 = vector.shape_cast %80 : vector<64x128xf32> to vector<8x8x128xf32>
      %84 = arith.truncf %83 : vector<8x8x128xf32> to vector<8x8x128xbf16>
      %c1_59 = arith.constant 1 : index
      %c1_60 = arith.constant 1 : index
      %c0_61 = arith.constant 0 : index
      %85 = vector.load %arg10[%c1_59, %c1_60, %c0_61] : memref<10x10x128xbf16, #tpu.memory_space<vmem>>, vector<8x8x128xbf16>
      tpu.vector_store %arg10[%c1_59, %c1_60, %c0_61], %84 {strides = array<i32>} : memref<10x10x128xbf16, #tpu.memory_space<vmem>>, vector<8x8x128xbf16>,
    } else {
    }
    %c4_i32 = arith.constant 4 : i32
    %3 = arith.muli %arg1, %c4_i32 : i32
    %4 = tpu.assume_multiple %3, 4 : i32
    %cst = arith.constant 0.000000e+00 : f32
    %5 = vector.broadcast %cst : f32 to vector<32x128xf32>
    %c0_i32_1 = arith.constant 0 : i32
    %6 = arith.addi %4, %c0_i32_1 : i32
    %7 = arith.index_cast %6 : i32 to index
    %c0 = arith.constant 0 : index
    %c0_2 = arith.constant 0 : index
    %8 = vector.load %arg10[%7, %c0, %c0_2] : memref<10x10x128xbf16, #tpu.memory_space<vmem>>, vector<4x8x128xbf16>
    %9 = vector.shape_cast %8 : vector<4x8x128xbf16> to vector<32x128xbf16>
    %c0_i32_3 = arith.constant 0 : i32
    %10 = arith.addi %4, %c0_i32_3 : i32
    %11 = arith.index_cast %10 : i32 to index
    %c1 = arith.constant 1 : index
    %c0_4 = arith.constant 0 : index
    %12 = vector.load %arg10[%11, %c1, %c0_4] : memref<10x10x128xbf16, #tpu.memory_space<vmem>>, vector<4x8x128xbf16>
    %13 = vector.shape_cast %12 : vector<4x8x128xbf16> to vector<32x128xbf16>
    %c0_i32_5 = arith.constant 0 : i32
    %14 = arith.addi %4, %c0_i32_5 : i32
    %15 = arith.index_cast %14 : i32 to index
    %c2 = arith.constant 2 : index
    %c0_6 = arith.constant 0 : index
    %16 = vector.load %arg10[%15, %c2, %c0_6] : memref<10x10x128xbf16, #tpu.memory_space<vmem>>, vector<4x8x128xbf16>
    %17 = vector.shape_cast %16 : vector<4x8x128xbf16> to vector<32x128xbf16>
    %18 = tpu.concatenate %9, %13, %17 in 1 : vector<32x128xbf16>, vector<32x128xbf16>, vector<32x128xbf16> -> vector<32x384xbf16>
    %c0_7 = arith.constant 0 : index
    %c0_8 = arith.constant 0 : index
    %c0_9 = arith.constant 0 : index
    %19 = vector.load %arg6[%c0_7, %c0_8, %c0_9] : memref<3x384x128xbf16, #tpu.memory_space<vmem>>, vector<1x384x128xbf16>
    %20 = vector.shape_cast %19 : vector<1x384x128xbf16> to vector<384x128xbf16>
    %cst_10 = arith.constant dense<0.000000e+00> : vector<32x128xf32>
    %21 = tpu.matmul %18, %20, %cst_10 {dimension_numbers = #tpu.dot_dimension_numbers<[1], [0], [0], [1], [0, 0, 1, 1], [], []>} : vector<32x384xbf16>, vector<384x128xbf16>, vector<32x128xf32> -> vector<32x128xf32>
    %22 = arith.addf %5, %21 : vector<32x128xf32>
    %c1_i32 = arith.constant 1 : i32
    %23 = arith.addi %4, %c1_i32 : i32
    %24 = arith.index_cast %23 : i32 to index
    %c0_11 = arith.constant 0 : index
    %c0_12 = arith.constant 0 : index
    %25 = vector.load %arg10[%24, %c0_11, %c0_12] : memref<10x10x128xbf16, #tpu.memory_space<vmem>>, vector<4x8x128xbf16>
    %26 = vector.shape_cast %25 : vector<4x8x128xbf16> to vector<32x128xbf16>
    %c1_i32_13 = arith.constant 1 : i32
    %27 = arith.addi %4, %c1_i32_13 : i32
    %28 = arith.index_cast %27 : i32 to index
    %c1_14 = arith.constant 1 : index
    %c0_15 = arith.constant 0 : index
    %29 = vector.load %arg10[%28, %c1_14, %c0_15] : memref<10x10x128xbf16, #tpu.memory_space<vmem>>, vector<4x8x128xbf16>
    %30 = vector.shape_cast %29 : vector<4x8x128xbf16> to vector<32x128xbf16>
    %c1_i32_16 = arith.constant 1 : i32
    %31 = arith.addi %4, %c1_i32_16 : i32
    %32 = arith.index_cast %31 : i32 to index
    %c2_17 = arith.constant 2 : index
    %c0_18 = arith.constant 0 : index
    %33 = vector.load %arg10[%32, %c2_17, %c0_18] : memref<10x10x128xbf16, #tpu.memory_space<vmem>>, vector<4x8x128xbf16>
    %34 = vector.shape_cast %33 : vector<4x8x128xbf16> to vector<32x128xbf16>
    %35 = tpu.concatenate %26, %30, %34 in 1 : vector<32x128xbf16>, vector<32x128xbf16>, vector<32x128xbf16> -> vector<32x384xbf16>
    %c1_19 = arith.constant 1 : index
    %c0_20 = arith.constant 0 : index
    %c0_21 = arith.constant 0 : index
    %36 = vector.load %arg6[%c1_19, %c0_20, %c0_21] : memref<3x384x128xbf16, #tpu.memory_space<vmem>>, vector<1x384x128xbf16>
    %37 = vector.shape_cast %36 : vector<1x384x128xbf16> to vector<384x128xbf16>
    %cst_22 = arith.constant dense<0.000000e+00> : vector<32x128xf32>
    %38 = tpu.matmul %35, %37, %cst_22 {dimension_numbers = #tpu.dot_dimension_numbers<[1], [0], [0], [1], [0, 0, 1, 1], [], []>} : vector<32x384xbf16>, vector<384x128xbf16>, vector<32x128xf32> -> vector<32x128xf32>
    %39 = arith.addf %22, %38 : vector<32x128xf32>
    %c2_i32 = arith.constant 2 : i32
    %40 = arith.addi %4, %c2_i32 : i32
    %41 = arith.index_cast %40 : i32 to index
    %c0_23 = arith.constant 0 : index
    %c0_24 = arith.constant 0 : index
    %42 = vector.load %arg10[%41, %c0_23, %c0_24] : memref<10x10x128xbf16, #tpu.memory_space<vmem>>, vector<4x8x128xbf16>
    %43 = vector.shape_cast %42 : vector<4x8x128xbf16> to vector<32x128xbf16>
    %c2_i32_25 = arith.constant 2 : i32
    %44 = arith.addi %4, %c2_i32_25 : i32
    %45 = arith.index_cast %44 : i32 to index
    %c1_26 = arith.constant 1 : index
    %c0_27 = arith.constant 0 : index
    %46 = vector.load %arg10[%45, %c1_26, %c0_27] : memref<10x10x128xbf16, #tpu.memory_space<vmem>>, vector<4x8x128xbf16>
    %47 = vector.shape_cast %46 : vector<4x8x128xbf16> to vector<32x128xbf16>
    %c2_i32_28 = arith.constant 2 : i32
    %48 = arith.addi %4, %c2_i32_28 : i32
    %49 = arith.index_cast %48 : i32 to index
    %c2_29 = arith.constant 2 : index
    %c0_30 = arith.constant 0 : index
    %50 = vector.load %arg10[%49, %c2_29, %c0_30] : memref<10x10x128xbf16, #tpu.memory_space<vmem>>, vector<4x8x128xbf16>
    %51 = vector.shape_cast %50 : vector<4x8x128xbf16> to vector<32x128xbf16>
    %52 = tpu.concatenate %43, %47, %51 in 1 : vector<32x128xbf16>, vector<32x128xbf16>, vector<32x128xbf16> -> vector<32x384xbf16>
    %c2_31 = arith.constant 2 : index
    %c0_32 = arith.constant 0 : index
    %c0_33 = arith.constant 0 : index
    %53 = vector.load %arg6[%c2_31, %c0_32, %c0_33] : memref<3x384x128xbf16, #tpu.memory_space<vmem>>, vector<1x384x128xbf16>
    %54 = vector.shape_cast %53 : vector<1x384x128xbf16> to vector<384x128xbf16>
    %cst_34 = arith.constant dense<0.000000e+00> : vector<32x128xf32>
    %55 = tpu.matmul %52, %54, %cst_34 {dimension_numbers = #tpu.dot_dimension_numbers<[1], [0], [0], [1], [0, 0, 1, 1], [], []>} : vector<32x384xbf16>, vector<384x128xbf16>, vector<32x128xf32> -> vector<32x128xf32>
    %56 = arith.addf %39, %55 : vector<32x128xf32>
    %c0_35 = arith.constant 0 : index
    %c0_36 = arith.constant 0 : index
    %57 = vector.load %arg7[%c0_35, %c0_36] : memref<1x128xf32, #tpu.memory_space<vmem>>, vector<1x128xf32>
    %58 = vector.broadcast %57 : vector<1x128xf32> to vector<32x128xf32>
    %59 = arith.mulf %56, %58 : vector<32x128xf32>
    %c0_37 = arith.constant 0 : index
    %c0_38 = arith.constant 0 : index
    %60 = vector.load %arg8[%c0_37, %c0_38] : memref<1x128xf32, #tpu.memory_space<vmem>>, vector<1x128xf32>
    %61 = vector.broadcast %60 : vector<1x128xf32> to vector<32x128xf32>
    %62 = arith.addf %59, %61 : vector<32x128xf32>
    %cst_39 = arith.constant 0.000000e+00 : f32
    %63 = vector.broadcast %cst_39 : f32 to vector<32x128xf32>
    %64 = arith.maximumf %62, %63 : vector<32x128xf32>
    %65 = vector.shape_cast %64 : vector<32x128xf32> to vector<1x32x128xf32>
    %66 = arith.truncf %65 : vector<1x32x128xf32> to vector<1x32x128xbf16>
    %c0_40 = arith.constant 0 : index
    %c0_41 = arith.constant 0 : index
    %c0_42 = arith.constant 0 : index
    %67 = vector.load %arg9[%c0_40, %c0_41, %c0_42] : memref<1x32x128xbf16, #tpu.memory_space<vmem>>, vector<1x32x128xbf16>
    tpu.vector_store %arg9[%c0_40, %c0_41, %c0_42], %66 {strides = array<i32>} : memref<1x32x128xbf16, #tpu.memory_space<vmem>>, vector<1x32x128xbf16>,
    return
  }
  func.func @transform_0(%arg0: i32, %arg1: i32) -> (i32, i32, i32, i32) {
    %c0_i32 = arith.constant 0 : i32
    %c0_i32_0 = arith.constant 0 : i32
    %c0_i32_1 = arith.constant 0 : i32
    %c0_i32_2 = arith.constant 0 : i32
    return %arg0, %c0_i32, %c0_i32_0, %c0_i32_1 : i32, i32, i32, i32
  }
  func.func @transform_1(%arg0: i32, %arg1: i32) -> (i32, i32) {
    %c0_i32 = arith.constant 0 : i32
    %c0_i32_0 = arith.constant 0 : i32
    %c0_i32_1 = arith.constant 0 : i32
    return %c0_i32, %c0_i32_0 : i32, i32
  }
  func.func @transform_2(%arg0: i32, %arg1: i32) -> (i32, i32) {
    %c0_i32 = arith.constant 0 : i32
    %c0_i32_0 = arith.constant 0 : i32
    %c0_i32_1 = arith.constant 0 : i32
    return %c0_i32, %c0_i32_0 : i32, i32
  }
  func.func @transform_3(%arg0: i32, %arg1: i32) -> (i32, i32) {
    %c0_i32 = arith.constant 0 : i32
    %c0_i32_0 = arith.constant 0 : i32
    %c0_i32_1 = arith.constant 0 : i32
    return %c0_i32, %c0_i32_0 : i32, i32
  }
  func.func @transform_4(%arg0: i32, %arg1: i32) -> (i32, i32, i32) {
    %c0_i32 = arith.constant 0 : i32
    %c0_i32_0 = arith.constant 0 : i32
    %c0_i32_1 = arith.constant 0 : i32
    %c0_i32_2 = arith.constant 0 : i32
    return %c0_i32, %c0_i32_0, %c0_i32_1 : i32, i32, i32
  }
  func.func @transform_5(%arg0: i32, %arg1: i32) -> (i32, i32) {
    %c0_i32 = arith.constant 0 : i32
    %c0_i32_0 = arith.constant 0 : i32
    %c0_i32_1 = arith.constant 0 : i32
    return %c0_i32, %c0_i32_0 : i32, i32
  }
  func.func @transform_6(%arg0: i32, %arg1: i32) -> (i32, i32) {
    %c0_i32 = arith.constant 0 : i32
    %c0_i32_0 = arith.constant 0 : i32
    %c0_i32_1 = arith.constant 0 : i32
    return %c0_i32, %c0_i32_0 : i32, i32
  }
  func.func @transform_7(%arg0: i32, %arg1: i32) -> (i32, i32, i32) {
    %c0_i32 = arith.constant 0 : i32
    %c0_i32_0 = arith.constant 0 : i32
    return %arg0, %arg1, %c0_i32 : i32, i32, i32
  }
}

</mosaic_0001>

<bundles_post_ra>
// kernel: tpu_custom_call.1
= control target key start
LH: loop header
LB: loop body
LE: loop exit
PB: predicated region body
PF: predicated region fallthrough
CT: control target
= control target key end

     0   :  { %s3354_s0 = inlined_call_operand.hbm [shape: bf16[2,8,8,128], index: 0, kind: input, shape index: {}]   ;;  %s3355_s1 = inlined_call_operand.hbm [shape: bf16[128,128], index: 1, kind: input, shape index: {}]   ;;  %s3356_s2 = inlined_call_operand.vmem [shape: f32[1,128], index: 2, kind: input, shape index: {}]   ;;  %s3357_s3 = inlined_call_operand.vmem [shape: f32[1,128], index: 3, kind: input, shape index: {}]   ;;  %s3358_s4 = inlined_call_operand.hbm [shape: bf16[3,384,128], index: 4, kind: input, shape index: {}]   ;;  %s3359_s5 = inlined_call_operand.vmem [shape: f32[1,128], index: 5, kind: input, shape index: {}]   ;;  %s3360_s6 = inlined_call_operand.vmem [shape: f32[1,128], index: 6, kind: input, shape index: {}]   ;;  %s3361_s7 = inlined_call_operand.hbm [shape: bf16[2,64,128], index: 7, kind: output, shape index: {}]  }
   0x1   :  { %3372 = sst [smem:[#allocation20_spill]] %s3355_s1 }
   0x2   :  { %3373 = sst [smem:[#allocation21_spill]] %s3358_s4 }
   0x3   :  { %3374 = sst [smem:[#allocation22_spill]] %s3359_s5 }
   0x4   :  { %3375 = sst [smem:[#allocation23_spill]] %s3360_s6 }
   0x5   :  { %3376 = sst [smem:[#allocation24_spill]] %s3361_s7 }
   0x6   :  { %12 = vsyncpa [#allocation4], 0 }
   0x7   :  { %14 = vsyncpa [#allocation4 + $0x1], 0 }
   0x8   :  { %15 = vsyncpa [#allocation7], 0 }
   0x9   :  { %16 = vsyncpa [#allocation5], 0 }
   0xa   :  { %18 = vsyncpa [#allocation5 + $0x1], 0  ;;  %s2924_s24 = smov 0   ;;  %s2926_s25 = smov 0  }
   0xb   :  { %s2928_s26 = smov 0   ;;  %s2930_s27 = smov 0  }
   0xc   :  { %s2932_s28 = smov 0   ;;  %s2934_s29 = smov 0  }
   0xd   :  { %s2936_s30 = smov 0   ;;  %s2938_s8 = smov 0  }
   0xe   :  { %s2940_s9 = smov 0   ;;  %s2942_s10 = smov 0  }
   0xf   :  { %s2944_s11 = smov 0  }
  0x10 LB: > { %3377 = sst [smem:[#allocation13_spill]] %s2835_s24  ;;  %s1965_s12 = sadd.s32 4294967295, %s2875_s11   ;;  %s2875_s11 = sphi %s2944_s11, %s24_s11   ;;  %s2871_s10 = sphi %s2942_s10, %s3420_s10   ;;  %s2867_s9 = sphi %s2940_s9, %s3411_s9   ;;  %s2863_s8 = sphi %s2938_s8, %s3419_s8   ;;  %s2859_s30 = sphi %s2936_s30, %s3410_s30   ;;  %s2855_s29 = sphi %s2934_s29, %s3418_s29   ;;  %s2851_s28 = sphi %s2932_s28, %s3417_s28   ;;  %s2847_s27 = sphi %s2930_s27, %s3416_s27   ;;  %s2843_s26 = sphi %s2928_s26, %s3415_s26   ;;  %s2839_s25 = sphi %s2926_s25, %s3414_s25   ;;  %s2835_s24 = sphi %s2924_s24, %s3413_s24  }
  0x11   : > { %3378 = sst [smem:[#allocation14_spill]] %s2863_s8  ;;  %s1966_s13 = sadd.s32 4294967294, %s2875_s11  }
  0x12   : > { %3379 = sst [smem:[#allocation15_spill]] %s2867_s9  ;;  %p56_p0 = scmp.ne.s32.totalorder %s2851_s28, %s2847_s27 }
  0x13   : > { %p2980_p1 = scmp.eq.s32.totalorder %s1965_s12, 0  ;;  %p207_p2 = scmp.ne.s32.totalorder %s2843_s26, %s2839_s25 }
  0x14   : > { %p208_p3 = scmp.eq.s32.totalorder %s1965_s12, 3  ;;  %p213_p5 = scmp.ne.s32.totalorder %s2839_s25, %s2835_s24 }
  0x15   : > { %p2988_p4 = por %p2980_p1, %p56_p0  ;;  %p214_p7 = scmp.eq.s32.totalorder %s1966_s13, 3 }
  0x16   : > { %p2994_p6 = por %p208_p3, %p207_p2  ;;  %p1967_p8 = scmp.ge.s32.totalorder %s2875_s11, 1 }
  0x17   : > { %p221_p9 = scmp.lt.s32.totalorder %s2875_s11, 5  ;;  %p3000_p10 = por %p214_p7, %p213_p5 }
  0x18   : > { %s3382_s16 = scalar_select %p2994_p6, 1, 0 }
  0x19   : > { %s3384_s17 = scalar_select %p3000_p10, 1, 0 }
  0x1a   : > { %3383 = sst [smem:[#allocation16_spill]] %s3382_s16  ;;  %p3004_p11 = pnand %p1967_p8, %p221_p9 }
  0x1b   : > { %3385 = sst [smem:[#allocation17_spill]] %s3384_s17  ;;  %s2877_s22 = smov [#allocation6]  }
  0x1c   : > { %s3387_s1 = sld [smem:[#allocation20_spill]]  ;;  %p2539_p12 = pneg %p3004_p11 }
  0x1d   : > { %s234_s23 = sshll.u32 %s2877_s22, 4  ;;  %s3388_s4 = sld [smem:[#allocation21_spill]]  ;;  %s235_s23 = int_to_ptr.vmem [resolvable:$true] %s234_s23 }
  0x1e   : > { %p2540_p13 = pnand %p2539_p12, %p2980_p1  ;;  %s3362_s19 = smov 64  }
  0x1f   : > { %s3363_s20 = smov 4   ;;  %s2880_s22 = smov [#allocation8]  }
  0x20   : > { %s33_s27 = sadd.s32 1, %s2867_s9  ;;  %s36_s12 = sadd.s32 1, %s2871_s10 }
  0x21   : > { %p34_p0 = scmp.ge.s32.totalorder %s33_s27, 2  ;;  %p50_p2 = scmp.ne.s32.totalorder %s2855_s29, %s2851_s28 }
  0x22   : > { %s232_s21 = sshll.u32 %s3387_s1, 4  ;;  %s254_s1 = sshll.u32 %s2880_s22, 4  ;;  %s233_s21 = int_to_ptr.hbm [resolvable:$true] %s232_s21  ;;  %s255_s1 = int_to_ptr.vmem [resolvable:$true] %s254_s1 }
  0x23   : > { %s252_s13 = sshll.u32 %s3388_s4, 4  ;;  %s3422_s27 = smov (%p34_p0, %s33_s27), 0  ;;  %s253_s13 = int_to_ptr.hbm [resolvable:$true] %s252_s13 }
  0x24   : > { %2542 = dma.hbm_to_vmem [thread:$0]  (!%p2540_p13), %s233_s21, 1024, %s235_s23, [#allocation7], %s3362_s19, %s3362_s19, %s3363_s20  }
  0x25   : > { %2545 = dma.hbm_to_vmem [thread:$0]  (!%p2540_p13), %s253_s13, 9216, %s255_s1, [#allocation7], %s3362_s19, %s3362_s19, %s3363_s20  }
  0x26   : > { %3389 = sst [smem:[#allocation18_spill]] %s3422_s27  ;;  %s3424_s12 = smov (!%p34_p0, %s36_s12), %s2871_s10 }
  0x27   : > { %s43_s21 = sadd.s32 1, %s2855_s29  ;;  %p51_p3 = scmp.eq.s32.totalorder %s2875_s11, 0 }
  0x28   : > { %p38_p5 = scmp.ge.s32.totalorder %s3424_s12, 2  ;;  %s193_s23 = ssub.s32 %s2867_s9, %s3422_s27 }
  0x29   : > { %p3035_p7 = por %p51_p3, %p50_p2  ;;  %s197_s1 = sadd.s32 1, %s2843_s26 }
  0x2a   : > { %s3426_s12 = smov (%p38_p5, %s3424_s12), 0  ;;  %p2556_p8 = scmp.lt.s32.totalorder %s2875_s11, 4 }
  0x2b   : > { %3391 = sst [smem:[#allocation19_spill]] %s3426_s12  ;;  %s274_s13 = sand.u32 1, %s2855_s29  }
  0x2c   : > { %s40_s19 = ssub.s32 %s2871_s10, %s3426_s12  ;;  %s2389_s20 = sshll.u32 %s2871_s10, 5 }
  0x2d   : > { %p41_p9 = scmp.eq.s32.totalorder %s40_s19, 0  ;;  %s194_s4 = sor.u32 %s193_s23, %s40_s19 }
  0x2e   : > { %p195_p12 = scmp.eq.s32.totalorder %s194_s4, 0  ;;  %s1971_s17 = sshll.u32 %s274_s13, 5 }
  0x2f   : > { %s3048_s24 = scalar_select %p41_p9, %s2855_s29, %s43_s21  }
  0x30   : > { %s3051_s27 = scalar_select %p195_p12, %s2843_s26, %s197_s1  }
  0x31   : > { %s283_s7 = scalar_lea.hbm %s3354_s0, %s2389_s20  ;;  %s278_s5 = scalar_lea.vmem [#allocation3], %s1971_s17 }
  0x32   : > { %s284_s6 = sshll.u32 %s283_s7, 4  ;;  %s286_s8 = sshll.u32 %s278_s5, 4  ;;  %s285_s6 = int_to_ptr.hbm [resolvable:$true] %s284_s6  ;;  %s287_s8 = int_to_ptr.vmem [resolvable:$true] %s286_s8 }
  0x33   : > { %p2547_p13 = pnand %p2556_p8, %p3035_p7  ;;  %s275_s12 = scalar_lea.sflag [#allocation4], %s274_s13 }
  0x34   : > { %s3392_s19 = smov 4   ;;  %s3393_s4 = smov 64  }
  0x35   : > { %2549 = dma.hbm_to_vmem [thread:$0]  (!%p2547_p13), %s285_s6, 512, %s287_s8, %s275_s12, %s3393_s4, %s3393_s4, %s3392_s19  }
  0x36   : > { %298 = sbr.rel (%p3004_p11) target bundleno = 510 (0x1fe), region = 48  ;;  %s300_s9 = sand.u32 (!%p3004_p11), 1, %s2851_s28  }
  0x37   : > { %s1975_s16 = sshll.u32 (!%p3004_p11), %s300_s9, 5  ;;  %s301_s7 = scalar_lea.sflag (!%p3004_p11), [#allocation4], %s300_s9 }
  0x38   : > { %s3066_s17 = scalar_lea.vmem (!%p3004_p11), [#allocation3], %s1975_s16 }
  0x3b   : > { %2822 = dma.done.wait (%p2988_p4), %s301_s7, 512  }
  0x3c   : > { %2824 = vsyncadd (%p2988_p4), %s301_s7, 4294966784 }
  0x3d   : > { %2826 = dma.done.wait (%p2980_p1), [#allocation7], 10240  }
  0x3e   : > { %2828 = vsyncadd (%p2980_p1), [#allocation7], 4294957056  ;;  %s343_s5 = sand.u32 1, %s2839_s25   ;;  %p1979_p11 = scmp.ne.s32.totalorder %s2859_s30, 0 }
  0x3f   : > { %s1978_s6 = sshll.u32 %s343_s5, 4 }
  0x40   : > { %s3079_s8 = scalar_lea.vmem [#allocation9], %s1978_s6  ;;  %351 = sbr.rel (%p1979_p11) target bundleno = 263 (0x107), region = 64 }
  0x45   : > { %v2401_v0 = vld [vmem:[#allocation6 + $0x38] sm:$0xff]  ;;  %v2400_v1 = vld [vmem:[#allocation6 + $0x30] sm:$0xff]  ;;  %v2399_v2 = vld [vmem:[#allocation6 + $0x28] sm:$0xff]  ;;  %v2881_v12 = vmov 0   ;;  %vm618_vm0 = vcmask 1043456   ;;  %vm624_vm2 = vcmask 1040384  }
  0x46   : > { %448 = vmatpush.bf16.msra.mxu0 %v2401_v0  ;;  %2495 = vmatpush.bf16.msra.mxu1 %v2401_v0  ;;  %v2398_v3 = vld [vmem:[#allocation6 + $0x20] sm:$0xff]  ;;  %v2397_v4 = vld [vmem:[#allocation6 + $0x18] sm:$0xff]  ;;  %v2396_v5 = vld [vmem:[#allocation6 + $0x10] sm:$0xff]  ;;  %511 = vst [vmem:[#allocation2 + $0x8] sm:$0xf] %v2881_v12 }
  0x47   : > { %2496 = vmatpush.bf16.msra.mxu2 %v2401_v0  ;;  %2497 = vmatpush.bf16.msra.mxu3 %v2401_v0  ;;  %v2395_v6 = vld [vmem:[#allocation6 + $0x8] sm:$0xff]  ;;  %v2394_v7 = vld [vmem:[#allocation6] sm:$0xff]  ;;  %v2392_v10 = vld [vmem:[%s3066_s17 + $0x10] sm:$0xff]  ;;  %512 = vst [vmem:[#allocation2 + $0xc] sm:$0x1] %v2881_v12 }
  0x48   : > { %v2390_v8 = vld [vmem:[%s3066_s17] sm:$0xff]  ;;  %v2391_v9 = vld [vmem:[%s3066_s17 + $0x8] sm:$0xff]  ;;  %v2393_v11 = vld [vmem:[%s3066_s17 + $0x18] sm:$0xff]  ;;  %509 = vst [vmem:[#allocation2] sm:$0xf] %v2881_v12 }
  0x49   : > { %510 = vst [vmem:[#allocation2 + $0x4] sm:$0x1] %v2881_v12  ;;  %v3089_v13 = vld [vmem:[%s3356_s2] ss:$0 sm:$0xff]  ;;  %vm619_vm1 = vsmask.f32 7938 }
  0x4a   : > { %449 = vmatpush.bf16.msra.mxu0 %v2400_v1  ;;  %2498 = vmatpush.bf16.msra.mxu1 %v2400_v1  ;;  %513 = vst [vmem:[#allocation2 + $0x10] sm:$0xf] %v2881_v12  ;;  %v3094_v14 = vld [vmem:[%s3357_s3] ss:$0 sm:$0xff]  ;;  %vm625_vm3 = vsmask.f32 256  ;;  %vm3108_vm4 = vmand %vm618_vm0, %vm619_vm1 }
  0x4b   : > { %2499 = vmatpush.bf16.msra.mxu2 %v2400_v1  ;;  %2500 = vmatpush.bf16.msra.mxu3 %v2400_v1  ;;  %514 = vst [vmem:[#allocation2 + $0x14] sm:$0x1] %v2881_v12  ;;  %vm3114_vm5 = vmand %vm624_vm2, %vm625_vm3 }
  0x4c   : > { %515 = vst [vmem:[#allocation2 + $0x18] sm:$0xf] %v2881_v12 }
  0x4d   : > { %516 = vst [vmem:[#allocation2 + $0x1c] sm:$0x1] %v2881_v12  ;;  %v621_v41 = vld [vmem:[#allocation2 + $0x8] sm:$0xf] }
  0x4e   : > { %450 = vmatpush.bf16.msra.mxu0 %v2399_v2  ;;  %2501 = vmatpush.bf16.msra.mxu1 %v2399_v2  ;;  %517 = vst [vmem:[#allocation2 + $0x20] sm:$0xf] %v2881_v12  ;;  %v627_v44 = vld [vmem:[#allocation2 + $0xc] sm:$0x1] }
  0x4f   : > { %2502 = vmatpush.bf16.msra.mxu2 %v2399_v2  ;;  %2503 = vmatpush.bf16.msra.mxu3 %v2399_v2  ;;  %518 = vst [vmem:[#allocation2 + $0x24] sm:$0x1] %v2881_v12 }
  0x50   : > { %519 = vst [vmem:[#allocation2 + $0x28] sm:$0xf] %v2881_v12 }
  0x51   : > { %520 = vst [vmem:[#allocation2 + $0x2c] sm:$0x1] %v2881_v12 }
  0x52   : > { %451 = vmatpush.bf16.msra.mxu0 %v2398_v3  ;;  %2504 = vmatpush.bf16.msra.mxu1 %v2398_v3  ;;  %521 = vst [vmem:[#allocation2 + $0x30] sm:$0xf] %v2881_v12 }
  0x53   : > { %2505 = vmatpush.bf16.msra.mxu2 %v2398_v3  ;;  %2506 = vmatpush.bf16.msra.mxu3 %v2398_v3  ;;  %522 = vst [vmem:[#allocation2 + $0x34] sm:$0x1] %v2881_v12  ;;  %v636_v45 = vld [vmem:[#allocation2 + $0x18] sm:$0xf] }
  0x54   : > { %523 = vst [vmem:[#allocation2 + $0x38] sm:$0xf] %v2881_v12  ;;  %v639_v54 = vld [vmem:[#allocation2 + $0x1c] sm:$0x1] }
  0x55   : > { %524 = vst [vmem:[#allocation2 + $0x3c] sm:$0x1] %v2881_v12 }
  0x56   : > { %452 = vmatpush.bf16.msra.mxu0 %v2397_v4  ;;  %2507 = vmatpush.bf16.msra.mxu1 %v2397_v4  ;;  %525 = vst [vmem:[#allocation2 + $0x40] sm:$0xf] %v2881_v12 }
  0x57   : > { %2508 = vmatpush.bf16.msra.mxu2 %v2397_v4  ;;  %2509 = vmatpush.bf16.msra.mxu3 %v2397_v4  ;;  %526 = vst [vmem:[#allocation2 + $0x44] sm:$0x1] %v2881_v12  ;;  %v648_v3 = vld [vmem:[#allocation2 + $0x28] sm:$0xf] }
  0x58   : > { %527 = vst [vmem:[#allocation2 + $0x48] sm:$0xf] %v2881_v12  ;;  %v651_v4 = vld [vmem:[#allocation2 + $0x2c] sm:$0x1] }
  0x59   : > { %528 = vst [vmem:[#allocation2 + $0x4c] sm:$0x1] %v2881_v12 }
  0x5a   : > { %453 = vmatpush.bf16.msra.mxu0 %v2396_v5  ;;  %2510 = vmatpush.bf16.msra.mxu1 %v2396_v5 }
  0x5b   : > { %2511 = vmatpush.bf16.msra.mxu2 %v2396_v5  ;;  %2512 = vmatpush.bf16.msra.mxu3 %v2396_v5  ;;  %v660_v5 = vld [vmem:[#allocation2 + $0x38] sm:$0xf] }
  0x5e   : > { %454 = vmatpush.bf16.msra.mxu0 %v2395_v6  ;;  %2513 = vmatpush.bf16.msra.mxu1 %v2395_v6 }
  0x5f   : > { %2514 = vmatpush.bf16.msra.mxu2 %v2395_v6  ;;  %2515 = vmatpush.bf16.msra.mxu3 %v2395_v6  ;;  %v663_v6 = vld [vmem:[#allocation2 + $0x3c] sm:$0x1] }
  0x62   : > { %455 = vmatpush.bf16.msra.mxu0 %v2394_v7  ;;  %2516 = vmatpush.bf16.msra.mxu1 %v2394_v7 }
  0x63   : > { %2517 = vmatpush.bf16.msra.mxu2 %v2394_v7  ;;  %2518 = vmatpush.bf16.msra.mxu3 %v2394_v7 }
  0x65   : > { %456 = vmatmul.bf16.vlgmr.msra.gmra.mxu0 %v2390_v8  ;;  %461 = vmatmul.bf16.vlgmr.msra.gmra.mxu1 %v2391_v9 }
  0x66   : > { %466 = vmatmul.bf16.vlgmr.msra.gmra.mxu2 %v2392_v10  ;;  %471 = vmatmul.bf16.vlgmr.msra.gmra.mxu3 %v2393_v11 }
  0xe2   : > { %v457_v15 = vpop.f32.mrf.mxu0  ;;  %v462_v16 = vpop.f32.mrf.mxu1 }
  0xe3   : > { %v481_v17 = vmul.f32 %v3089_v13, %v457_v15  ;;  %v483_v18 = vmul.f32 %v3089_v13, %v462_v16 }
  0xe5   : > { %v493_v19 = vadd.f32 %v3094_v14, %v481_v17  ;;  %v495_v20 = vadd.f32 %v3094_v14, %v483_v18 }
  0xe7   : > { %v501_v21 = vmax.f32 %v493_v19, 0.0  ;;  %v503_v22 = vmax.f32 %v495_v20, 0.0 }
  0xe9   : > { %v529_v23 = vpack.c.bf16 %v501_v21, %v501_v21  ;;  %v531_v24 = vpack.c.bf16 %v503_v22, %v503_v22  ;;  %v467_v25 = vpop.f32.mrf.mxu2  ;;  %v472_v26 = vpop.f32.mrf.mxu3 }
  0xea   : > { %v485_v27 = vmul.f32 %v3089_v13, %v467_v25  ;;  %v487_v28 = vmul.f32 %v3089_v13, %v472_v26  ;;  %v459_v29 = vpop.f32.mrf.mxu0  ;;  %v464_v30 = vpop.f32.mrf.mxu1 }
  0xeb   : > { %v538_v31 = vshrl.u32 %v529_v23, 16  ;;  %v541_v32 = vshll.u32 %v529_v23, 16  ;;  %v554_v33 = vshrl.u32 %v531_v24, 16  ;;  %v557_v34 = vshll.u32 %v531_v24, 16 }
  0xec   : > { %v497_v35 = vadd.f32 %v3094_v14, %v485_v27  ;;  %v499_v36 = vadd.f32 %v3094_v14, %v487_v28  ;;  %v482_v37 = vmul.f32 %v3089_v13, %v459_v29  ;;  %v484_v38 = vmul.f32 %v3089_v13, %v464_v30 }
  0xed   : > { %v540_v39 = vrot.slane %v538_v31, 7  ;;  %v556_v42 = vrot.slane %v554_v33, 7  ;;  %v633_v33 = vld [vmem:[#allocation2 + $0x14] sm:$0x1] }
  0xee   : > { %v505_v46 = vmax.f32 %v497_v35, 0.0  ;;  %v507_v47 = vmax.f32 %v499_v36, 0.0  ;;  %v494_v48 = vadd.f32 %v3094_v14, %v482_v37  ;;  %v496_v49 = vadd.f32 %v3094_v14, %v484_v38  ;;  %v645_v38 = vld [vmem:[#allocation2 + $0x24] sm:$0x1] }
  0xef   : > { %v543_v50 = vor.u32 %v541_v32, %v540_v39  ;;  %v544_v51 = vrot.slane %v540_v39, 4  ;;  %v559_v52 = vor.u32 %v557_v34, %v556_v42  ;;  %v560_v53 = vrot.slane %v556_v42, 4  ;;  %v630_v32 = vld [vmem:[#allocation2 + $0x10] sm:$0xf] }
  0xf0   : > { %v533_v55 = vpack.c.bf16 %v505_v46, %v505_v46  ;;  %v535_v56 = vpack.c.bf16 %v507_v47, %v507_v47  ;;  %v502_v57 = vmax.f32 %v494_v48, 0.0  ;;  %v504_v58 = vmax.f32 %v496_v49, 0.0 }
  0xf1   : > { %v622_v59 = vsel %vm3108_vm4, %v543_v50, %v621_v41  ;;  %v628_v60 = vsel %vm3114_vm5, %v544_v51, %v627_v44  ;;  %v637_v61 = vsel %vm3108_vm4, %v559_v52, %v636_v45  ;;  %v469_v62 = vpop.f32.mrf.mxu2  ;;  %v474_v63 = vpop.f32.mrf.mxu3  ;;  %v640_v0 = vsel %vm3114_vm5, %v560_v53, %v639_v54 }
  0xf2   : > { %623 = vst [vmem:[#allocation2 + $0x8] sm:$0xf] %v622_v59  ;;  %v570_v1 = vshrl.u32 %v533_v55, 16  ;;  %v586_v2 = vshrl.u32 %v535_v56, 16  ;;  %v530_v7 = vpack.c.bf16 %v502_v57, %v502_v57  ;;  %v532_v8 = vpack.c.bf16 %v504_v58, %v504_v58  ;;  %v666_v57 = vld [vmem:[#allocation2 + $0x40] sm:$0xf] }
  0xf3   : > { %629 = vst [vmem:[#allocation2 + $0xc] sm:$0x1] %v628_v60  ;;  %v486_v9 = vmul.f32 %v3089_v13, %v469_v62  ;;  %v488_v10 = vmul.f32 %v3089_v13, %v474_v63  ;;  %v573_v12 = vshll.u32 %v533_v55, 16  ;;  %v589_v16 = vshll.u32 %v535_v56, 16  ;;  %v654_v55 = vld [vmem:[#allocation2 + $0x30] sm:$0xf] }
  0xf4   : > { %638 = vst [vmem:[#allocation2 + $0x18] sm:$0xf] %v637_v61  ;;  %v572_v11 = vrot.slane %v570_v1, 7  ;;  %v588_v15 = vrot.slane %v586_v2, 7  ;;  %v546_v17 = vshrl.u32 %v530_v7, 16  ;;  %v549_v18 = vshll.u32 %v530_v7, 16 }
  0xf5   : > { %641 = vst [vmem:[#allocation2 + $0x1c] sm:$0x1] %v640_v0  ;;  %v562_v19 = vshrl.u32 %v532_v8, 16  ;;  %v565_v20 = vshll.u32 %v532_v8, 16  ;;  %v498_v27 = vadd.f32 %v3094_v14, %v486_v9  ;;  %v500_v13 = vadd.f32 %v3094_v14, %v488_v10  ;;  %v642_v14 = vld [vmem:[#allocation2 + $0x20] sm:$0xf] }
  0xf6   : > { %v575_v21 = vor.u32 %v573_v12, %v572_v11  ;;  %v576_v22 = vrot.slane %v572_v11, 4  ;;  %v591_v23 = vor.u32 %v589_v16, %v588_v15  ;;  %v592_v24 = vrot.slane %v588_v15, 4  ;;  %v657_v56 = vld [vmem:[#allocation2 + $0x34] sm:$0x1]  ;;  %v669_v62 = vld [vmem:[#allocation2 + $0x44] sm:$0x1] }
  0xf7   : > { %v548_v25 = vrot.slane %v546_v17, 7  ;;  %v564_v26 = vrot.slane %v562_v19, 7  ;;  %v506_v39 = vmax.f32 %v498_v27, 0.0  ;;  %v508_v41 = vmax.f32 %v500_v13, 0.0 }
  0xf8   : > { %v649_v28 = vsel %vm3108_vm4, %v575_v21, %v648_v3  ;;  %v652_v29 = vsel %vm3114_vm5, %v576_v22, %v651_v4  ;;  %v661_v30 = vsel %vm3108_vm4, %v591_v23, %v660_v5  ;;  %v664_v31 = vsel %vm3114_vm5, %v592_v24, %v663_v6 }
  0xf9   : > { %650 = vst [vmem:[#allocation2 + $0x28] sm:$0xf] %v649_v28  ;;  %v551_v34 = vor.u32 %v549_v18, %v548_v25  ;;  %v552_v35 = vrot.slane %v548_v25, 4  ;;  %v567_v36 = vor.u32 %v565_v20, %v564_v26  ;;  %v568_v37 = vrot.slane %v564_v26, 4 }
  0xfa   : > { %653 = vst [vmem:[#allocation2 + $0x2c] sm:$0x1] %v652_v29  ;;  %v534_v46 = vpack.c.bf16 %v506_v39, %v506_v39  ;;  %v536_v47 = vpack.c.bf16 %v508_v41, %v508_v41 }
  0xfb   : > { %662 = vst [vmem:[#allocation2 + $0x38] sm:$0xf] %v661_v30  ;;  %v631_v42 = vsel %vm3108_vm4, %v551_v34, %v630_v32  ;;  %v634_v44 = vsel %vm3114_vm5, %v552_v35, %v633_v33  ;;  %v643_v45 = vsel %vm3108_vm4, %v567_v36, %v642_v14  ;;  %v646_v48 = vsel %vm3114_vm5, %v568_v37, %v645_v38 }
  0xfc   : > { %665 = vst [vmem:[#allocation2 + $0x3c] sm:$0x1] %v664_v31  ;;  %v578_v49 = vshrl.u32 %v534_v46, 16  ;;  %v594_v50 = vshrl.u32 %v536_v47, 16  ;;  %v581_v52 = vshll.u32 %v534_v46, 16  ;;  %v597_v54 = vshll.u32 %v536_v47, 16 }
  0xfd   : > { %632 = vst [vmem:[#allocation2 + $0x10] sm:$0xf] %v631_v42 }
  0xfe   : > { %635 = vst [vmem:[#allocation2 + $0x14] sm:$0x1] %v634_v44  ;;  %v580_v51 = vrot.slane %v578_v49, 7  ;;  %v596_v53 = vrot.slane %v594_v50, 7 }
  0xff   : > { %644 = vst [vmem:[#allocation2 + $0x20] sm:$0xf] %v643_v45 }
 0x100   : > { %647 = vst [vmem:[#allocation2 + $0x24] sm:$0x1] %v646_v48  ;;  %v583_v58 = vor.u32 %v581_v52, %v580_v51  ;;  %v584_v59 = vrot.slane %v580_v51, 4  ;;  %v599_v60 = vor.u32 %v597_v54, %v596_v53  ;;  %v600_v61 = vrot.slane %v596_v53, 4 }
 0x102   : > { %v655_v63 = vsel %vm3108_vm4, %v583_v58, %v654_v55  ;;  %v658_v0 = vsel %vm3114_vm5, %v584_v59, %v657_v56  ;;  %v667_v1 = vsel %vm3108_vm4, %v599_v60, %v666_v57  ;;  %v670_v2 = vsel %vm3114_vm5, %v600_v61, %v669_v62 }
 0x103   : > { %656 = vst [vmem:[#allocation2 + $0x30] sm:$0xf] %v655_v63 }
 0x104   : > { %659 = vst [vmem:[#allocation2 + $0x34] sm:$0x1] %v658_v0 }
 0x105   : > { %668 = vst [vmem:[#allocation2 + $0x40] sm:$0xf] %v667_v1 }
 0x106   : > { %671 = vst [vmem:[#allocation2 + $0x44] sm:$0x1] %v670_v2 }
 0x107 PF: > { %v2440_v3 = vld [vmem:[#allocation8 + $0xf8] sm:$0xff]  ;;  %v2439_v7 = vld [vmem:[#allocation8 + $0xf0] sm:$0xff]  ;;  %s2403_s12 = sshll.u32 %s2859_s30, 5  ;;  %v2438_v43 = vld [vmem:[#allocation8 + $0xe8] sm:$0xff]  ;;  %vm684_vm6 = vsmask.f32 3328 }
 0x108   : > { %v2448_v4 = vld [vmem:[#allocation8 + $0x138] sm:$0xff]  ;;  %1167 = vmatpush.bf16.msra.mxu0 %v2440_v3  ;;  %v2447_v8 = vld [vmem:[#allocation8 + $0x130] sm:$0xff]  ;;  %v2446_v10 = vld [vmem:[#allocation8 + $0x128] sm:$0xff]  ;;  %s3157_s21 = scalar_lea.vmem [#allocation2], %s2403_s12  ;;  %vm685_vm7 = vsmask.f32 7440 }
 0x109   : > { %v2456_v5 = vld [vmem:[#allocation8 + $0x178] sm:$0xff]  ;;  %1186 = vmatpush.bf16.msra.mxu1 %v2448_v4  ;;  %v2455_v40 = vld [vmem:[#allocation8 + $0x170] sm:$0xff]  ;;  %v2454_v11 = vld [vmem:[#allocation8 + $0x168] sm:$0xff]  ;;  %vm755_vm8 = vcmask 1042432   ;;  %vm756_vm9 = vcmask 1046532   ;;  %s3402_s23 = sld [smem:[#allocation14_spill]] }
 0x10a   : > { %v2413_v6 = vld [vmem:[#allocation8 + $0x38] sm:$0xff]  ;;  %1205 = vmatpush.bf16.msra.mxu2 %v2456_v5  ;;  %v2412_v9 = vld [vmem:[#allocation8 + $0x30] sm:$0xff]  ;;  %v2411_v12 = vld [vmem:[#allocation8 + $0x28] sm:$0xff]  ;;  %s2384_s22 = sshll.u32 %s2859_s30, 2  ;;  %s3403_s4 = sld [smem:[#allocation22_spill]] }
 0x10b   : > { %1368 = vmatpush.bf16.msra.mxu3 %v2413_v6  ;;  %v2437_v15 = vld [vmem:[#allocation8 + $0xe0] sm:$0xff]  ;;  %v2436_v23 = vld [vmem:[#allocation8 + $0xd8] sm:$0xff]  ;;  %v2435_v39 = vld [vmem:[#allocation8 + $0xd0] sm:$0xff]  ;;  %s3404_s17 = sld [smem:[#allocation23_spill]]  ;;  %s1846_s20 = sshll.u32 %s3079_s8, 4  ;;  %s1847_s20 = int_to_ptr.vmem [resolvable:$true] %s1846_s20 }
 0x10c   : > { %1168 = vmatpush.bf16.msra.mxu0 %v2439_v7  ;;  %v2445_v16 = vld [vmem:[#allocation8 + $0x120] sm:$0xff]  ;;  %v2444_v27 = vld [vmem:[#allocation8 + $0x118] sm:$0xff]  ;;  %v2443_v41 = vld [vmem:[#allocation8 + $0x110] sm:$0xff]  ;;  %s3405_s15 = sld [smem:[#allocation24_spill]] }
 0x10d   : > { %1187 = vmatpush.bf16.msra.mxu1 %v2447_v8  ;;  %v2453_v17 = vld [vmem:[#allocation8 + $0x160] sm:$0xff]  ;;  %v2045_v19 = vld [vmem:[%s3157_s21 + $0x8] sm:$0xf]  ;;  %v2049_v21 = vld [vmem:[%s3157_s21 + $0xc] sm:$0x1] }
 0x10e   : > { %1206 = vmatpush.bf16.msra.mxu2 %v2455_v40  ;;  %v2410_v18 = vld [vmem:[#allocation8 + $0x20] sm:$0xff]  ;;  %v863_v24 = vshrl.u32 %v2045_v19, 16  ;;  %v866_v25 = vshll.u32 %v2045_v19, 16  ;;  %v872_v13 = vshll.u32 %v2049_v21, 16  ;;  %v2053_v30 = vld [vmem:[%s3157_s21 + $0x8] sm:$0xe]  ;;  %vm3167_vm10 = vmor %vm684_vm6, %vm685_vm7 }
 0x10f   : > { %1369 = vmatpush.bf16.msra.mxu3 %v2412_v9  ;;  %v2046_v20 = vld [vmem:[%s3157_s21 + $0x10] sm:$0xf]  ;;  %v2050_v22 = vld [vmem:[%s3157_s21 + $0x14] sm:$0x1]  ;;  %v2452_v31 = vld [vmem:[#allocation8 + $0x158] sm:$0xff]  ;;  %v2057_v38 = vrot.slane %v2053_v30, 9 }
 0x110   : > { %1169 = vmatpush.bf16.msra.mxu0 %v2438_v43  ;;  %v877_v26 = vshrl.u32 %v2046_v20, 16  ;;  %v880_v28 = vshll.u32 %v2046_v20, 16  ;;  %v886_v29 = vshll.u32 %v2050_v22, 16  ;;  %v2409_v32 = vld [vmem:[#allocation8 + $0x18] sm:$0xff]  ;;  %v865_v33 = vrot.slane %v863_v24, 4  ;;  %v2451_v48 = vld [vmem:[#allocation8 + $0x150] sm:$0xff]  ;;  %vm3173_vm11 = vmor %vm755_vm8, %vm756_vm9 }
 0x111   : > { %1188 = vmatpush.bf16.msra.mxu1 %v2446_v10  ;;  %v868_v34 = vrot.slane %v866_v25, 5  ;;  %v2054_v37 = vld [vmem:[%s3157_s21 + $0x10] sm:$0xe]  ;;  %v874_v44 = vrot.slane %v872_v13, 5  ;;  %v932_v47 = vrot.slane %v2049_v21, 5  ;;  %v2408_v49 = vld [vmem:[#allocation8 + $0x10] sm:$0xff] }
 0x112   : > { %1207 = vmatpush.bf16.msra.mxu2 %v2454_v11  ;;  %v879_v35 = vrot.slane %v877_v26, 4  ;;  %v882_v36 = vrot.slane %v880_v28, 5  ;;  %v888_v46 = vrot.slane %v886_v29, 5  ;;  %v2058_v52 = vrot.slane %v2054_v37, 9  ;;  %v2434_v55 = vld [vmem:[#allocation8 + $0xc8] sm:$0xff]  ;;  %v2433_v1 = vld [vmem:[#allocation8 + $0xc0] sm:$0xff] }
 0x113   : > { %1370 = vmatpush.bf16.msra.mxu3 %v2411_v12  ;;  %v869_v14 = vor.u32 %v868_v34, %v865_v33  ;;  %v936_v53 = vrot.slane %v2050_v22, 5  ;;  %v2442_v56 = vld [vmem:[#allocation8 + $0x108] sm:$0xff]  ;;  %v933_v59 = vsel %vm3173_vm11, %v2057_v38, %v932_v47  ;;  %v2048_v0 = vld [vmem:[%s3157_s21 + $0x20] sm:$0xf]  ;;  %v2063_v2 = vld [vmem:[%s3157_s21 + $0x8] sm:$0xf] }
 0x114   : > { %1170 = vmatpush.bf16.msra.mxu0 %v2437_v15  ;;  %v883_v45 = vor.u32 %v882_v36, %v879_v35  ;;  %v2047_v60 = vld [vmem:[%s3157_s21 + $0x18] sm:$0xf]  ;;  %v905_v5 = vshrl.u32 %v2048_v0, 16  ;;  %v2441_v6 = vld [vmem:[#allocation8 + $0x100] sm:$0xff]  ;;  %v966_v9 = vunpack.c.l.b16 %v933_v59  ;;  %v2037_v43 = vld [vmem:[%s3157_s21] sm:$0xf] }
 0x115   : > { %1189 = vmatpush.bf16.msra.mxu1 %v2445_v16  ;;  %v870_v50 = vrot.slane %v869_v14, 4  ;;  %v2450_v61 = vld [vmem:[#allocation8 + $0x148] sm:$0xff]  ;;  %v937_v63 = vsel %vm3173_vm11, %v2058_v52, %v936_v53  ;;  %v891_v3 = vshrl.u32 %v2047_v60, 16  ;;  %v894_v4 = vshll.u32 %v2047_v60, 16  ;;  %v2431_v7 = vld [vmem:[%s3157_s21 + $0xc] sm:$0xf0] }
 0x116   : > { %1208 = vmatpush.bf16.msra.mxu2 %v2453_v17  ;;  %v884_v54 = vrot.slane %v883_v45, 4  ;;  %v2407_v62 = vld [vmem:[#allocation8 + $0x8] sm:$0xff]  ;;  %v908_v10 = vshll.u32 %v2048_v0, 16  ;;  %v2449_v11 = vld [vmem:[#allocation8 + $0x140] sm:$0xff]  ;;  %v967_v12 = vunpack.c.l.b16 %v937_v63  ;;  %v2404_v20 = vld [vmem:[%s3157_s21 + $0x4] sm:$0xf0]  ;;  %v2064_v25 = vor.u32 %v2431_v7, %v2063_v2 }
 0x117   : > { %1371 = vmatpush.bf16.msra.mxu3 %v2410_v18  ;;  %v875_v57 = vsel %vm3167_vm10, %v870_v50, %v874_v44  ;;  %v2051_v15 = vld [vmem:[%s3157_s21 + $0x1c] sm:$0x1]  ;;  %v893_v16 = vrot.slane %v891_v3, 4  ;;  %v896_v17 = vrot.slane %v894_v4, 5  ;;  %v907_v18 = vrot.slane %v905_v5, 4  ;;  %v2406_v19 = vld [vmem:[#allocation8] sm:$0xff] }
 0x118   : > { %1171 = vmatpush.bf16.msra.mxu0 %v2436_v23  ;;  %v889_v58 = vsel %vm3167_vm10, %v884_v54, %v888_v46  ;;  %v958_v8 = vunpack.c.l.b16 %v875_v57  ;;  %v2052_v21 = vld [vmem:[%s3157_s21 + $0x24] sm:$0x1]  ;;  %v910_v22 = vrot.slane %v908_v10, 5  ;;  %v2421_v23 = vld [vmem:[#allocation8 + $0x78] sm:$0xff]  ;;  %v900_v13 = vshll.u32 %v2051_v15, 16  ;;  %v2419_v53 = vld [vmem:[#allocation8 + $0x68] sm:$0xff] }
 0x119   : > { %1190 = vmatpush.bf16.msra.mxu1 %v2444_v27  ;;  %v959_v40 = vunpack.c.l.b16 %v889_v58  ;;  %v2429_v24 = vld [vmem:[#allocation8 + $0xb8] sm:$0xff]  ;;  %v897_v27 = vor.u32 %v896_v17, %v893_v16  ;;  %v2055_v28 = vld [vmem:[%s3157_s21 + $0x18] sm:$0xe]  ;;  %v970_v29 = vpack.c.b16 %v967_v12, %v966_v9  ;;  %v2038_v30 = vor.u32 %v2404_v20, %v2037_v43  ;;  %v2056_v33 = vld [vmem:[%s3157_s21 + $0x20] sm:$0xe]  ;;  %s2385_s1 = sshll.u32 %s3402_s23, 3 }
 0x11a   : > { %1209 = vmatpush.bf16.msra.mxu2 %v2452_v31  ;;  %v911_v31 = vor.u32 %v910_v22, %v907_v18  ;;  %v2467_v34 = vld [vmem:[#allocation8 + $0x1b8] sm:$0xff]  ;;  %v2420_v36 = vld [vmem:[#allocation8 + $0x70] sm:$0xff]  ;;  %v2059_v14 = vrot.slane %v2055_v28, 9  ;;  %v940_v38 = vrot.slane %v2051_v15, 5  ;;  %v2060_v44 = vrot.slane %v2056_v33, 9  ;;  %v2427_v54 = vld [vmem:[#allocation8 + $0xa8] sm:$0xff]  ;;  %s1843_s9 = sadd.s32 %s2385_s1, %s2384_s22 }
 0x11b   : > { %1372 = vmatpush.bf16.msra.mxu3 %v2409_v32  ;;  %v962_v26 = vpack.c.b16 %v959_v40, %v958_v8  ;;  %v914_v32 = vshll.u32 %v2052_v21, 16  ;;  %v2475_v35 = vld [vmem:[#allocation8 + $0x1f8] sm:$0xff]  ;;  %v2428_v37 = vld [vmem:[#allocation8 + $0xb0] sm:$0xff]  ;;  %v944_v45 = vrot.slane %v2052_v21, 5  ;;  %v2465_v60 = vld [vmem:[#allocation8 + $0x1a8] sm:$0xff]  ;;  %s2386_s30 = sshll.u32 %s1843_s9, 2 }
 0x11c   : > { %1172 = vmatpush.bf16.msra.mxu0 %v2435_v39  ;;  %v898_v39 = vrot.slane %v897_v27, 4  ;;  %v912_v46 = vrot.slane %v911_v31, 4  ;;  %v2474_v50 = vld [vmem:[#allocation8 + $0x1f0] sm:$0xff]  ;;  %v677_v52 = vld [vmem:[%s3157_s21 + $0x8] sm:$0xf]  ;;  %v2418_v2 = vld [vmem:[#allocation8 + $0x60] sm:$0xff]  ;;  %s1845_s18 = scalar_lea.hbm %s3405_s15, %s2386_s30 }
 0x11d   : > { %1191 = vmatpush.bf16.msra.mxu1 %v2443_v41  ;;  %v902_v41 = vrot.slane %v900_v13, 5  ;;  %v916_v47 = vrot.slane %v914_v32, 5  ;;  %v945_v57 = vsel %vm3173_vm11, %v2060_v44, %v944_v45  ;;  %v705_v63 = vshll.u32 %v677_v52, 16  ;;  %v2263_v0 = vld [vmem:[%s3157_s21 + $0x10] sm:$0xf]  ;;  %v2463_v44 = vld [vmem:[#allocation8 + $0x198] sm:$0xff] }
 0x11e   : > { %1210 = vmatpush.bf16.msra.mxu2 %v2451_v48  ;;  %v676_v48 = vld [vmem:[%s3157_s21] sm:$0xf]  ;;  %v2264_v3 = vld [vmem:[%s3157_s21 + $0x18] sm:$0xf]  ;;  %v2426_v4 = vld [vmem:[#allocation8 + $0xa0] sm:$0xff]  ;;  %v969_v40 = vunpack.c.l.b16 %v945_v57  ;;  %v1438_v43 = vshrl.u32 %v2263_v0, 16 }
 0x11f   : > { %1373 = vmatpush.bf16.msra.mxu3 %v2408_v49  ;;  %v2466_v49 = vld [vmem:[#allocation8 + $0x1b0] sm:$0xff]  ;;  %v688_v58 = vshrl.u32 %v676_v48, 16  ;;  %v691_v59 = vshll.u32 %v676_v48, 16  ;;  %v2067_v5 = vld [vmem:[%s3157_s21 + $0x18] sm:$0xf]  ;;  %v2464_v10 = vld [vmem:[#allocation8 + $0x1a0] sm:$0xff] }
 0x120   : > { %1173 = vmatpush.bf16.msra.mxu0 %v2434_v55  ;;  %v941_v55 = vsel %vm3173_vm11, %v2059_v14, %v940_v38  ;;  %v3210_v9 = vld [vmem:[%s3157_s21 + $0x4] sm:$0x1]  ;;  %v2041_v15 = vld [vmem:[%s3157_s21 + $0x10] sm:$0xf]  ;;  %v1441_v18 = vshll.u32 %v2263_v0, 16  ;;  %v707_v22 = vrot.slane %v705_v63, 5 }
 0x121   : > { %1192 = vmatpush.bf16.msra.mxu1 %v2442_v56  ;;  %v903_v56 = vsel %vm3167_vm10, %v898_v39, %v902_v41  ;;  %v968_v8 = vunpack.c.l.b16 %v941_v55  ;;  %v690_v16 = vrot.slane %v688_v58, 4  ;;  %v693_v17 = vrot.slane %v691_v59, 5  ;;  %v3214_v20 = vld [vmem:[%s3157_s21 + $0xc] sm:$0x1]  ;;  %v743_v39 = vld [vmem:[%s3157_s21] sm:$0xe] }
 0x122   : > { %1211 = vmatpush.bf16.msra.mxu2 %v2450_v61  ;;  %v917_v61 = vsel %vm3167_vm10, %v912_v46, %v916_v47  ;;  %v960_v7 = vunpack.c.l.b16 %v903_v56  ;;  %v697_v27 = vshll.u32 %v3210_v9, 16  ;;  %v1440_v13 = vrot.slane %v1438_v43, 4  ;;  %v744_v41 = vld [vmem:[%s3157_s21 + $0x8] sm:$0xe]  ;;  %v2462_v55 = vld [vmem:[#allocation8 + $0x190] sm:$0xff]  ;;  %s1848_s12 = sshll.u32 %s1845_s18, 4  ;;  %s1849_s12 = int_to_ptr.hbm [resolvable:$true] %s1848_s12 }
 0x123   : > { %1374 = vmatpush.bf16.msra.mxu3 %v2407_v62  ;;  %v702_v62 = vshrl.u32 %v677_v52, 16  ;;  %v961_v12 = vunpack.c.l.b16 %v917_v61  ;;  %v1443_v28 = vrot.slane %v1441_v18, 5  ;;  %v694_v14 = vor.u32 %v693_v17, %v690_v16  ;;  %v2471_v45 = vld [vmem:[#allocation8 + $0x1d8] sm:$0xff]  ;;  %v2424_v52 = vld [vmem:[#allocation8 + $0x90] sm:$0xff]  ;;  %v678_v61 = vld [vmem:[%s3157_s21 + $0x10] sm:$0xf] }
 0x124   : > { %1174 = vmatpush.bf16.msra.mxu0 %v2433_v1  ;;  %v2473_v1 = vld [vmem:[#allocation8 + $0x1e8] sm:$0xff]  ;;  %v2470_v56 = vld [vmem:[#allocation8 + $0x1d0] sm:$0xff]  ;;  %v2031_v58 = vrot.slane %v743_v39, 9  ;;  %v2032_v59 = vrot.slane %v744_v41, 9  ;;  %v719_v43 = vshll.u32 %v678_v61, 16  ;;  %s1832_s23 = scalar_lea.sflag [#allocation5], %s343_s5 }
 0x125   : > { %1193 = vmatpush.bf16.msra.mxu1 %v2441_v6  ;;  %v2432_v6 = vld [vmem:[%s3157_s21 + $0x1c] sm:$0xf0]  ;;  %v704_v21 = vrot.slane %v702_v62, 4  ;;  %v1444_v46 = vor.u32 %v1443_v28, %v1440_v13  ;;  %v695_v62 = vrot.slane %v694_v14, 4  ;;  %v2461_v17 = vld [vmem:[#allocation8 + $0x188] sm:$0xff]  ;;  %v2460_v28 = vld [vmem:[#allocation8 + $0x180] sm:$0xff] }
 0x126   : > { %1212 = vmatpush.bf16.msra.mxu2 %v2449_v11  ;;  %v2472_v11 = vld [vmem:[#allocation8 + $0x1e0] sm:$0xff]  ;;  %v2068_v33 = vor.u32 %v2432_v6, %v2067_v5  ;;  %v2415_v5 = vld [vmem:[#allocation8 + $0x48] sm:$0xff]  ;;  %s2763_s22 = sshra.s32 %s1849_s12, 4  ;;  %s2764_s22 = int_to_ptr.hbm [resolvable:$true] %s2763_s22 }
 0x127   : > { %1375 = vmatpush.bf16.msra.mxu3 %v2406_v19  ;;  %1175 = vmatmul.bf16.vlgmr.msra.gmra.mxu0 %v2064_v25  ;;  %v2417_v19 = vld [vmem:[#allocation8 + $0x58] sm:$0xff]  ;;  %v2405_v25 = vld [vmem:[%s3157_s21 + $0x14] sm:$0xf0]  ;;  %v708_v38 = vor.u32 %v707_v22, %v704_v21  ;;  %v1445_v0 = vrot.slane %v1444_v46, 4  ;;  %v682_v39 = vld [vmem:[%s3157_s21 + $0x14] sm:$0x1]  ;;  %p2770_p2 = scmp.lt.s32.totalorder %s2764_s22, %s3405_s15 }
 0x128   : > { %1387 = vmatpush.bf16.msrb.mxu0 %v2421_v23  ;;  %1194 = vmatmul.bf16.vlgmr.msra.gmra.mxu1 %v962_v26  ;;  %v1452_v23 = vshrl.u32 %v2264_v3, 16  ;;  %v2425_v26 = vld [vmem:[#allocation8 + $0x98] sm:$0xff]  ;;  %v2423_v6 = vld [vmem:[#allocation8 + $0x88] sm:$0xff]  ;;  %s2765_s1 = scalar_lea.hbm %s2764_s22, 16 }
 0x129   : > { %1406 = vmatpush.bf16.msrb.mxu1 %v2429_v24  ;;  %1213 = vmatmul.bf16.vlgmr.msra.gmra.mxu2 %v970_v29  ;;  %v1455_v24 = vshll.u32 %v2264_v3, 16  ;;  %v3219_v29 = vld [vmem:[%s3157_s21 + $0x14] sm:$0x1]  ;;  %v709_v63 = vrot.slane %v708_v38, 4  ;;  %v2469_v18 = vld [vmem:[#allocation8 + $0x1c8] sm:$0xff]  ;;  %p2766_p1 = scmp.ne.s32.totalorder %s2764_s22, %s2765_s1 }
 0x12a   : > { %1376 = vmatmul.bf16.vlgmr.msra.gmra.mxu3 %v2038_v30  ;;  %1742 = vmatpush.bf16.msrb.mxu2 %v2467_v34  ;;  %v3222_v30 = vld [vmem:[%s3157_s21 + $0x1c] sm:$0x1]  ;;  %v1454_v31 = vrot.slane %v1452_v23, 4  ;;  %v963_v34 = vpack.c.b16 %v961_v12, %v960_v7  ;;  %v1447_v47 = vshll.u32 %v3219_v29, 16  ;;  %v2265_v7 = vld [vmem:[%s3157_s21 + $0x20] sm:$0xf] }
 0x12b   : > { %1761 = vmatpush.bf16.msrb.mxu3 %v2475_v35  ;;  %v1457_v32 = vrot.slane %v1455_v24, 5  ;;  %v711_v35 = vshll.u32 %v3214_v20, 16  ;;  %v1466_v21 = vshrl.u32 %v2265_v7, 16  ;;  %v1469_v22 = vshll.u32 %v2265_v7, 16  ;;  %v2414_v23 = vld [vmem:[#allocation8 + $0x40] sm:$0xff]  ;;  %p2767_p4 = pnand %p2766_p1, %p2994_p6 }
 0x12c   : > { %1388 = vmatpush.bf16.msrb.mxu0 %v2420_v36  ;;  %v971_v36 = vpack.c.b16 %v969_v40, %v968_v8  ;;  %v2422_v24 = vld [vmem:[#allocation8 + $0x80] sm:$0xff]  ;;  %v683_v41 = vld [vmem:[%s3157_s21 + $0x1c] sm:$0x1]  ;;  %v2458_v46 = vld [vmem:[%s3157_s21 + $0x14] sm:$0xf0] }
 0x12d   : > { %1407 = vmatpush.bf16.msrb.mxu1 %v2428_v37  ;;  %v2042_v37 = vor.u32 %v2405_v25, %v2041_v15  ;;  %v1458_v48 = vor.u32 %v1457_v32, %v1454_v31  ;;  %v713_v57 = vrot.slane %v711_v35, 5  ;;  %v2468_v31 = vld [vmem:[#allocation8 + $0x1c0] sm:$0xff]  ;;  %v2483_v35 = vld [vmem:[#allocation8 + $0x238] sm:$0xff]  ;;  %p2768_p0 = pneg %p2767_p4 }
 0x12e   : > { %1743 = vmatpush.bf16.msrb.mxu2 %v2466_v49  ;;  %v1461_v49 = vshll.u32 %v3222_v30, 16 }
 0x12f   : > { %1762 = vmatpush.bf16.msrb.mxu3 %v2474_v50  ;;  %v2416_v50 = vld [vmem:[#allocation8 + $0x50] sm:$0xff]  ;;  %v714_v12 = vsel %vm3167_vm10, %v709_v63, %v713_v57  ;;  %v739_v57 = vshll.u32 %v683_v41, 16 }
 0x130   : > { %1389 = vmatpush.bf16.msrb.mxu0 %v2419_v53  ;;  %v699_v53 = vrot.slane %v697_v27, 5  ;;  %v1463_v3 = vrot.slane %v1461_v49, 5  ;;  %v2482_v63 = vld [vmem:[#allocation8 + $0x230] sm:$0xff] }
 0x131   : > { %1408 = vmatpush.bf16.msrb.mxu1 %v2427_v54  ;;  %v760_v54 = vrot.slane %v3210_v9, 5  ;;  %v716_v9 = vshrl.u32 %v678_v61, 16 }
 0x132   : > { %1744 = vmatpush.bf16.msrb.mxu2 %v2465_v60  ;;  %v764_v60 = vrot.slane %v3214_v20, 5 }
 0x133   : > { %1763 = vmatpush.bf16.msrb.mxu3 %v2473_v1  ;;  %v1449_v1 = vrot.slane %v1447_v47, 5  ;;  %v761_v8 = vsel %vm3173_vm11, %v2031_v58, %v760_v54  ;;  %v1468_v47 = vrot.slane %v1466_v21, 4 }
 0x134   : > { %1390 = vmatpush.bf16.msrb.mxu0 %v2418_v2  ;;  %v1459_v2 = vrot.slane %v1458_v48, 4  ;;  %v765_v40 = vsel %vm3173_vm11, %v2032_v59, %v764_v60  ;;  %v794_v25 = vunpack.c.l.b16 %v761_v8  ;;  %v1471_v48 = vrot.slane %v1469_v22, 5  ;;  %v2480_v22 = vld [vmem:[#allocation8 + $0x220] sm:$0xff] }
 0x135   : > { %1409 = vmatpush.bf16.msrb.mxu1 %v2426_v4  ;;  %v679_v4 = vld [vmem:[%s3157_s21 + $0x18] sm:$0xf]  ;;  %v768_v8 = vrot.slane %v682_v39, 5 }
 0x136   : > { %1745 = vmatpush.bf16.msrb.mxu2 %v2464_v10  ;;  %v2266_v10 = vld [vmem:[%s3157_s21 + $0x28] sm:$0xf]  ;;  %v730_v15 = vshrl.u32 %v679_v4, 16  ;;  %v733_v16 = vshll.u32 %v679_v4, 16  ;;  %v1464_v20 = vsel %vm3167_vm10, %v1459_v2, %v1463_v3 }
 0x137   : > { %1764 = vmatpush.bf16.msrb.mxu3 %v2472_v11  ;;  %1180 = vmatmul.bf16.gmra.mxu0 %v2068_v33  ;;  %v700_v11 = vsel %vm3167_vm10, %v695_v62, %v699_v53  ;;  %v1480_v27 = vshrl.u32 %v2266_v10, 16  ;;  %v1483_v13 = vshll.u32 %v2266_v10, 16  ;;  %v787_v33 = vunpack.c.l.b16 %v714_v12  ;;  %v3255_v53 = vld [vmem:[%s3157_s21 + $0x2c] sm:$0x1]  ;;  %v745_v62 = vld [vmem:[%s3157_s21 + $0x10] sm:$0xe] }
 0x138   : > { %1391 = vmatpush.bf16.msrb.mxu0 %v2417_v19  ;;  %1199 = vmatmul.bf16.gmra.mxu1 %v963_v34  ;;  %v1450_v19 = vsel %vm3167_vm10, %v1445_v0, %v1449_v1  ;;  %v786_v32 = vunpack.c.l.b16 %v700_v11  ;;  %v2281_v34 = vld [vmem:[%s3157_s21 + $0x10] sm:$0xf]  ;;  %v1534_v38 = vunpack.c.l.b16 %v1464_v20  ;;  %v746_v0 = vld [vmem:[%s3157_s21 + $0x18] sm:$0xe]  ;;  %v1472_v1 = vor.u32 %v1471_v48, %v1468_v47 }
 0x139   : > { %1410 = vmatpush.bf16.msrb.mxu1 %v2425_v26  ;;  %1218 = vmatmul.bf16.gmra.mxu2 %v971_v36  ;;  %v795_v26 = vunpack.c.l.b16 %v765_v40  ;;  %v718_v36 = vrot.slane %v716_v9, 4  ;;  %v1533_v14 = vunpack.c.l.b16 %v1450_v19  ;;  %v1482_v49 = vrot.slane %v1480_v27, 4  ;;  %v2481_v11 = vld [vmem:[#allocation8 + $0x228] sm:$0xff] }
 0x13a   : > { %1381 = vmatmul.bf16.gmra.mxu3 %v2042_v37  ;;  %1746 = vmatpush.bf16.msrb.mxu2 %v2463_v44  ;;  %v721_v37 = vrot.slane %v719_v43, 5  ;;  %v732_v44 = vrot.slane %v730_v15, 4  ;;  %v790_v54 = vpack.c.b16 %v787_v33, %v786_v32  ;;  %v2282_v58 = vor.u32 %v2458_v46, %v2281_v34  ;;  %v2285_v32 = vld [vmem:[%s3157_s21 + $0x20] sm:$0xf]  ;;  %v2459_v33 = vld [vmem:[%s3157_s21 + $0x24] sm:$0xf0] }
 0x13b   : > { %1765 = vmatpush.bf16.msrb.mxu3 %v2471_v45  ;;  %v735_v45 = vrot.slane %v733_v16, 5  ;;  %v1537_v59 = vpack.c.b16 %v1534_v38, %v1533_v14  ;;  %v1489_v4 = vshll.u32 %v3255_v53, 16  ;;  %v2033_v7 = vrot.slane %v745_v62, 9  ;;  %v2479_v34 = vld [vmem:[#allocation8 + $0x218] sm:$0xff]  ;;  %v2478_v14 = vld [vmem:[#allocation8 + $0x210] sm:$0xff] }
 0x13c   : > { %1392 = vmatpush.bf16.msrb.mxu0 %v2416_v50  ;;  %v1485_v50 = vrot.slane %v1483_v13, 5  ;;  %v722_v60 = vor.u32 %v721_v37, %v718_v36  ;;  %v2034_v43 = vrot.slane %v746_v0, 9  ;;  %v772_v10 = vrot.slane %v683_v41, 5  ;;  %v2271_v38 = vld [vmem:[%s3157_s21 + $0x10] sm:$0xe] }
 0x13d   : > { %1411 = vmatpush.bf16.msrb.mxu1 %v2424_v52  ;;  %v3252_v52 = vld [vmem:[%s3157_s21 + $0x24] sm:$0x1]  ;;  %v736_v61 = vor.u32 %v735_v45, %v732_v44  ;;  %v1473_v12 = vrot.slane %v1472_v1, 4  ;;  %v769_v20 = vsel %vm3173_vm11, %v2033_v7, %v768_v8  ;;  %v2286_v37 = vor.u32 %v2459_v33, %v2285_v32  ;;  %v2273_v41 = vld [vmem:[%s3157_s21 + $0x20] sm:$0xe] }
 0x13e   : > { %1747 = vmatpush.bf16.msrb.mxu2 %v2462_v55  ;;  %v798_v55 = vpack.c.b16 %v795_v26, %v794_v25  ;;  %v1475_v2 = vshll.u32 %v3252_v52, 16  ;;  %v1486_v3 = vor.u32 %v1485_v50, %v1482_v49  ;;  %v723_v40 = vrot.slane %v722_v60, 4  ;;  %v2274_v44 = vld [vmem:[%s3157_s21 + $0x28] sm:$0xe] }
 0x13f   : > { %1766 = vmatpush.bf16.msrb.mxu3 %v2470_v56  ;;  %v725_v56 = vshll.u32 %v682_v39, 16  ;;  %v737_v9 = vrot.slane %v736_v61, 4  ;;  %v773_v21 = vsel %vm3173_vm11, %v2034_v43, %v772_v10  ;;  %v796_v27 = vunpack.c.l.b16 %v769_v20  ;;  %v2272_v39 = vld [vmem:[%s3157_s21 + $0x18] sm:$0xe] }
 0x140   : > { %1393 = vmatpush.bf16.msrb.mxu0 %v2415_v5  ;;  %v1477_v15 = vrot.slane %v1475_v2, 5  ;;  %v1487_v16 = vrot.slane %v1486_v3, 4  ;;  %v797_v13 = vunpack.c.l.b16 %v773_v21  ;;  %v1507_v45 = vrot.slane %v3219_v29, 5 }
 0x141   : > { %1412 = vmatpush.bf16.msrb.mxu1 %v2423_v6  ;;  %v727_v5 = vrot.slane %v725_v56, 5  ;;  %v741_v6 = vrot.slane %v739_v57, 5  ;;  %v1511_v46 = vrot.slane %v3222_v30, 5  ;;  %v1515_v47 = vrot.slane %v3252_v52, 5  ;;  %v2477_v56 = vld [vmem:[#allocation8 + $0x208] sm:$0xff]  ;;  %v2476_v57 = vld [vmem:[#allocation8 + $0x200] sm:$0xff] }
 0x142   : > { %1748 = vmatpush.bf16.msrb.mxu2 %v2461_v17  ;;  %v1491_v17 = vrot.slane %v1489_v4, 5  ;;  %v799_v36 = vpack.c.b16 %v797_v13, %v796_v27  ;;  %v1519_v48 = vrot.slane %v3255_v53, 5  ;;  %v2275_v49 = vrot.slane %v2271_v38, 9 }
 0x143   : > { %1767 = vmatpush.bf16.msrb.mxu3 %v2469_v18  ;;  %v728_v18 = vsel %vm3167_vm10, %v723_v40, %v727_v5  ;;  %v742_v19 = vsel %vm3167_vm10, %v737_v9, %v741_v6  ;;  %v2276_v50 = vrot.slane %v2272_v39, 9 }
 0x144   : > { %1394 = vmatpush.bf16.msrb.mxu0 %v2414_v23  ;;  %v1478_v23 = vsel %vm3167_vm10, %v1473_v12, %v1477_v15  ;;  %v788_v25 = vunpack.c.l.b16 %v728_v18  ;;  %v789_v26 = vunpack.c.l.b16 %v742_v19  ;;  %v1508_v29 = vsel %vm3173_vm11, %v2275_v49, %v1507_v45 }
 0x145   : > { %1413 = vmatpush.bf16.msrb.mxu1 %v2422_v24  ;;  %v1492_v24 = vsel %vm3167_vm10, %v1487_v16, %v1491_v17  ;;  %v1512_v30 = vsel %vm3173_vm11, %v2276_v50, %v1511_v46 }
 0x146   : > { %1749 = vmatpush.bf16.msrb.mxu2 %v2460_v28  ;;  %v1535_v28 = vunpack.c.l.b16 %v1478_v23 }
 0x147   : > { %1768 = vmatpush.bf16.msrb.mxu3 %v2468_v31  ;;  %1395 = vmatmul.bf16.vlgmr.msrb.gmra.mxu0 %v790_v54  ;;  %v1536_v31 = vunpack.c.l.b16 %v1492_v24  ;;  %v2277_v54 = vrot.slane %v2273_v41, 9 }
 0x148   : > { %1780 = vmatpush.bf16.msra.mxu0 %v2483_v35  ;;  %1414 = vmatmul.bf16.vlgmr.msrb.gmra.mxu1 %v798_v55  ;;  %v2278_v55 = vrot.slane %v2274_v44, 9 }
 0x149   : > { %2519 = vmatpush.bf16.msra.mxu1 %v2483_v35  ;;  %1750 = vmatmul.bf16.vlgmr.msrb.gmra.mxu2 %v2282_v58  ;;  %v791_v35 = vpack.c.b16 %v789_v26, %v788_v25  ;;  %v1538_v42 = vpack.c.b16 %v1536_v31, %v1535_v28  ;;  %v1516_v52 = vsel %vm3173_vm11, %v2277_v54, %v1515_v47  ;;  %v1541_v58 = vunpack.c.l.b16 %v1508_v29 }
 0x14a   : > { %1769 = vmatmul.bf16.vlgmr.msrb.gmra.mxu3 %v1537_v59  ;;  %v1520_v53 = vsel %vm3173_vm11, %v2278_v55, %v1519_v48  ;;  %v1542_v59 = vunpack.c.l.b16 %v1512_v30  ;;  %v1543_v60 = vunpack.c.l.b16 %v1516_v52 }
 0x14b   : > { %v1544_v61 = vunpack.c.l.b16 %v1520_v53 }
 0x14c   : > { %1781 = vmatpush.bf16.msra.mxu0 %v2482_v63  ;;  %v1545_v62 = vpack.c.b16 %v1542_v59, %v1541_v58 }
 0x14d   : > { %2520 = vmatpush.bf16.msra.mxu1 %v2482_v63  ;;  %v1546_v63 = vpack.c.b16 %v1544_v61, %v1543_v60 }
 0x150   : > { %1782 = vmatpush.bf16.msra.mxu0 %v2481_v11 }
 0x151   : > { %2521 = vmatpush.bf16.msra.mxu1 %v2481_v11 }
 0x154   : > { %1783 = vmatpush.bf16.msra.mxu0 %v2480_v22 }
 0x155   : > { %2522 = vmatpush.bf16.msra.mxu1 %v2480_v22 }
 0x157   : > { %1400 = vmatmul.bf16.gmra.mxu0 %v791_v35 }
 0x158   : > { %1784 = vmatpush.bf16.msra.mxu0 %v2479_v34  ;;  %1419 = vmatmul.bf16.gmra.mxu1 %v799_v36 }
 0x159   : > { %2523 = vmatpush.bf16.msra.mxu1 %v2479_v34  ;;  %1755 = vmatmul.bf16.gmra.mxu2 %v2286_v37 }
 0x15a   : > { %1774 = vmatmul.bf16.gmra.mxu3 %v1538_v42 }
 0x15c   : > { %1785 = vmatpush.bf16.msra.mxu0 %v2478_v14 }
 0x15d   : > { %2524 = vmatpush.bf16.msra.mxu1 %v2478_v14 }
 0x160   : > { %1786 = vmatpush.bf16.msra.mxu0 %v2477_v56 }
 0x161   : > { %2525 = vmatpush.bf16.msra.mxu1 %v2477_v56 }
 0x164   : > { %1787 = vmatpush.bf16.msra.mxu0 %v2476_v57 }
 0x165   : > { %2526 = vmatpush.bf16.msra.mxu1 %v2476_v57  ;;  %v2657_v57 = vld [vmem:[%s3403_s4] ss:$0 sm:$0xff]  ;;  %s2769_s4 = scalar_lea.hbm %s3405_s15, 64 }
 0x166   : > { %p2771_p3 = scmp.lt.s32.totalorder %s2769_s4, %s2765_s1 }
 0x167   : > { %1788 = vmatmul.bf16.vlgmr.msra.gmra.mxu0 %v1545_v62 }
 0x168   : > { %1793 = vmatmul.bf16.vlgmr.msra.gmra.mxu1 %v1546_v63  ;;  %p2772_p5 = por %p2771_p3, %p2770_p2 }
 0x16a   : > { %p2773_p7 = pnand %p2772_p5, %p2768_p0 }
 0x1a4   : > { %v1176_v0 = vpop.f32.mrf.mxu0 }
 0x1a5   : > { %v1195_v1 = vpop.f32.mrf.mxu1 }
 0x1a6   : > { %v1196_v25 = vadd.f32 %v1195_v1, %v1176_v0 }
 0x1ac   : > { %v1214_v2 = vpop.f32.mrf.mxu2  ;;  %v1178_v4 = vpop.f32.mrf.mxu0 }
 0x1ad   : > { %v1377_v3 = vpop.f32.mrf.mxu3  ;;  %v1197_v51 = vpop.f32.mrf.mxu1  ;;  %v1215_v28 = vadd.f32 %v1214_v2, %v1196_v25  ;;  %v2658_v2 = vld [vmem:[%s3404_s17] ss:$0 sm:$0xff] }
 0x1ae   : > { %v1198_v34 = vadd.f32 %v1197_v51, %v1178_v4 }
 0x1af   : > { %v1378_v36 = vadd.f32 %v1377_v3, %v1215_v28 }
 0x1b4   : > { %v1216_v5 = vpop.f32.mrf.mxu2  ;;  %v1181_v7 = vpop.f32.mrf.mxu0 }
 0x1b5   : > { %v1379_v6 = vpop.f32.mrf.mxu3  ;;  %v1200_v8 = vpop.f32.mrf.mxu1  ;;  %v1217_v14 = vadd.f32 %v1216_v5, %v1198_v34 }
 0x1b6   : > { %v1201_v26 = vadd.f32 %v1200_v8, %v1181_v7 }
 0x1b7   : > { %v1380_v49 = vadd.f32 %v1379_v6, %v1217_v14 }
 0x1bc   : > { %v1219_v40 = vpop.f32.mrf.mxu2  ;;  %v1183_v43 = vpop.f32.mrf.mxu0 }
 0x1bd   : > { %v1382_v9 = vpop.f32.mrf.mxu3  ;;  %v1202_v10 = vpop.f32.mrf.mxu1  ;;  %v1220_v31 = vadd.f32 %v1219_v40, %v1201_v26 }
 0x1be   : > { %v1203_v35 = vadd.f32 %v1202_v10, %v1183_v43 }
 0x1bf   : > { %v1383_v37 = vadd.f32 %v1382_v9, %v1220_v31 }
 0x1c4   : > { %v1221_v11 = vpop.f32.mrf.mxu2  ;;  %v1396_v15 = vpop.f32.mrf.mxu0 }
 0x1c5   : > { %v1384_v12 = vpop.f32.mrf.mxu3  ;;  %v1415_v16 = vpop.f32.mrf.mxu1  ;;  %v1222_v38 = vadd.f32 %v1221_v11, %v1203_v35  ;;  %v1397_v39 = vadd.f32 %v1396_v15, %v1378_v36 }
 0x1c7   : > { %v1385_v50 = vadd.f32 %v1384_v12, %v1222_v38  ;;  %v1416_v54 = vadd.f32 %v1415_v16, %v1397_v39 }
 0x1cc   : > { %v1751_v17 = vpop.f32.mrf.mxu2  ;;  %v1398_v19 = vpop.f32.mrf.mxu0 }
 0x1cd   : > { %v1770_v18 = vpop.f32.mrf.mxu3  ;;  %v1417_v20 = vpop.f32.mrf.mxu1  ;;  %v1399_v56 = vadd.f32 %v1398_v19, %v1380_v49 }
 0x1ce   : > { %v1771_v41 = vadd.f32 %v1770_v18, %v1751_v17 }
 0x1cf   : > { %v1418_v61 = vadd.f32 %v1417_v20, %v1399_v56 }
 0x1d4   : > { %v1753_v21 = vpop.f32.mrf.mxu2  ;;  %v1401_v23 = vpop.f32.mrf.mxu0 }
 0x1d5   : > { %v1772_v22 = vpop.f32.mrf.mxu3  ;;  %v1420_v24 = vpop.f32.mrf.mxu1  ;;  %v1402_v44 = vadd.f32 %v1401_v23, %v1383_v37 }
 0x1d6   : > { %v1773_v59 = vadd.f32 %v1772_v22, %v1753_v21 }
 0x1d7   : > { %v1421_v55 = vadd.f32 %v1420_v24, %v1402_v44 }
 0x1dc   : > { %v1403_v27 = vpop.f32.mrf.mxu0  ;;  %v1756_v32 = vpop.f32.mrf.mxu2 }
 0x1dd   : > { %v1422_v13 = vpop.f32.mrf.mxu1  ;;  %v1775_v33 = vpop.f32.mrf.mxu3  ;;  %v1404_v29 = vadd.f32 %v1403_v27, %v1385_v50 }
 0x1de   : > { %v1776_v42 = vadd.f32 %v1775_v33, %v1756_v32 }
 0x1df   : > { %v1423_v62 = vadd.f32 %v1422_v13, %v1404_v29 }
 0x1e4   : > { %v1789_v45 = vpop.f32.mrf.mxu0  ;;  %v1758_v30 = vpop.f32.mrf.mxu2 }
 0x1e5   : > { %v1794_v46 = vpop.f32.mrf.mxu1  ;;  %v1790_v47 = vadd.f32 %v1789_v45, %v1771_v41  ;;  %v1777_v52 = vpop.f32.mrf.mxu3 }
 0x1e6   : > { %v1795_v48 = vadd.f32 %v1794_v46, %v1776_v42  ;;  %v1778_v60 = vadd.f32 %v1777_v52, %v1758_v30 }
 0x1e7   : > { %v1799_v53 = vadd.f32 %v1790_v47, %v1416_v54 }
 0x1e8   : > { %v1801_v58 = vadd.f32 %v1795_v48, %v1421_v55 }
 0x1e9   : > { %v1807_v1 = vmul.f32 %v2657_v57, %v1799_v53 }
 0x1ea   : > { %v1809_v3 = vmul.f32 %v2657_v57, %v1801_v58 }
 0x1eb   : > { %v1815_v7 = vadd.f32 %v2658_v2, %v1807_v1 }
 0x1ec   : > { %v1791_v63 = vpop.f32.mrf.mxu0  ;;  %v1817_v8 = vadd.f32 %v2658_v2, %v1809_v3 }
 0x1ed   : > { %v1796_v0 = vpop.f32.mrf.mxu1  ;;  %v1792_v4 = vadd.f32 %v1791_v63, %v1773_v59  ;;  %v1819_v11 = vmax.f32 %v1815_v7, 0.0 }
 0x1ee   : > { %v1797_v51 = vadd.f32 %v1796_v0, %v1778_v60  ;;  %v1821_v12 = vmax.f32 %v1817_v8, 0.0 }
 0x1ef   : > { %v1800_v5 = vadd.f32 %v1792_v4, %v1418_v61 }
 0x1f0   : > { %v1802_v6 = vadd.f32 %v1797_v51, %v1423_v62 }
 0x1f1   : > { %v1808_v40 = vmul.f32 %v2657_v57, %v1800_v5 }
 0x1f2   : > { %v1810_v9 = vmul.f32 %v2657_v57, %v1802_v6 }
 0x1f3   : > { %v1816_v43 = vadd.f32 %v2658_v2, %v1808_v40 }
 0x1f4   : > { %v1818_v10 = vadd.f32 %v2658_v2, %v1810_v9 }
 0x1f5   : > { %v1820_v15 = vmax.f32 %v1816_v43, 0.0 }
 0x1f6   : > { %v1822_v16 = vmax.f32 %v1818_v10, 0.0 }
 0x1f7   : > { %v2487_v17 = vpack.c.bf16 %v1820_v15, %v1819_v11 }
 0x1f8   : > { %v2492_v18 = vpack.c.bf16 %v1822_v16, %v1821_v12 }
 0x1f9   : > { %2488 = vst [vmem:[%s3079_s8] sm:$0xff] %v2487_v17  }
 0x1fa   : > { %2494 = vst [vmem:[%s3079_s8 + $0x8] sm:$0xff] %v2492_v18  }
 0x1fb   : > { %2776 = shalt.err (!%p2773_p7)
}
 0x1fc   : > { %s2882_s5 = smov 64   ;;  %s2883_s8 = smov 4  }
 0x1fd   : > { %2537 = dma.vmem_to_hbm [thread:$0]  (%p2994_p6), %s1847_s20, 256, %s1849_s12, %s1832_s23, %s2882_s5, %s2882_s5, %s2883_s8  }
 0x1fe PF: > { %s3407_s7 = sld [smem:[#allocation13_spill]]  ;;  %p2559_p8 = scmp.ge.s32.totalorder %s2875_s11, 2 }
 0x200   : > { %p2551_p9 = pnand %p2559_p8, %p3000_p10 }
 0x202   : > { %p2552_p12 = pneg %p2551_p9 }
 0x204   : > { %s1863_s30 = sand.u32 1, %s3407_s7  }
 0x205   : > { %s1864_s6 = scalar_lea.sflag [#allocation5], %s1863_s30 }
 0x206   : > { %2830 = dma.done.wait (%p2552_p12), %s1864_s6, 256  }
 0x207   : > { %2832 = vsyncadd (%p2552_p12), %s1864_s6, 4294967040  ;;  %s24_s11 = sadd.s32 1, %s2875_s11   ;;  %s3409_s14 = smov %s3048_s24 }
 0x208   : > { %p21_p13 = scmp.ge.s32.totalorder %s24_s11, 6   ;;  %s3410_s30 = sld [smem:[#allocation15_spill]] }
 0x209   : > { %s3411_s9 = sld [smem:[#allocation18_spill]]  ;;  %s3413_s24 = smov %s2839_s25 }
 0x20a   : > { %s3412_s18 = sld [smem:[#allocation19_spill]]  ;;  %s3414_s25 = smov %s2843_s26 }
 0x20b   : > { %s3415_s26 = smov %s3051_s27  ;;  %s3416_s27 = smov %s2851_s28 }
 0x20c   : > { %s3417_s28 = smov %s2855_s29  ;;  %s3418_s29 = smov %s3409_s14 }
 0x20d   : > { %s3419_s8 = smov %s2871_s10  ;;  %23 = sbr.rel (!%p21_p13) target bundleno = 16 (0x10), region = 111 }
 0x210   : > { %s3420_s10 = smov %s3412_s18 }
 0x212   :  { %1870 = vsyncpa [#allocation4], 1 }
 0x213   :  { %1872 = vsyncpa [#allocation4 + $0x1], 1 }
 0x214   :  { %1873 = vsyncpa [#allocation7], 1 }
 0x215   :  { %1874 = vsyncpa [#allocation5], 1 }
 0x216   :  { %1876 = vsyncpa [#allocation5 + $0x1], 1 }

// kernel: tpu_custom_call.1
= control target key start
LH: loop header
LB: loop body
LE: loop exit
PB: predicated region body
PF: predicated region fallthrough
CT: control target
= control target key end

     0   :  { %s3354_s0 = inlined_call_operand.hbm [shape: bf16[2,8,8,128], index: 0, kind: input, shape index: {}]   ;;  %s3355_s1 = inlined_call_operand.hbm [shape: bf16[128,128], index: 1, kind: input, shape index: {}]   ;;  %s3356_s2 = inlined_call_operand.vmem [shape: f32[1,128], index: 2, kind: input, shape index: {}]   ;;  %s3357_s3 = inlined_call_operand.vmem [shape: f32[1,128], index: 3, kind: input, shape index: {}]   ;;  %s3358_s4 = inlined_call_operand.hbm [shape: bf16[3,384,128], index: 4, kind: input, shape index: {}]   ;;  %s3359_s5 = inlined_call_operand.vmem [shape: f32[1,128], index: 5, kind: input, shape index: {}]   ;;  %s3360_s6 = inlined_call_operand.vmem [shape: f32[1,128], index: 6, kind: input, shape index: {}]   ;;  %s3361_s7 = inlined_call_operand.hbm [shape: bf16[2,64,128], index: 7, kind: output, shape index: {}]  }
   0x1   :  { %3372 = sst [smem:[#allocation20_spill]] %s3355_s1 }
   0x2   :  { %3373 = sst [smem:[#allocation21_spill]] %s3358_s4 }
   0x3   :  { %3374 = sst [smem:[#allocation22_spill]] %s3359_s5 }
   0x4   :  { %3375 = sst [smem:[#allocation23_spill]] %s3360_s6 }
   0x5   :  { %3376 = sst [smem:[#allocation24_spill]] %s3361_s7 }
   0x6   :  { %12 = vsyncpa [#allocation4], 0 }
   0x7   :  { %14 = vsyncpa [#allocation4 + $0x1], 0 }
   0x8   :  { %15 = vsyncpa [#allocation7], 0 }
   0x9   :  { %16 = vsyncpa [#allocation5], 0 }
   0xa   :  { %18 = vsyncpa [#allocation5 + $0x1], 0  ;;  %s2924_s24 = smov 0   ;;  %s2926_s25 = smov 0  }
   0xb   :  { %s2928_s26 = smov 0   ;;  %s2930_s27 = smov 0  }
   0xc   :  { %s2932_s28 = smov 0   ;;  %s2934_s29 = smov 0  }
   0xd   :  { %s2936_s30 = smov 0   ;;  %s2938_s8 = smov 0  }
   0xe   :  { %s2940_s9 = smov 0   ;;  %s2942_s10 = smov 0  }
   0xf   :  { %s2944_s11 = smov 0  }
  0x10 LB: > { %3377 = sst [smem:[#allocation13_spill]] %s2835_s24  ;;  %s1965_s12 = sadd.s32 4294967295, %s2875_s11   ;;  %s2875_s11 = sphi %s2944_s11, %s24_s11   ;;  %s2871_s10 = sphi %s2942_s10, %s3420_s10   ;;  %s2867_s9 = sphi %s2940_s9, %s3411_s9   ;;  %s2863_s8 = sphi %s2938_s8, %s3419_s8   ;;  %s2859_s30 = sphi %s2936_s30, %s3410_s30   ;;  %s2855_s29 = sphi %s2934_s29, %s3418_s29   ;;  %s2851_s28 = sphi %s2932_s28, %s3417_s28   ;;  %s2847_s27 = sphi %s2930_s27, %s3416_s27   ;;  %s2843_s26 = sphi %s2928_s26, %s3415_s26   ;;  %s2839_s25 = sphi %s2926_s25, %s3414_s25   ;;  %s2835_s24 = sphi %s2924_s24, %s3413_s24  }
  0x11   : > { %3378 = sst [smem:[#allocation14_spill]] %s2863_s8  ;;  %s1966_s13 = sadd.s32 4294967294, %s2875_s11  }
  0x12   : > { %3379 = sst [smem:[#allocation15_spill]] %s2867_s9  ;;  %p56_p0 = scmp.ne.s32.totalorder %s2851_s28, %s2847_s27 }
  0x13   : > { %p2980_p1 = scmp.eq.s32.totalorder %s1965_s12, 0  ;;  %p207_p2 = scmp.ne.s32.totalorder %s2843_s26, %s2839_s25 }
  0x14   : > { %p208_p3 = scmp.eq.s32.totalorder %s1965_s12, 3  ;;  %p213_p5 = scmp.ne.s32.totalorder %s2839_s25, %s2835_s24 }
  0x15   : > { %p2988_p4 = por %p2980_p1, %p56_p0  ;;  %p214_p7 = scmp.eq.s32.totalorder %s1966_s13, 3 }
  0x16   : > { %p2994_p6 = por %p208_p3, %p207_p2  ;;  %p1967_p8 = scmp.ge.s32.totalorder %s2875_s11, 1 }
  0x17   : > { %p221_p9 = scmp.lt.s32.totalorder %s2875_s11, 5  ;;  %p3000_p10 = por %p214_p7, %p213_p5 }
  0x18   : > { %s3382_s16 = scalar_select %p2994_p6, 1, 0 }
  0x19   : > { %s3384_s17 = scalar_select %p3000_p10, 1, 0 }
  0x1a   : > { %3383 = sst [smem:[#allocation16_spill]] %s3382_s16  ;;  %p3004_p11 = pnand %p1967_p8, %p221_p9 }
  0x1b   : > { %3385 = sst [smem:[#allocation17_spill]] %s3384_s17  ;;  %s2877_s22 = smov [#allocation6]  }
  0x1c   : > { %s3387_s1 = sld [smem:[#allocation20_spill]]  ;;  %p2539_p12 = pneg %p3004_p11 }
  0x1d   : > { %s234_s23 = sshll.u32 %s2877_s22, 4  ;;  %s3388_s4 = sld [smem:[#allocation21_spill]]  ;;  %s235_s23 = int_to_ptr.vmem [resolvable:$true] %s234_s23 }
  0x1e   : > { %p2540_p13 = pnand %p2539_p12, %p2980_p1  ;;  %s3362_s19 = smov 64  }
  0x1f   : > { %s3363_s20 = smov 4   ;;  %s2880_s22 = smov [#allocation8]  }
  0x20   : > { %s33_s27 = sadd.s32 1, %s2867_s9  ;;  %s36_s12 = sadd.s32 1, %s2871_s10 }
  0x21   : > { %p34_p0 = scmp.ge.s32.totalorder %s33_s27, 2  ;;  %p50_p2 = scmp.ne.s32.totalorder %s2855_s29, %s2851_s28 }
  0x22   : > { %s232_s21 = sshll.u32 %s3387_s1, 4  ;;  %s254_s1 = sshll.u32 %s2880_s22, 4  ;;  %s233_s21 = int_to_ptr.hbm [resolvable:$true] %s232_s21  ;;  %s255_s1 = int_to_ptr.vmem [resolvable:$true] %s254_s1 }
  0x23   : > { %s252_s13 = sshll.u32 %s3388_s4, 4  ;;  %s3422_s27 = smov (%p34_p0, %s33_s27), 0  ;;  %s253_s13 = int_to_ptr.hbm [resolvable:$true] %s252_s13 }
  0x24   : > { %2542 = dma.hbm_to_vmem [thread:$0]  (!%p2540_p13), %s233_s21, 1024, %s235_s23, [#allocation7], %s3362_s19, %s3362_s19, %s3363_s20  }
  0x25   : > { %2545 = dma.hbm_to_vmem [thread:$0]  (!%p2540_p13), %s253_s13, 9216, %s255_s1, [#allocation7], %s3362_s19, %s3362_s19, %s3363_s20  }
  0x26   : > { %3389 = sst [smem:[#allocation18_spill]] %s3422_s27  ;;  %s3424_s12 = smov (!%p34_p0, %s36_s12), %s2871_s10 }
  0x27   : > { %s43_s21 = sadd.s32 1, %s2855_s29  ;;  %p51_p3 = scmp.eq.s32.totalorder %s2875_s11, 0 }
  0x28   : > { %p38_p5 = scmp.ge.s32.totalorder %s3424_s12, 2  ;;  %s193_s23 = ssub.s32 %s2867_s9, %s3422_s27 }
  0x29   : > { %p3035_p7 = por %p51_p3, %p50_p2  ;;  %s197_s1 = sadd.s32 1, %s2843_s26 }
  0x2a   : > { %s3426_s12 = smov (%p38_p5, %s3424_s12), 0  ;;  %p2556_p8 = scmp.lt.s32.totalorder %s2875_s11, 4 }
  0x2b   : > { %3391 = sst [smem:[#allocation19_spill]] %s3426_s12  ;;  %s274_s13 = sand.u32 1, %s2855_s29  }
  0x2c   : > { %s40_s19 = ssub.s32 %s2871_s10, %s3426_s12  ;;  %s2389_s20 = sshll.u32 %s2871_s10, 5 }
  0x2d   : > { %p41_p9 = scmp.eq.s32.totalorder %s40_s19, 0  ;;  %s194_s4 = sor.u32 %s193_s23, %s40_s19 }
  0x2e   : > { %p195_p12 = scmp.eq.s32.totalorder %s194_s4, 0  ;;  %s1971_s17 = sshll.u32 %s274_s13, 5 }
  0x2f   : > { %s3048_s24 = scalar_select %p41_p9, %s2855_s29, %s43_s21  }
  0x30   : > { %s3051_s27 = scalar_select %p195_p12, %s2843_s26, %s197_s1  }
  0x31   : > { %s283_s7 = scalar_lea.hbm %s3354_s0, %s2389_s20  ;;  %s278_s5 = scalar_lea.vmem [#allocation3], %s1971_s17 }
  0x32   : > { %s284_s6 = sshll.u32 %s283_s7, 4  ;;  %s286_s8 = sshll.u32 %s278_s5, 4  ;;  %s285_s6 = int_to_ptr.hbm [resolvable:$true] %s284_s6  ;;  %s287_s8 = int_to_ptr.vmem [resolvable:$true] %s286_s8 }
  0x33   : > { %p2547_p13 = pnand %p2556_p8, %p3035_p7  ;;  %s275_s12 = scalar_lea.sflag [#allocation4], %s274_s13 }
  0x34   : > { %s3392_s19 = smov 4   ;;  %s3393_s4 = smov 64  }
  0x35   : > { %2549 = dma.hbm_to_vmem [thread:$0]  (!%p2547_p13), %s285_s6, 512, %s287_s8, %s275_s12, %s3393_s4, %s3393_s4, %s3392_s19  }
  0x36   : > { %298 = sbr.rel (%p3004_p11) target bundleno = 510 (0x1fe), region = 48  ;;  %s300_s9 = sand.u32 (!%p3004_p11), 1, %s2851_s28  }
  0x37   : > { %s1975_s16 = sshll.u32 (!%p3004_p11), %s300_s9, 5  ;;  %s301_s7 = scalar_lea.sflag (!%p3004_p11), [#allocation4], %s300_s9 }
  0x38   : > { %s3066_s17 = scalar_lea.vmem (!%p3004_p11), [#allocation3], %s1975_s16 }
  0x3b   : > { %2822 = dma.done.wait (%p2988_p4), %s301_s7, 512  }
  0x3c   : > { %2824 = vsyncadd (%p2988_p4), %s301_s7, 4294966784 }
  0x3d   : > { %2826 = dma.done.wait (%p2980_p1), [#allocation7], 10240  }
  0x3e   : > { %2828 = vsyncadd (%p2980_p1), [#allocation7], 4294957056  ;;  %s343_s5 = sand.u32 1, %s2839_s25   ;;  %p1979_p11 = scmp.ne.s32.totalorder %s2859_s30, 0 }
  0x3f   : > { %s1978_s6 = sshll.u32 %s343_s5, 4 }
  0x40   : > { %s3079_s8 = scalar_lea.vmem [#allocation9], %s1978_s6  ;;  %351 = sbr.rel (%p1979_p11) target bundleno = 263 (0x107), region = 64 }
  0x45   : > { %v2401_v0 = vld [vmem:[#allocation6 + $0x38] sm:$0xff]  ;;  %v2400_v1 = vld [vmem:[#allocation6 + $0x30] sm:$0xff]  ;;  %v2399_v2 = vld [vmem:[#allocation6 + $0x28] sm:$0xff]  ;;  %v2881_v12 = vmov 0   ;;  %vm618_vm0 = vcmask 1043456   ;;  %vm624_vm2 = vcmask 1040384  }
  0x46   : > { %448 = vmatpush.bf16.msra.mxu0 %v2401_v0  ;;  %2495 = vmatpush.bf16.msra.mxu1 %v2401_v0  ;;  %v2398_v3 = vld [vmem:[#allocation6 + $0x20] sm:$0xff]  ;;  %v2397_v4 = vld [vmem:[#allocation6 + $0x18] sm:$0xff]  ;;  %v2396_v5 = vld [vmem:[#allocation6 + $0x10] sm:$0xff]  ;;  %511 = vst [vmem:[#allocation2 + $0x8] sm:$0xf] %v2881_v12 }
  0x47   : > { %2496 = vmatpush.bf16.msra.mxu2 %v2401_v0  ;;  %2497 = vmatpush.bf16.msra.mxu3 %v2401_v0  ;;  %v2395_v6 = vld [vmem:[#allocation6 + $0x8] sm:$0xff]  ;;  %v2394_v7 = vld [vmem:[#allocation6] sm:$0xff]  ;;  %v2392_v10 = vld [vmem:[%s3066_s17 + $0x10] sm:$0xff]  ;;  %512 = vst [vmem:[#allocation2 + $0xc] sm:$0x1] %v2881_v12 }
  0x48   : > { %v2390_v8 = vld [vmem:[%s3066_s17] sm:$0xff]  ;;  %v2391_v9 = vld [vmem:[%s3066_s17 + $0x8] sm:$0xff]  ;;  %v2393_v11 = vld [vmem:[%s3066_s17 + $0x18] sm:$0xff]  ;;  %509 = vst [vmem:[#allocation2] sm:$0xf] %v2881_v12 }
  0x49   : > { %510 = vst [vmem:[#allocation2 + $0x4] sm:$0x1] %v2881_v12  ;;  %v3089_v13 = vld [vmem:[%s3356_s2] ss:$0 sm:$0xff]  ;;  %vm619_vm1 = vsmask.f32 7938 }
  0x4a   : > { %449 = vmatpush.bf16.msra.mxu0 %v2400_v1  ;;  %2498 = vmatpush.bf16.msra.mxu1 %v2400_v1  ;;  %513 = vst [vmem:[#allocation2 + $0x10] sm:$0xf] %v2881_v12  ;;  %v3094_v14 = vld [vmem:[%s3357_s3] ss:$0 sm:$0xff]  ;;  %vm625_vm3 = vsmask.f32 256  ;;  %vm3108_vm4 = vmand %vm618_vm0, %vm619_vm1 }
  0x4b   : > { %2499 = vmatpush.bf16.msra.mxu2 %v2400_v1  ;;  %2500 = vmatpush.bf16.msra.mxu3 %v2400_v1  ;;  %514 = vst [vmem:[#allocation2 + $0x14] sm:$0x1] %v2881_v12  ;;  %vm3114_vm5 = vmand %vm624_vm2, %vm625_vm3 }
  0x4c   : > { %515 = vst [vmem:[#allocation2 + $0x18] sm:$0xf] %v2881_v12 }
  0x4d   : > { %516 = vst [vmem:[#allocation2 + $0x1c] sm:$0x1] %v2881_v12  ;;  %v621_v41 = vld [vmem:[#allocation2 + $0x8] sm:$0xf] }
  0x4e   : > { %450 = vmatpush.bf16.msra.mxu0 %v2399_v2  ;;  %2501 = vmatpush.bf16.msra.mxu1 %v2399_v2  ;;  %517 = vst [vmem:[#allocation2 + $0x20] sm:$0xf] %v2881_v12  ;;  %v627_v44 = vld [vmem:[#allocation2 + $0xc] sm:$0x1] }
  0x4f   : > { %2502 = vmatpush.bf16.msra.mxu2 %v2399_v2  ;;  %2503 = vmatpush.bf16.msra.mxu3 %v2399_v2  ;;  %518 = vst [vmem:[#allocation2 + $0x24] sm:$0x1] %v2881_v12 }
  0x50   : > { %519 = vst [vmem:[#allocation2 + $0x28] sm:$0xf] %v2881_v12 }
  0x51   : > { %520 = vst [vmem:[#allocation2 + $0x2c] sm:$0x1] %v2881_v12 }
  0x52   : > { %451 = vmatpush.bf16.msra.mxu0 %v2398_v3  ;;  %2504 = vmatpush.bf16.msra.mxu1 %v2398_v3  ;;  %521 = vst [vmem:[#allocation2 + $0x30] sm:$0xf] %v2881_v12 }
  0x53   : > { %2505 = vmatpush.bf16.msra.mxu2 %v2398_v3  ;;  %2506 = vmatpush.bf16.msra.mxu3 %v2398_v3  ;;  %522 = vst [vmem:[#allocation2 + $0x34] sm:$0x1] %v2881_v12  ;;  %v636_v45 = vld [vmem:[#allocation2 + $0x18] sm:$0xf] }
  0x54   : > { %523 = vst [vmem:[#allocation2 + $0x38] sm:$0xf] %v2881_v12  ;;  %v639_v54 = vld [vmem:[#allocation2 + $0x1c] sm:$0x1] }
  0x55   : > { %524 = vst [vmem:[#allocation2 + $0x3c] sm:$0x1] %v2881_v12 }
  0x56   : > { %452 = vmatpush.bf16.msra.mxu0 %v2397_v4  ;;  %2507 = vmatpush.bf16.msra.mxu1 %v2397_v4  ;;  %525 = vst [vmem:[#allocation2 + $0x40] sm:$0xf] %v2881_v12 }
  0x57   : > { %2508 = vmatpush.bf16.msra.mxu2 %v2397_v4  ;;  %2509 = vmatpush.bf16.msra.mxu3 %v2397_v4  ;;  %526 = vst [vmem:[#allocation2 + $0x44] sm:$0x1] %v2881_v12  ;;  %v648_v3 = vld [vmem:[#allocation2 + $0x28] sm:$0xf] }
  0x58   : > { %527 = vst [vmem:[#allocation2 + $0x48] sm:$0xf] %v2881_v12  ;;  %v651_v4 = vld [vmem:[#allocation2 + $0x2c] sm:$0x1] }
  0x59   : > { %528 = vst [vmem:[#allocation2 + $0x4c] sm:$0x1] %v2881_v12 }
  0x5a   : > { %453 = vmatpush.bf16.msra.mxu0 %v2396_v5  ;;  %2510 = vmatpush.bf16.msra.mxu1 %v2396_v5 }
  0x5b   : > { %2511 = vmatpush.bf16.msra.mxu2 %v2396_v5  ;;  %2512 = vmatpush.bf16.msra.mxu3 %v2396_v5  ;;  %v660_v5 = vld [vmem:[#allocation2 + $0x38] sm:$0xf] }
  0x5e   : > { %454 = vmatpush.bf16.msra.mxu0 %v2395_v6  ;;  %2513 = vmatpush.bf16.msra.mxu1 %v2395_v6 }
  0x5f   : > { %2514 = vmatpush.bf16.msra.mxu2 %v2395_v6  ;;  %2515 = vmatpush.bf16.msra.mxu3 %v2395_v6  ;;  %v663_v6 = vld [vmem:[#allocation2 + $0x3c] sm:$0x1] }
  0x62   : > { %455 = vmatpush.bf16.msra.mxu0 %v2394_v7  ;;  %2516 = vmatpush.bf16.msra.mxu1 %v2394_v7 }
  0x63   : > { %2517 = vmatpush.bf16.msra.mxu2 %v2394_v7  ;;  %2518 = vmatpush.bf16.msra.mxu3 %v2394_v7 }
  0x65   : > { %456 = vmatmul.bf16.vlgmr.msra.gmra.mxu0 %v2390_v8  ;;  %461 = vmatmul.bf16.vlgmr.msra.gmra.mxu1 %v2391_v9 }
  0x66   : > { %466 = vmatmul.bf16.vlgmr.msra.gmra.mxu2 %v2392_v10  ;;  %471 = vmatmul.bf16.vlgmr.msra.gmra.mxu3 %v2393_v11 }
  0xe2   : > { %v457_v15 = vpop.f32.mrf.mxu0  ;;  %v462_v16 = vpop.f32.mrf.mxu1 }
  0xe3   : > { %v481_v17 = vmul.f32 %v3089_v13, %v457_v15  ;;  %v483_v18 = vmul.f32 %v3089_v13, %v462_v16 }
  0xe5   : > { %v493_v19 = vadd.f32 %v3094_v14, %v481_v17  ;;  %v495_v20 = vadd.f32 %v3094_v14, %v483_v18 }
  0xe7   : > { %v501_v21 = vmax.f32 %v493_v19, 0.0  ;;  %v503_v22 = vmax.f32 %v495_v20, 0.0 }
  0xe9   : > { %v529_v23 = vpack.c.bf16 %v501_v21, %v501_v21  ;;  %v531_v24 = vpack.c.bf16 %v503_v22, %v503_v22  ;;  %v467_v25 = vpop.f32.mrf.mxu2  ;;  %v472_v26 = vpop.f32.mrf.mxu3 }
  0xea   : > { %v485_v27 = vmul.f32 %v3089_v13, %v467_v25  ;;  %v487_v28 = vmul.f32 %v3089_v13, %v472_v26  ;;  %v459_v29 = vpop.f32.mrf.mxu0  ;;  %v464_v30 = vpop.f32.mrf.mxu1 }
  0xeb   : > { %v538_v31 = vshrl.u32 %v529_v23, 16  ;;  %v541_v32 = vshll.u32 %v529_v23, 16  ;;  %v554_v33 = vshrl.u32 %v531_v24, 16  ;;  %v557_v34 = vshll.u32 %v531_v24, 16 }
  0xec   : > { %v497_v35 = vadd.f32 %v3094_v14, %v485_v27  ;;  %v499_v36 = vadd.f32 %v3094_v14, %v487_v28  ;;  %v482_v37 = vmul.f32 %v3089_v13, %v459_v29  ;;  %v484_v38 = vmul.f32 %v3089_v13, %v464_v30 }
  0xed   : > { %v540_v39 = vrot.slane %v538_v31, 7  ;;  %v556_v42 = vrot.slane %v554_v33, 7  ;;  %v633_v33 = vld [vmem:[#allocation2 + $0x14] sm:$0x1] }
  0xee   : > { %v505_v46 = vmax.f32 %v497_v35, 0.0  ;;  %v507_v47 = vmax.f32 %v499_v36, 0.0  ;;  %v494_v48 = vadd.f32 %v3094_v14, %v482_v37  ;;  %v496_v49 = vadd.f32 %v3094_v14, %v484_v38  ;;  %v645_v38 = vld [vmem:[#allocation2 + $0x24] sm:$0x1] }
  0xef   : > { %v543_v50 = vor.u32 %v541_v32, %v540_v39  ;;  %v544_v51 = vrot.slane %v540_v39, 4  ;;  %v559_v52 = vor.u32 %v557_v34, %v556_v42  ;;  %v560_v53 = vrot.slane %v556_v42, 4  ;;  %v630_v32 = vld [vmem:[#allocation2 + $0x10] sm:$0xf] }
  0xf0   : > { %v533_v55 = vpack.c.bf16 %v505_v46, %v505_v46  ;;  %v535_v56 = vpack.c.bf16 %v507_v47, %v507_v47  ;;  %v502_v57 = vmax.f32 %v494_v48, 0.0  ;;  %v504_v58 = vmax.f32 %v496_v49, 0.0 }
  0xf1   : > { %v622_v59 = vsel %vm3108_vm4, %v543_v50, %v621_v41  ;;  %v628_v60 = vsel %vm3114_vm5, %v544_v51, %v627_v44  ;;  %v637_v61 = vsel %vm3108_vm4, %v559_v52, %v636_v45  ;;  %v469_v62 = vpop.f32.mrf.mxu2  ;;  %v474_v63 = vpop.f32.mrf.mxu3  ;;  %v640_v0 = vsel %vm3114_vm5, %v560_v53, %v639_v54 }
  0xf2   : > { %623 = vst [vmem:[#allocation2 + $0x8] sm:$0xf] %v622_v59  ;;  %v570_v1 = vshrl.u32 %v533_v55, 16  ;;  %v586_v2 = vshrl.u32 %v535_v56, 16  ;;  %v530_v7 = vpack.c.bf16 %v502_v57, %v502_v57  ;;  %v532_v8 = vpack.c.bf16 %v504_v58, %v504_v58  ;;  %v666_v57 = vld [vmem:[#allocation2 + $0x40] sm:$0xf] }
  0xf3   : > { %629 = vst [vmem:[#allocation2 + $0xc] sm:$0x1] %v628_v60  ;;  %v486_v9 = vmul.f32 %v3089_v13, %v469_v62  ;;  %v488_v10 = vmul.f32 %v3089_v13, %v474_v63  ;;  %v573_v12 = vshll.u32 %v533_v55, 16  ;;  %v589_v16 = vshll.u32 %v535_v56, 16  ;;  %v654_v55 = vld [vmem:[#allocation2 + $0x30] sm:$0xf] }
  0xf4   : > { %638 = vst [vmem:[#allocation2 + $0x18] sm:$0xf] %v637_v61  ;;  %v572_v11 = vrot.slane %v570_v1, 7  ;;  %v588_v15 = vrot.slane %v586_v2, 7  ;;  %v546_v17 = vshrl.u32 %v530_v7, 16  ;;  %v549_v18 = vshll.u32 %v530_v7, 16 }
  0xf5   : > { %641 = vst [vmem:[#allocation2 + $0x1c] sm:$0x1] %v640_v0  ;;  %v562_v19 = vshrl.u32 %v532_v8, 16  ;;  %v565_v20 = vshll.u32 %v532_v8, 16  ;;  %v498_v27 = vadd.f32 %v3094_v14, %v486_v9  ;;  %v500_v13 = vadd.f32 %v3094_v14, %v488_v10  ;;  %v642_v14 = vld [vmem:[#allocation2 + $0x20] sm:$0xf] }
  0xf6   : > { %v575_v21 = vor.u32 %v573_v12, %v572_v11  ;;  %v576_v22 = vrot.slane %v572_v11, 4  ;;  %v591_v23 = vor.u32 %v589_v16, %v588_v15  ;;  %v592_v24 = vrot.slane %v588_v15, 4  ;;  %v657_v56 = vld [vmem:[#allocation2 + $0x34] sm:$0x1]  ;;  %v669_v62 = vld [vmem:[#allocation2 + $0x44] sm:$0x1] }
  0xf7   : > { %v548_v25 = vrot.slane %v546_v17, 7  ;;  %v564_v26 = vrot.slane %v562_v19, 7  ;;  %v506_v39 = vmax.f32 %v498_v27, 0.0  ;;  %v508_v41 = vmax.f32 %v500_v13, 0.0 }
  0xf8   : > { %v649_v28 = vsel %vm3108_vm4, %v575_v21, %v648_v3  ;;  %v652_v29 = vsel %vm3114_vm5, %v576_v22, %v651_v4  ;;  %v661_v30 = vsel %vm3108_vm4, %v591_v23, %v660_v5  ;;  %v664_v31 = vsel %vm3114_vm5, %v592_v24, %v663_v6 }
  0xf9   : > { %650 = vst [vmem:[#allocation2 + $0x28] sm:$0xf] %v649_v28  ;;  %v551_v34 = vor.u32 %v549_v18, %v548_v25  ;;  %v552_v35 = vrot.slane %v548_v25, 4  ;;  %v567_v36 = vor.u32 %v565_v20, %v564_v26  ;;  %v568_v37 = vrot.slane %v564_v26, 4 }
  0xfa   : > { %653 = vst [vmem:[#allocation2 + $0x2c] sm:$0x1] %v652_v29  ;;  %v534_v46 = vpack.c.bf16 %v506_v39, %v506_v39  ;;  %v536_v47 = vpack.c.bf16 %v508_v41, %v508_v41 }
  0xfb   : > { %662 = vst [vmem:[#allocation2 + $0x38] sm:$0xf] %v661_v30  ;;  %v631_v42 = vsel %vm3108_vm4, %v551_v34, %v630_v32  ;;  %v634_v44 = vsel %vm3114_vm5, %v552_v35, %v633_v33  ;;  %v643_v45 = vsel %vm3108_vm4, %v567_v36, %v642_v14  ;;  %v646_v48 = vsel %vm3114_vm5, %v568_v37, %v645_v38 }
  0xfc   : > { %665 = vst [vmem:[#allocation2 + $0x3c] sm:$0x1] %v664_v31  ;;  %v578_v49 = vshrl.u32 %v534_v46, 16  ;;  %v594_v50 = vshrl.u32 %v536_v47, 16  ;;  %v581_v52 = vshll.u32 %v534_v46, 16  ;;  %v597_v54 = vshll.u32 %v536_v47, 16 }
  0xfd   : > { %632 = vst [vmem:[#allocation2 + $0x10] sm:$0xf] %v631_v42 }
  0xfe   : > { %635 = vst [vmem:[#allocation2 + $0x14] sm:$0x1] %v634_v44  ;;  %v580_v51 = vrot.slane %v578_v49, 7  ;;  %v596_v53 = vrot.slane %v594_v50, 7 }
  0xff   : > { %644 = vst [vmem:[#allocation2 + $0x20] sm:$0xf] %v643_v45 }
 0x100   : > { %647 = vst [vmem:[#allocation2 + $0x24] sm:$0x1] %v646_v48  ;;  %v583_v58 = vor.u32 %v581_v52, %v580_v51  ;;  %v584_v59 = vrot.slane %v580_v51, 4  ;;  %v599_v60 = vor.u32 %v597_v54, %v596_v53  ;;  %v600_v61 = vrot.slane %v596_v53, 4 }
 0x102   : > { %v655_v63 = vsel %vm3108_vm4, %v583_v58, %v654_v55  ;;  %v658_v0 = vsel %vm3114_vm5, %v584_v59, %v657_v56  ;;  %v667_v1 = vsel %vm3108_vm4, %v599_v60, %v666_v57  ;;  %v670_v2 = vsel %vm3114_vm5, %v600_v61, %v669_v62 }
 0x103   : > { %656 = vst [vmem:[#allocation2 + $0x30] sm:$0xf] %v655_v63 }
 0x104   : > { %659 = vst [vmem:[#allocation2 + $0x34] sm:$0x1] %v658_v0 }
 0x105   : > { %668 = vst [vmem:[#allocation2 + $0x40] sm:$0xf] %v667_v1 }
 0x106   : > { %671 = vst [vmem:[#allocation2 + $0x44] sm:$0x1] %v670_v2 }
 0x107 PF: > { %v2440_v3 = vld [vmem:[#allocation8 + $0xf8] sm:$0xff]  ;;  %v2439_v7 = vld [vmem:[#allocation8 + $0xf0] sm:$0xff]  ;;  %s2403_s12 = sshll.u32 %s2859_s30, 5  ;;  %v2438_v43 = vld [vmem:[#allocation8 + $0xe8] sm:$0xff]  ;;  %vm684_vm6 = vsmask.f32 3328 }
 0x108   : > { %v2448_v4 = vld [vmem:[#allocation8 + $0x138] sm:$0xff]  ;;  %1167 = vmatpush.bf16.msra.mxu0 %v2440_v3  ;;  %v2447_v8 = vld [vmem:[#allocation8 + $0x130] sm:$0xff]  ;;  %v2446_v10 = vld [vmem:[#allocation8 + $0x128] sm:$0xff]  ;;  %s3157_s21 = scalar_lea.vmem [#allocation2], %s2403_s12  ;;  %vm685_vm7 = vsmask.f32 7440 }
 0x109   : > { %v2456_v5 = vld [vmem:[#allocation8 + $0x178] sm:$0xff]  ;;  %1186 = vmatpush.bf16.msra.mxu1 %v2448_v4  ;;  %v2455_v40 = vld [vmem:[#allocation8 + $0x170] sm:$0xff]  ;;  %v2454_v11 = vld [vmem:[#allocation8 + $0x168] sm:$0xff]  ;;  %vm755_vm8 = vcmask 1042432   ;;  %vm756_vm9 = vcmask 1046532   ;;  %s3402_s23 = sld [smem:[#allocation14_spill]] }
 0x10a   : > { %v2413_v6 = vld [vmem:[#allocation8 + $0x38] sm:$0xff]  ;;  %1205 = vmatpush.bf16.msra.mxu2 %v2456_v5  ;;  %v2412_v9 = vld [vmem:[#allocation8 + $0x30] sm:$0xff]  ;;  %v2411_v12 = vld [vmem:[#allocation8 + $0x28] sm:$0xff]  ;;  %s2384_s22 = sshll.u32 %s2859_s30, 2  ;;  %s3403_s4 = sld [smem:[#allocation22_spill]] }
 0x10b   : > { %1368 = vmatpush.bf16.msra.mxu3 %v2413_v6  ;;  %v2437_v15 = vld [vmem:[#allocation8 + $0xe0] sm:$0xff]  ;;  %v2436_v23 = vld [vmem:[#allocation8 + $0xd8] sm:$0xff]  ;;  %v2435_v39 = vld [vmem:[#allocation8 + $0xd0] sm:$0xff]  ;;  %s3404_s17 = sld [smem:[#allocation23_spill]]  ;;  %s1846_s20 = sshll.u32 %s3079_s8, 4  ;;  %s1847_s20 = int_to_ptr.vmem [resolvable:$true] %s1846_s20 }
 0x10c   : > { %1168 = vmatpush.bf16.msra.mxu0 %v2439_v7  ;;  %v2445_v16 = vld [vmem:[#allocation8 + $0x120] sm:$0xff]  ;;  %v2444_v27 = vld [vmem:[#allocation8 + $0x118] sm:$0xff]  ;;  %v2443_v41 = vld [vmem:[#allocation8 + $0x110] sm:$0xff]  ;;  %s3405_s15 = sld [smem:[#allocation24_spill]] }
 0x10d   : > { %1187 = vmatpush.bf16.msra.mxu1 %v2447_v8  ;;  %v2453_v17 = vld [vmem:[#allocation8 + $0x160] sm:$0xff]  ;;  %v2045_v19 = vld [vmem:[%s3157_s21 + $0x8] sm:$0xf]  ;;  %v2049_v21 = vld [vmem:[%s3157_s21 + $0xc] sm:$0x1] }
 0x10e   : > { %1206 = vmatpush.bf16.msra.mxu2 %v2455_v40  ;;  %v2410_v18 = vld [vmem:[#allocation8 + $0x20] sm:$0xff]  ;;  %v863_v24 = vshrl.u32 %v2045_v19, 16  ;;  %v866_v25 = vshll.u32 %v2045_v19, 16  ;;  %v872_v13 = vshll.u32 %v2049_v21, 16  ;;  %v2053_v30 = vld [vmem:[%s3157_s21 + $0x8] sm:$0xe]  ;;  %vm3167_vm10 = vmor %vm684_vm6, %vm685_vm7 }
 0x10f   : > { %1369 = vmatpush.bf16.msra.mxu3 %v2412_v9  ;;  %v2046_v20 = vld [vmem:[%s3157_s21 + $0x10] sm:$0xf]  ;;  %v2050_v22 = vld [vmem:[%s3157_s21 + $0x14] sm:$0x1]  ;;  %v2452_v31 = vld [vmem:[#allocation8 + $0x158] sm:$0xff]  ;;  %v2057_v38 = vrot.slane %v2053_v30, 9 }
 0x110   : > { %1169 = vmatpush.bf16.msra.mxu0 %v2438_v43  ;;  %v877_v26 = vshrl.u32 %v2046_v20, 16  ;;  %v880_v28 = vshll.u32 %v2046_v20, 16  ;;  %v886_v29 = vshll.u32 %v2050_v22, 16  ;;  %v2409_v32 = vld [vmem:[#allocation8 + $0x18] sm:$0xff]  ;;  %v865_v33 = vrot.slane %v863_v24, 4  ;;  %v2451_v48 = vld [vmem:[#allocation8 + $0x150] sm:$0xff]  ;;  %vm3173_vm11 = vmor %vm755_vm8, %vm756_vm9 }
 0x111   : > { %1188 = vmatpush.bf16.msra.mxu1 %v2446_v10  ;;  %v868_v34 = vrot.slane %v866_v25, 5  ;;  %v2054_v37 = vld [vmem:[%s3157_s21 + $0x10] sm:$0xe]  ;;  %v874_v44 = vrot.slane %v872_v13, 5  ;;  %v932_v47 = vrot.slane %v2049_v21, 5  ;;  %v2408_v49 = vld [vmem:[#allocation8 + $0x10] sm:$0xff] }
 0x112   : > { %1207 = vmatpush.bf16.msra.mxu2 %v2454_v11  ;;  %v879_v35 = vrot.slane %v877_v26, 4  ;;  %v882_v36 = vrot.slane %v880_v28, 5  ;;  %v888_v46 = vrot.slane %v886_v29, 5  ;;  %v2058_v52 = vrot.slane %v2054_v37, 9  ;;  %v2434_v55 = vld [vmem:[#allocation8 + $0xc8] sm:$0xff]  ;;  %v2433_v1 = vld [vmem:[#allocation8 + $0xc0] sm:$0xff] }
 0x113   : > { %1370 = vmatpush.bf16.msra.mxu3 %v2411_v12  ;;  %v869_v14 = vor.u32 %v868_v34, %v865_v33  ;;  %v936_v53 = vrot.slane %v2050_v22, 5  ;;  %v2442_v56 = vld [vmem:[#allocation8 + $0x108] sm:$0xff]  ;;  %v933_v59 = vsel %vm3173_vm11, %v2057_v38, %v932_v47  ;;  %v2048_v0 = vld [vmem:[%s3157_s21 + $0x20] sm:$0xf]  ;;  %v2063_v2 = vld [vmem:[%s3157_s21 + $0x8] sm:$0xf] }
 0x114   : > { %1170 = vmatpush.bf16.msra.mxu0 %v2437_v15  ;;  %v883_v45 = vor.u32 %v882_v36, %v879_v35  ;;  %v2047_v60 = vld [vmem:[%s3157_s21 + $0x18] sm:$0xf]  ;;  %v905_v5 = vshrl.u32 %v2048_v0, 16  ;;  %v2441_v6 = vld [vmem:[#allocation8 + $0x100] sm:$0xff]  ;;  %v966_v9 = vunpack.c.l.b16 %v933_v59  ;;  %v2037_v43 = vld [vmem:[%s3157_s21] sm:$0xf] }
 0x115   : > { %1189 = vmatpush.bf16.msra.mxu1 %v2445_v16  ;;  %v870_v50 = vrot.slane %v869_v14, 4  ;;  %v2450_v61 = vld [vmem:[#allocation8 + $0x148] sm:$0xff]  ;;  %v937_v63 = vsel %vm3173_vm11, %v2058_v52, %v936_v53  ;;  %v891_v3 = vshrl.u32 %v2047_v60, 16  ;;  %v894_v4 = vshll.u32 %v2047_v60, 16  ;;  %v2431_v7 = vld [vmem:[%s3157_s21 + $0xc] sm:$0xf0] }
 0x116   : > { %1208 = vmatpush.bf16.msra.mxu2 %v2453_v17  ;;  %v884_v54 = vrot.slane %v883_v45, 4  ;;  %v2407_v62 = vld [vmem:[#allocation8 + $0x8] sm:$0xff]  ;;  %v908_v10 = vshll.u32 %v2048_v0, 16  ;;  %v2449_v11 = vld [vmem:[#allocation8 + $0x140] sm:$0xff]  ;;  %v967_v12 = vunpack.c.l.b16 %v937_v63  ;;  %v2404_v20 = vld [vmem:[%s3157_s21 + $0x4] sm:$0xf0]  ;;  %v2064_v25 = vor.u32 %v2431_v7, %v2063_v2 }
 0x117   : > { %1371 = vmatpush.bf16.msra.mxu3 %v2410_v18  ;;  %v875_v57 = vsel %vm3167_vm10, %v870_v50, %v874_v44  ;;  %v2051_v15 = vld [vmem:[%s3157_s21 + $0x1c] sm:$0x1]  ;;  %v893_v16 = vrot.slane %v891_v3, 4  ;;  %v896_v17 = vrot.slane %v894_v4, 5  ;;  %v907_v18 = vrot.slane %v905_v5, 4  ;;  %v2406_v19 = vld [vmem:[#allocation8] sm:$0xff] }
 0x118   : > { %1171 = vmatpush.bf16.msra.mxu0 %v2436_v23  ;;  %v889_v58 = vsel %vm3167_vm10, %v884_v54, %v888_v46  ;;  %v958_v8 = vunpack.c.l.b16 %v875_v57  ;;  %v2052_v21 = vld [vmem:[%s3157_s21 + $0x24] sm:$0x1]  ;;  %v910_v22 = vrot.slane %v908_v10, 5  ;;  %v2421_v23 = vld [vmem:[#allocation8 + $0x78] sm:$0xff]  ;;  %v900_v13 = vshll.u32 %v2051_v15, 16  ;;  %v2419_v53 = vld [vmem:[#allocation8 + $0x68] sm:$0xff] }
 0x119   : > { %1190 = vmatpush.bf16.msra.mxu1 %v2444_v27  ;;  %v959_v40 = vunpack.c.l.b16 %v889_v58  ;;  %v2429_v24 = vld [vmem:[#allocation8 + $0xb8] sm:$0xff]  ;;  %v897_v27 = vor.u32 %v896_v17, %v893_v16  ;;  %v2055_v28 = vld [vmem:[%s3157_s21 + $0x18] sm:$0xe]  ;;  %v970_v29 = vpack.c.b16 %v967_v12, %v966_v9  ;;  %v2038_v30 = vor.u32 %v2404_v20, %v2037_v43  ;;  %v2056_v33 = vld [vmem:[%s3157_s21 + $0x20] sm:$0xe]  ;;  %s2385_s1 = sshll.u32 %s3402_s23, 3 }
 0x11a   : > { %1209 = vmatpush.bf16.msra.mxu2 %v2452_v31  ;;  %v911_v31 = vor.u32 %v910_v22, %v907_v18  ;;  %v2467_v34 = vld [vmem:[#allocation8 + $0x1b8] sm:$0xff]  ;;  %v2420_v36 = vld [vmem:[#allocation8 + $0x70] sm:$0xff]  ;;  %v2059_v14 = vrot.slane %v2055_v28, 9  ;;  %v940_v38 = vrot.slane %v2051_v15, 5  ;;  %v2060_v44 = vrot.slane %v2056_v33, 9  ;;  %v2427_v54 = vld [vmem:[#allocation8 + $0xa8] sm:$0xff]  ;;  %s1843_s9 = sadd.s32 %s2385_s1, %s2384_s22 }
 0x11b   : > { %1372 = vmatpush.bf16.msra.mxu3 %v2409_v32  ;;  %v962_v26 = vpack.c.b16 %v959_v40, %v958_v8  ;;  %v914_v32 = vshll.u32 %v2052_v21, 16  ;;  %v2475_v35 = vld [vmem:[#allocation8 + $0x1f8] sm:$0xff]  ;;  %v2428_v37 = vld [vmem:[#allocation8 + $0xb0] sm:$0xff]  ;;  %v944_v45 = vrot.slane %v2052_v21, 5  ;;  %v2465_v60 = vld [vmem:[#allocation8 + $0x1a8] sm:$0xff]  ;;  %s2386_s30 = sshll.u32 %s1843_s9, 2 }
 0x11c   : > { %1172 = vmatpush.bf16.msra.mxu0 %v2435_v39  ;;  %v898_v39 = vrot.slane %v897_v27, 4  ;;  %v912_v46 = vrot.slane %v911_v31, 4  ;;  %v2474_v50 = vld [vmem:[#allocation8 + $0x1f0] sm:$0xff]  ;;  %v677_v52 = vld [vmem:[%s3157_s21 + $0x8] sm:$0xf]  ;;  %v2418_v2 = vld [vmem:[#allocation8 + $0x60] sm:$0xff]  ;;  %s1845_s18 = scalar_lea.hbm %s3405_s15, %s2386_s30 }
 0x11d   : > { %1191 = vmatpush.bf16.msra.mxu1 %v2443_v41  ;;  %v902_v41 = vrot.slane %v900_v13, 5  ;;  %v916_v47 = vrot.slane %v914_v32, 5  ;;  %v945_v57 = vsel %vm3173_vm11, %v2060_v44, %v944_v45  ;;  %v705_v63 = vshll.u32 %v677_v52, 16  ;;  %v2263_v0 = vld [vmem:[%s3157_s21 + $0x10] sm:$0xf]  ;;  %v2463_v44 = vld [vmem:[#allocation8 + $0x198] sm:$0xff] }
 0x11e   : > { %1210 = vmatpush.bf16.msra.mxu2 %v2451_v48  ;;  %v676_v48 = vld [vmem:[%s3157_s21] sm:$0xf]  ;;  %v2264_v3 = vld [vmem:[%s3157_s21 + $0x18] sm:$0xf]  ;;  %v2426_v4 = vld [vmem:[#allocation8 + $0xa0] sm:$0xff]  ;;  %v969_v40 = vunpack.c.l.b16 %v945_v57  ;;  %v1438_v43 = vshrl.u32 %v2263_v0, 16 }
 0x11f   : > { %1373 = vmatpush.bf16.msra.mxu3 %v2408_v49  ;;  %v2466_v49 = vld [vmem:[#allocation8 + $0x1b0] sm:$0xff]  ;;  %v688_v58 = vshrl.u32 %v676_v48, 16  ;;  %v691_v59 = vshll.u32 %v676_v48, 16  ;;  %v2067_v5 = vld [vmem:[%s3157_s21 + $0x18] sm:$0xf]  ;;  %v2464_v10 = vld [vmem:[#allocation8 + $0x1a0] sm:$0xff] }
 0x120   : > { %1173 = vmatpush.bf16.msra.mxu0 %v2434_v55  ;;  %v941_v55 = vsel %vm3173_vm11, %v2059_v14, %v940_v38  ;;  %v3210_v9 = vld [vmem:[%s3157_s21 + $0x4] sm:$0x1]  ;;  %v2041_v15 = vld [vmem:[%s3157_s21 + $0x10] sm:$0xf]  ;;  %v1441_v18 = vshll.u32 %v2263_v0, 16  ;;  %v707_v22 = vrot.slane %v705_v63, 5 }
 0x121   : > { %1192 = vmatpush.bf16.msra.mxu1 %v2442_v56  ;;  %v903_v56 = vsel %vm3167_vm10, %v898_v39, %v902_v41  ;;  %v968_v8 = vunpack.c.l.b16 %v941_v55  ;;  %v690_v16 = vrot.slane %v688_v58, 4  ;;  %v693_v17 = vrot.slane %v691_v59, 5  ;;  %v3214_v20 = vld [vmem:[%s3157_s21 + $0xc] sm:$0x1]  ;;  %v743_v39 = vld [vmem:[%s3157_s21] sm:$0xe] }
 0x122   : > { %1211 = vmatpush.bf16.msra.mxu2 %v2450_v61  ;;  %v917_v61 = vsel %vm3167_vm10, %v912_v46, %v916_v47  ;;  %v960_v7 = vunpack.c.l.b16 %v903_v56  ;;  %v697_v27 = vshll.u32 %v3210_v9, 16  ;;  %v1440_v13 = vrot.slane %v1438_v43, 4  ;;  %v744_v41 = vld [vmem:[%s3157_s21 + $0x8] sm:$0xe]  ;;  %v2462_v55 = vld [vmem:[#allocation8 + $0x190] sm:$0xff]  ;;  %s1848_s12 = sshll.u32 %s1845_s18, 4  ;;  %s1849_s12 = int_to_ptr.hbm [resolvable:$true] %s1848_s12 }
 0x123   : > { %1374 = vmatpush.bf16.msra.mxu3 %v2407_v62  ;;  %v702_v62 = vshrl.u32 %v677_v52, 16  ;;  %v961_v12 = vunpack.c.l.b16 %v917_v61  ;;  %v1443_v28 = vrot.slane %v1441_v18, 5  ;;  %v694_v14 = vor.u32 %v693_v17, %v690_v16  ;;  %v2471_v45 = vld [vmem:[#allocation8 + $0x1d8] sm:$0xff]  ;;  %v2424_v52 = vld [vmem:[#allocation8 + $0x90] sm:$0xff]  ;;  %v678_v61 = vld [vmem:[%s3157_s21 + $0x10] sm:$0xf] }
 0x124   : > { %1174 = vmatpush.bf16.msra.mxu0 %v2433_v1  ;;  %v2473_v1 = vld [vmem:[#allocation8 + $0x1e8] sm:$0xff]  ;;  %v2470_v56 = vld [vmem:[#allocation8 + $0x1d0] sm:$0xff]  ;;  %v2031_v58 = vrot.slane %v743_v39, 9  ;;  %v2032_v59 = vrot.slane %v744_v41, 9  ;;  %v719_v43 = vshll.u32 %v678_v61, 16  ;;  %s1832_s23 = scalar_lea.sflag [#allocation5], %s343_s5 }
 0x125   : > { %1193 = vmatpush.bf16.msra.mxu1 %v2441_v6  ;;  %v2432_v6 = vld [vmem:[%s3157_s21 + $0x1c] sm:$0xf0]  ;;  %v704_v21 = vrot.slane %v702_v62, 4  ;;  %v1444_v46 = vor.u32 %v1443_v28, %v1440_v13  ;;  %v695_v62 = vrot.slane %v694_v14, 4  ;;  %v2461_v17 = vld [vmem:[#allocation8 + $0x188] sm:$0xff]  ;;  %v2460_v28 = vld [vmem:[#allocation8 + $0x180] sm:$0xff] }
 0x126   : > { %1212 = vmatpush.bf16.msra.mxu2 %v2449_v11  ;;  %v2472_v11 = vld [vmem:[#allocation8 + $0x1e0] sm:$0xff]  ;;  %v2068_v33 = vor.u32 %v2432_v6, %v2067_v5  ;;  %v2415_v5 = vld [vmem:[#allocation8 + $0x48] sm:$0xff]  ;;  %s2763_s22 = sshra.s32 %s1849_s12, 4  ;;  %s2764_s22 = int_to_ptr.hbm [resolvable:$true] %s2763_s22 }
 0x127   : > { %1375 = vmatpush.bf16.msra.mxu3 %v2406_v19  ;;  %1175 = vmatmul.bf16.vlgmr.msra.gmra.mxu0 %v2064_v25  ;;  %v2417_v19 = vld [vmem:[#allocation8 + $0x58] sm:$0xff]  ;;  %v2405_v25 = vld [vmem:[%s3157_s21 + $0x14] sm:$0xf0]  ;;  %v708_v38 = vor.u32 %v707_v22, %v704_v21  ;;  %v1445_v0 = vrot.slane %v1444_v46, 4  ;;  %v682_v39 = vld [vmem:[%s3157_s21 + $0x14] sm:$0x1]  ;;  %p2770_p2 = scmp.lt.s32.totalorder %s2764_s22, %s3405_s15 }
 0x128   : > { %1387 = vmatpush.bf16.msrb.mxu0 %v2421_v23  ;;  %1194 = vmatmul.bf16.vlgmr.msra.gmra.mxu1 %v962_v26  ;;  %v1452_v23 = vshrl.u32 %v2264_v3, 16  ;;  %v2425_v26 = vld [vmem:[#allocation8 + $0x98] sm:$0xff]  ;;  %v2423_v6 = vld [vmem:[#allocation8 + $0x88] sm:$0xff]  ;;  %s2765_s1 = scalar_lea.hbm %s2764_s22, 16 }
 0x129   : > { %1406 = vmatpush.bf16.msrb.mxu1 %v2429_v24  ;;  %1213 = vmatmul.bf16.vlgmr.msra.gmra.mxu2 %v970_v29  ;;  %v1455_v24 = vshll.u32 %v2264_v3, 16  ;;  %v3219_v29 = vld [vmem:[%s3157_s21 + $0x14] sm:$0x1]  ;;  %v709_v63 = vrot.slane %v708_v38, 4  ;;  %v2469_v18 = vld [vmem:[#allocation8 + $0x1c8] sm:$0xff]  ;;  %p2766_p1 = scmp.ne.s32.totalorder %s2764_s22, %s2765_s1 }
 0x12a   : > { %1376 = vmatmul.bf16.vlgmr.msra.gmra.mxu3 %v2038_v30  ;;  %1742 = vmatpush.bf16.msrb.mxu2 %v2467_v34  ;;  %v3222_v30 = vld [vmem:[%s3157_s21 + $0x1c] sm:$0x1]  ;;  %v1454_v31 = vrot.slane %v1452_v23, 4  ;;  %v963_v34 = vpack.c.b16 %v961_v12, %v960_v7  ;;  %v1447_v47 = vshll.u32 %v3219_v29, 16  ;;  %v2265_v7 = vld [vmem:[%s3157_s21 + $0x20] sm:$0xf] }
 0x12b   : > { %1761 = vmatpush.bf16.msrb.mxu3 %v2475_v35  ;;  %v1457_v32 = vrot.slane %v1455_v24, 5  ;;  %v711_v35 = vshll.u32 %v3214_v20, 16  ;;  %v1466_v21 = vshrl.u32 %v2265_v7, 16  ;;  %v1469_v22 = vshll.u32 %v2265_v7, 16  ;;  %v2414_v23 = vld [vmem:[#allocation8 + $0x40] sm:$0xff]  ;;  %p2767_p4 = pnand %p2766_p1, %p2994_p6 }
 0x12c   : > { %1388 = vmatpush.bf16.msrb.mxu0 %v2420_v36  ;;  %v971_v36 = vpack.c.b16 %v969_v40, %v968_v8  ;;  %v2422_v24 = vld [vmem:[#allocation8 + $0x80] sm:$0xff]  ;;  %v683_v41 = vld [vmem:[%s3157_s21 + $0x1c] sm:$0x1]  ;;  %v2458_v46 = vld [vmem:[%s3157_s21 + $0x14] sm:$0xf0] }
 0x12d   : > { %1407 = vmatpush.bf16.msrb.mxu1 %v2428_v37  ;;  %v2042_v37 = vor.u32 %v2405_v25, %v2041_v15  ;;  %v1458_v48 = vor.u32 %v1457_v32, %v1454_v31  ;;  %v713_v57 = vrot.slane %v711_v35, 5  ;;  %v2468_v31 = vld [vmem:[#allocation8 + $0x1c0] sm:$0xff]  ;;  %v2483_v35 = vld [vmem:[#allocation8 + $0x238] sm:$0xff]  ;;  %p2768_p0 = pneg %p2767_p4 }
 0x12e   : > { %1743 = vmatpush.bf16.msrb.mxu2 %v2466_v49  ;;  %v1461_v49 = vshll.u32 %v3222_v30, 16 }
 0x12f   : > { %1762 = vmatpush.bf16.msrb.mxu3 %v2474_v50  ;;  %v2416_v50 = vld [vmem:[#allocation8 + $0x50] sm:$0xff]  ;;  %v714_v12 = vsel %vm3167_vm10, %v709_v63, %v713_v57  ;;  %v739_v57 = vshll.u32 %v683_v41, 16 }
 0x130   : > { %1389 = vmatpush.bf16.msrb.mxu0 %v2419_v53  ;;  %v699_v53 = vrot.slane %v697_v27, 5  ;;  %v1463_v3 = vrot.slane %v1461_v49, 5  ;;  %v2482_v63 = vld [vmem:[#allocation8 + $0x230] sm:$0xff] }
 0x131   : > { %1408 = vmatpush.bf16.msrb.mxu1 %v2427_v54  ;;  %v760_v54 = vrot.slane %v3210_v9, 5  ;;  %v716_v9 = vshrl.u32 %v678_v61, 16 }
 0x132   : > { %1744 = vmatpush.bf16.msrb.mxu2 %v2465_v60  ;;  %v764_v60 = vrot.slane %v3214_v20, 5 }
 0x133   : > { %1763 = vmatpush.bf16.msrb.mxu3 %v2473_v1  ;;  %v1449_v1 = vrot.slane %v1447_v47, 5  ;;  %v761_v8 = vsel %vm3173_vm11, %v2031_v58, %v760_v54  ;;  %v1468_v47 = vrot.slane %v1466_v21, 4 }
 0x134   : > { %1390 = vmatpush.bf16.msrb.mxu0 %v2418_v2  ;;  %v1459_v2 = vrot.slane %v1458_v48, 4  ;;  %v765_v40 = vsel %vm3173_vm11, %v2032_v59, %v764_v60  ;;  %v794_v25 = vunpack.c.l.b16 %v761_v8  ;;  %v1471_v48 = vrot.slane %v1469_v22, 5  ;;  %v2480_v22 = vld [vmem:[#allocation8 + $0x220] sm:$0xff] }
 0x135   : > { %1409 = vmatpush.bf16.msrb.mxu1 %v2426_v4  ;;  %v679_v4 = vld [vmem:[%s3157_s21 + $0x18] sm:$0xf]  ;;  %v768_v8 = vrot.slane %v682_v39, 5 }
 0x136   : > { %1745 = vmatpush.bf16.msrb.mxu2 %v2464_v10  ;;  %v2266_v10 = vld [vmem:[%s3157_s21 + $0x28] sm:$0xf]  ;;  %v730_v15 = vshrl.u32 %v679_v4, 16  ;;  %v733_v16 = vshll.u32 %v679_v4, 16  ;;  %v1464_v20 = vsel %vm3167_vm10, %v1459_v2, %v1463_v3 }
 0x137   : > { %1764 = vmatpush.bf16.msrb.mxu3 %v2472_v11  ;;  %1180 = vmatmul.bf16.gmra.mxu0 %v2068_v33  ;;  %v700_v11 = vsel %vm3167_vm10, %v695_v62, %v699_v53  ;;  %v1480_v27 = vshrl.u32 %v2266_v10, 16  ;;  %v1483_v13 = vshll.u32 %v2266_v10, 16  ;;  %v787_v33 = vunpack.c.l.b16 %v714_v12  ;;  %v3255_v53 = vld [vmem:[%s3157_s21 + $0x2c] sm:$0x1]  ;;  %v745_v62 = vld [vmem:[%s3157_s21 + $0x10] sm:$0xe] }
 0x138   : > { %1391 = vmatpush.bf16.msrb.mxu0 %v2417_v19  ;;  %1199 = vmatmul.bf16.gmra.mxu1 %v963_v34  ;;  %v1450_v19 = vsel %vm3167_vm10, %v1445_v0, %v1449_v1  ;;  %v786_v32 = vunpack.c.l.b16 %v700_v11  ;;  %v2281_v34 = vld [vmem:[%s3157_s21 + $0x10] sm:$0xf]  ;;  %v1534_v38 = vunpack.c.l.b16 %v1464_v20  ;;  %v746_v0 = vld [vmem:[%s3157_s21 + $0x18] sm:$0xe]  ;;  %v1472_v1 = vor.u32 %v1471_v48, %v1468_v47 }
 0x139   : > { %1410 = vmatpush.bf16.msrb.mxu1 %v2425_v26  ;;  %1218 = vmatmul.bf16.gmra.mxu2 %v971_v36  ;;  %v795_v26 = vunpack.c.l.b16 %v765_v40  ;;  %v718_v36 = vrot.slane %v716_v9, 4  ;;  %v1533_v14 = vunpack.c.l.b16 %v1450_v19  ;;  %v1482_v49 = vrot.slane %v1480_v27, 4  ;;  %v2481_v11 = vld [vmem:[#allocation8 + $0x228] sm:$0xff] }
 0x13a   : > { %1381 = vmatmul.bf16.gmra.mxu3 %v2042_v37  ;;  %1746 = vmatpush.bf16.msrb.mxu2 %v2463_v44  ;;  %v721_v37 = vrot.slane %v719_v43, 5  ;;  %v732_v44 = vrot.slane %v730_v15, 4  ;;  %v790_v54 = vpack.c.b16 %v787_v33, %v786_v32  ;;  %v2282_v58 = vor.u32 %v2458_v46, %v2281_v34  ;;  %v2285_v32 = vld [vmem:[%s3157_s21 + $0x20] sm:$0xf]  ;;  %v2459_v33 = vld [vmem:[%s3157_s21 + $0x24] sm:$0xf0] }
 0x13b   : > { %1765 = vmatpush.bf16.msrb.mxu3 %v2471_v45  ;;  %v735_v45 = vrot.slane %v733_v16, 5  ;;  %v1537_v59 = vpack.c.b16 %v1534_v38, %v1533_v14  ;;  %v1489_v4 = vshll.u32 %v3255_v53, 16  ;;  %v2033_v7 = vrot.slane %v745_v62, 9  ;;  %v2479_v34 = vld [vmem:[#allocation8 + $0x218] sm:$0xff]  ;;  %v2478_v14 = vld [vmem:[#allocation8 + $0x210] sm:$0xff] }
 0x13c   : > { %1392 = vmatpush.bf16.msrb.mxu0 %v2416_v50  ;;  %v1485_v50 = vrot.slane %v1483_v13, 5  ;;  %v722_v60 = vor.u32 %v721_v37, %v718_v36  ;;  %v2034_v43 = vrot.slane %v746_v0, 9  ;;  %v772_v10 = vrot.slane %v683_v41, 5  ;;  %v2271_v38 = vld [vmem:[%s3157_s21 + $0x10] sm:$0xe] }
 0x13d   : > { %1411 = vmatpush.bf16.msrb.mxu1 %v2424_v52  ;;  %v3252_v52 = vld [vmem:[%s3157_s21 + $0x24] sm:$0x1]  ;;  %v736_v61 = vor.u32 %v735_v45, %v732_v44  ;;  %v1473_v12 = vrot.slane %v1472_v1, 4  ;;  %v769_v20 = vsel %vm3173_vm11, %v2033_v7, %v768_v8  ;;  %v2286_v37 = vor.u32 %v2459_v33, %v2285_v32  ;;  %v2273_v41 = vld [vmem:[%s3157_s21 + $0x20] sm:$0xe] }
 0x13e   : > { %1747 = vmatpush.bf16.msrb.mxu2 %v2462_v55  ;;  %v798_v55 = vpack.c.b16 %v795_v26, %v794_v25  ;;  %v1475_v2 = vshll.u32 %v3252_v52, 16  ;;  %v1486_v3 = vor.u32 %v1485_v50, %v1482_v49  ;;  %v723_v40 = vrot.slane %v722_v60, 4  ;;  %v2274_v44 = vld [vmem:[%s3157_s21 + $0x28] sm:$0xe] }
 0x13f   : > { %1766 = vmatpush.bf16.msrb.mxu3 %v2470_v56  ;;  %v725_v56 = vshll.u32 %v682_v39, 16  ;;  %v737_v9 = vrot.slane %v736_v61, 4  ;;  %v773_v21 = vsel %vm3173_vm11, %v2034_v43, %v772_v10  ;;  %v796_v27 = vunpack.c.l.b16 %v769_v20  ;;  %v2272_v39 = vld [vmem:[%s3157_s21 + $0x18] sm:$0xe] }
 0x140   : > { %1393 = vmatpush.bf16.msrb.mxu0 %v2415_v5  ;;  %v1477_v15 = vrot.slane %v1475_v2, 5  ;;  %v1487_v16 = vrot.slane %v1486_v3, 4  ;;  %v797_v13 = vunpack.c.l.b16 %v773_v21  ;;  %v1507_v45 = vrot.slane %v3219_v29, 5 }
 0x141   : > { %1412 = vmatpush.bf16.msrb.mxu1 %v2423_v6  ;;  %v727_v5 = vrot.slane %v725_v56, 5  ;;  %v741_v6 = vrot.slane %v739_v57, 5  ;;  %v1511_v46 = vrot.slane %v3222_v30, 5  ;;  %v1515_v47 = vrot.slane %v3252_v52, 5  ;;  %v2477_v56 = vld [vmem:[#allocation8 + $0x208] sm:$0xff]  ;;  %v2476_v57 = vld [vmem:[#allocation8 + $0x200] sm:$0xff] }
 0x142   : > { %1748 = vmatpush.bf16.msrb.mxu2 %v2461_v17  ;;  %v1491_v17 = vrot.slane %v1489_v4, 5  ;;  %v799_v36 = vpack.c.b16 %v797_v13, %v796_v27  ;;  %v1519_v48 = vrot.slane %v3255_v53, 5  ;;  %v2275_v49 = vrot.slane %v2271_v38, 9 }
 0x143   : > { %1767 = vmatpush.bf16.msrb.mxu3 %v2469_v18  ;;  %v728_v18 = vsel %vm3167_vm10, %v723_v40, %v727_v5  ;;  %v742_v19 = vsel %vm3167_vm10, %v737_v9, %v741_v6  ;;  %v2276_v50 = vrot.slane %v2272_v39, 9 }
 0x144   : > { %1394 = vmatpush.bf16.msrb.mxu0 %v2414_v23  ;;  %v1478_v23 = vsel %vm3167_vm10, %v1473_v12, %v1477_v15  ;;  %v788_v25 = vunpack.c.l.b16 %v728_v18  ;;  %v789_v26 = vunpack.c.l.b16 %v742_v19  ;;  %v1508_v29 = vsel %vm3173_vm11, %v2275_v49, %v1507_v45 }
 0x145   : > { %1413 = vmatpush.bf16.msrb.mxu1 %v2422_v24  ;;  %v1492_v24 = vsel %vm3167_vm10, %v1487_v16, %v1491_v17  ;;  %v1512_v30 = vsel %vm3173_vm11, %v2276_v50, %v1511_v46 }
 0x146   : > { %1749 = vmatpush.bf16.msrb.mxu2 %v2460_v28  ;;  %v1535_v28 = vunpack.c.l.b16 %v1478_v23 }
 0x147   : > { %1768 = vmatpush.bf16.msrb.mxu3 %v2468_v31  ;;  %1395 = vmatmul.bf16.vlgmr.msrb.gmra.mxu0 %v790_v54  ;;  %v1536_v31 = vunpack.c.l.b16 %v1492_v24  ;;  %v2277_v54 = vrot.slane %v2273_v41, 9 }
 0x148   : > { %1780 = vmatpush.bf16.msra.mxu0 %v2483_v35  ;;  %1414 = vmatmul.bf16.vlgmr.msrb.gmra.mxu1 %v798_v55  ;;  %v2278_v55 = vrot.slane %v2274_v44, 9 }
 0x149   : > { %2519 = vmatpush.bf16.msra.mxu1 %v2483_v35  ;;  %1750 = vmatmul.bf16.vlgmr.msrb.gmra.mxu2 %v2282_v58  ;;  %v791_v35 = vpack.c.b16 %v789_v26, %v788_v25  ;;  %v1538_v42 = vpack.c.b16 %v1536_v31, %v1535_v28  ;;  %v1516_v52 = vsel %vm3173_vm11, %v2277_v54, %v1515_v47  ;;  %v1541_v58 = vunpack.c.l.b16 %v1508_v29 }
 0x14a   : > { %1769 = vmatmul.bf16.vlgmr.msrb.gmra.mxu3 %v1537_v59  ;;  %v1520_v53 = vsel %vm3173_vm11, %v2278_v55, %v1519_v48  ;;  %v1542_v59 = vunpack.c.l.b16 %v1512_v30  ;;  %v1543_v60 = vunpack.c.l.b16 %v1516_v52 }
 0x14b   : > { %v1544_v61 = vunpack.c.l.b16 %v1520_v53 }
 0x14c   : > { %1781 = vmatpush.bf16.msra.mxu0 %v2482_v63  ;;  %v1545_v62 = vpack.c.b16 %v1542_v59, %v1541_v58 }
 0x14d   : > { %2520 = vmatpush.bf16.msra.mxu1 %v2482_v63  ;;  %v1546_v63 = vpack.c.b16 %v1544_v61, %v1543_v60 }
 0x150   : > { %1782 = vmatpush.bf16.msra.mxu0 %v2481_v11 }
 0x151   : > { %2521 = vmatpush.bf16.msra.mxu1 %v2481_v11 }
 0x154   : > { %1783 = vmatpush.bf16.msra.mxu0 %v2480_v22 }
 0x155   : > { %2522 = vmatpush.bf16.msra.mxu1 %v2480_v22 }
 0x157   : > { %1400 = vmatmul.bf16.gmra.mxu0 %v791_v35 }
 0x158   : > { %1784 = vmatpush.bf16.msra.mxu0 %v2479_v34  ;;  %1419 = vmatmul.bf16.gmra.mxu1 %v799_v36 }
 0x159   : > { %2523 = vmatpush.bf16.msra.mxu1 %v2479_v34  ;;  %1755 = vmatmul.bf16.gmra.mxu2 %v2286_v37 }
 0x15a   : > { %1774 = vmatmul.bf16.gmra.mxu3 %v1538_v42 }
 0x15c   : > { %1785 = vmatpush.bf16.msra.mxu0 %v2478_v14 }
 0x15d   : > { %2524 = vmatpush.bf16.msra.mxu1 %v2478_v14 }
 0x160   : > { %1786 = vmatpush.bf16.msra.mxu0 %v2477_v56 }
 0x161   : > { %2525 = vmatpush.bf16.msra.mxu1 %v2477_v56 }
 0x164   : > { %1787 = vmatpush.bf16.msra.mxu0 %v2476_v57 }
 0x165   : > { %2526 = vmatpush.bf16.msra.mxu1 %v2476_v57  ;;  %v2657_v57 = vld [vmem:[%s3403_s4] ss:$0 sm:$0xff]  ;;  %s2769_s4 = scalar_lea.hbm %s3405_s15, 64 }
 0x166   : > { %p2771_p3 = scmp.lt.s32.totalorder %s2769_s4, %s2765_s1 }
 0x167   : > { %1788 = vmatmul.bf16.vlgmr.msra.gmra.mxu0 %v1545_v62 }
 0x168   : > { %1793 = vmatmul.bf16.vlgmr.msra.gmra.mxu1 %v1546_v63  ;;  %p2772_p5 = por %p2771_p3, %p2770_p2 }
 0x16a   : > { %p2773_p7 = pnand %p2772_p5, %p2768_p0 }
 0x1a4   : > { %v1176_v0 = vpop.f32.mrf.mxu0 }
 0x1a5   : > { %v1195_v1 = vpop.f32.mrf.mxu1 }
 0x1a6   : > { %v1196_v25 = vadd.f32 %v1195_v1, %v1176_v0 }
 0x1ac   : > { %v1214_v2 = vpop.f32.mrf.mxu2  ;;  %v1178_v4 = vpop.f32.mrf.mxu0 }
 0x1ad   : > { %v1377_v3 = vpop.f32.mrf.mxu3  ;;  %v1197_v51 = vpop.f32.mrf.mxu1  ;;  %v1215_v28 = vadd.f32 %v1214_v2, %v1196_v25  ;;  %v2658_v2 = vld [vmem:[%s3404_s17] ss:$0 sm:$0xff] }
 0x1ae   : > { %v1198_v34 = vadd.f32 %v1197_v51, %v1178_v4 }
 0x1af   : > { %v1378_v36 = vadd.f32 %v1377_v3, %v1215_v28 }
 0x1b4   : > { %v1216_v5 = vpop.f32.mrf.mxu2  ;;  %v1181_v7 = vpop.f32.mrf.mxu0 }
 0x1b5   : > { %v1379_v6 = vpop.f32.mrf.mxu3  ;;  %v1200_v8 = vpop.f32.mrf.mxu1  ;;  %v1217_v14 = vadd.f32 %v1216_v5, %v1198_v34 }
 0x1b6   : > { %v1201_v26 = vadd.f32 %v1200_v8, %v1181_v7 }
 0x1b7   : > { %v1380_v49 = vadd.f32 %v1379_v6, %v1217_v14 }
 0x1bc   : > { %v1219_v40 = vpop.f32.mrf.mxu2  ;;  %v1183_v43 = vpop.f32.mrf.mxu0 }
 0x1bd   : > { %v1382_v9 = vpop.f32.mrf.mxu3  ;;  %v1202_v10 = vpop.f32.mrf.mxu1  ;;  %v1220_v31 = vadd.f32 %v1219_v40, %v1201_v26 }
 0x1be   : > { %v1203_v35 = vadd.f32 %v1202_v10, %v1183_v43 }
 0x1bf   : > { %v1383_v37 = vadd.f32 %v1382_v9, %v1220_v31 }
 0x1c4   : > { %v1221_v11 = vpop.f32.mrf.mxu2  ;;  %v1396_v15 = vpop.f32.mrf.mxu0 }
 0x1c5   : > { %v1384_v12 = vpop.f32.mrf.mxu3  ;;  %v1415_v16 = vpop.f32.mrf.mxu1  ;;  %v1222_v38 = vadd.f32 %v1221_v11, %v1203_v35  ;;  %v1397_v39 = vadd.f32 %v1396_v15, %v1378_v36 }
 0x1c7   : > { %v1385_v50 = vadd.f32 %v1384_v12, %v1222_v38  ;;  %v1416_v54 = vadd.f32 %v1415_v16, %v1397_v39 }
 0x1cc   : > { %v1751_v17 = vpop.f32.mrf.mxu2  ;;  %v1398_v19 = vpop.f32.mrf.mxu0 }
 0x1cd   : > { %v1770_v18 = vpop.f32.mrf.mxu3  ;;  %v1417_v20 = vpop.f32.mrf.mxu1  ;;  %v1399_v56 = vadd.f32 %v1398_v19, %v1380_v49 }
 0x1ce   : > { %v1771_v41 = vadd.f32 %v1770_v18, %v1751_v17 }
 0x1cf   : > { %v1418_v61 = vadd.f32 %v1417_v20, %v1399_v56 }
 0x1d4   : > { %v1753_v21 = vpop.f32.mrf.mxu2  ;;  %v1401_v23 = vpop.f32.mrf.mxu0 }
 0x1d5   : > { %v1772_v22 = vpop.f32.mrf.mxu3  ;;  %v1420_v24 = vpop.f32.mrf.mxu1  ;;  %v1402_v44 = vadd.f32 %v1401_v23, %v1383_v37 }
 0x1d6   : > { %v1773_v59 = vadd.f32 %v1772_v22, %v1753_v21 }
 0x1d7   : > { %v1421_v55 = vadd.f32 %v1420_v24, %v1402_v44 }
 0x1dc   : > { %v1403_v27 = vpop.f32.mrf.mxu0  ;;  %v1756_v32 = vpop.f32.mrf.mxu2 }
 0x1dd   : > { %v1422_v13 = vpop.f32.mrf.mxu1  ;;  %v1775_v33 = vpop.f32.mrf.mxu3  ;;  %v1404_v29 = vadd.f32 %v1403_v27, %v1385_v50 }
 0x1de   : > { %v1776_v42 = vadd.f32 %v1775_v33, %v1756_v32 }
 0x1df   : > { %v1423_v62 = vadd.f32 %v1422_v13, %v1404_v29 }
 0x1e4   : > { %v1789_v45 = vpop.f32.mrf.mxu0  ;;  %v1758_v30 = vpop.f32.mrf.mxu2 }
 0x1e5   : > { %v1794_v46 = vpop.f32.mrf.mxu1  ;;  %v1790_v47 = vadd.f32 %v1789_v45, %v1771_v41  ;;  %v1777_v52 = vpop.f32.mrf.mxu3 }
 0x1e6   : > { %v1795_v48 = vadd.f32 %v1794_v46, %v1776_v42  ;;  %v1778_v60 = vadd.f32 %v1777_v52, %v1758_v30 }
 0x1e7   : > { %v1799_v53 = vadd.f32 %v1790_v47, %v1416_v54 }
 0x1e8   : > { %v1801_v58 = vadd.f32 %v1795_v48, %v1421_v55 }
 0x1e9   : > { %v1807_v1 = vmul.f32 %v2657_v57, %v1799_v53 }
 0x1ea   : > { %v1809_v3 = vmul.f32 %v2657_v57, %v1801_v58 }
 0x1eb   : > { %v1815_v7 = vadd.f32 %v2658_v2, %v1807_v1 }
 0x1ec   : > { %v1791_v63 = vpop.f32.mrf.mxu0  ;;  %v1817_v8 = vadd.f32 %v2658_v2, %v1809_v3 }
 0x1ed   : > { %v1796_v0 = vpop.f32.mrf.mxu1  ;;  %v1792_v4 = vadd.f32 %v1791_v63, %v1773_v59  ;;  %v1819_v11 = vmax.f32 %v1815_v7, 0.0 }
 0x1ee   : > { %v1797_v51 = vadd.f32 %v1796_v0, %v1778_v60  ;;  %v1821_v12 = vmax.f32 %v1817_v8, 0.0 }
 0x1ef   : > { %v1800_v5 = vadd.f32 %v1792_v4, %v1418_v61 }
 0x1f0   : > { %v1802_v6 = vadd.f32 %v1797_v51, %v1423_v62 }
 0x1f1   : > { %v1808_v40 = vmul.f32 %v2657_v57, %v1800_v5 }
 0x1f2   : > { %v1810_v9 = vmul.f32 %v2657_v57, %v1802_v6 }
 0x1f3   : > { %v1816_v43 = vadd.f32 %v2658_v2, %v1808_v40 }
 0x1f4   : > { %v1818_v10 = vadd.f32 %v2658_v2, %v1810_v9 }
 0x1f5   : > { %v1820_v15 = vmax.f32 %v1816_v43, 0.0 }
 0x1f6   : > { %v1822_v16 = vmax.f32 %v1818_v10, 0.0 }
 0x1f7   : > { %v2487_v17 = vpack.c.bf16 %v1820_v15, %v1819_v11 }
 0x1f8   : > { %v2492_v18 = vpack.c.bf16 %v1822_v16, %v1821_v12 }
 0x1f9   : > { %2488 = vst [vmem:[%s3079_s8] sm:$0xff] %v2487_v17  }
 0x1fa   : > { %2494 = vst [vmem:[%s3079_s8 + $0x8] sm:$0xff] %v2492_v18  }
 0x1fb   : > { %2776 = shalt.err (!%p2773_p7)
}
 0x1fc   : > { %s2882_s5 = smov 64   ;;  %s2883_s8 = smov 4  }
 0x1fd   : > { %2537 = dma.vmem_to_hbm [thread:$0]  (%p2994_p6), %s1847_s20, 256, %s1849_s12, %s1832_s23, %s2882_s5, %s2882_s5, %s2883_s8  }
 0x1fe PF: > { %s3407_s7 = sld [smem:[#allocation13_spill]]  ;;  %p2559_p8 = scmp.ge.s32.totalorder %s2875_s11, 2 }
 0x200   : > { %p2551_p9 = pnand %p2559_p8, %p3000_p10 }
 0x202   : > { %p2552_p12 = pneg %p2551_p9 }
 0x204   : > { %s1863_s30 = sand.u32 1, %s3407_s7  }
 0x205   : > { %s1864_s6 = scalar_lea.sflag [#allocation5], %s1863_s30 }
 0x206   : > { %2830 = dma.done.wait (%p2552_p12), %s1864_s6, 256  }
 0x207   : > { %2832 = vsyncadd (%p2552_p12), %s1864_s6, 4294967040  ;;  %s24_s11 = sadd.s32 1, %s2875_s11   ;;  %s3409_s14 = smov %s3048_s24 }
 0x208   : > { %p21_p13 = scmp.ge.s32.totalorder %s24_s11, 6   ;;  %s3410_s30 = sld [smem:[#allocation15_spill]] }
 0x209   : > { %s3411_s9 = sld [smem:[#allocation18_spill]]  ;;  %s3413_s24 = smov %s2839_s25 }
 0x20a   : > { %s3412_s18 = sld [smem:[#allocation19_spill]]  ;;  %s3414_s25 = smov %s2843_s26 }
 0x20b   : > { %s3415_s26 = smov %s3051_s27  ;;  %s3416_s27 = smov %s2851_s28 }
 0x20c   : > { %s3417_s28 = smov %s2855_s29  ;;  %s3418_s29 = smov %s3409_s14 }
 0x20d   : > { %s3419_s8 = smov %s2871_s10  ;;  %23 = sbr.rel (!%p21_p13) target bundleno = 16 (0x10), region = 111 }
 0x210   : > { %s3420_s10 = smov %s3412_s18 }
 0x212   :  { %1870 = vsyncpa [#allocation4], 1 }
 0x213   :  { %1872 = vsyncpa [#allocation4 + $0x1], 1 }
 0x214   :  { %1873 = vsyncpa [#allocation7], 1 }
 0x215   :  { %1874 = vsyncpa [#allocation5], 1 }
 0x216   :  { %1876 = vsyncpa [#allocation5 + $0x1], 1 }

</bundles_post_ra>
